<compile_context>
chip_gen: v5e
topology: v5e:2x2
jax: 0.10.0
libtpu: 0.0.40
codegen_flags: <defaults>
</compile_context>

<pallas_src>
import jax
import jax.numpy as jnp
from jax.experimental import pallas as pl
from jax.experimental.pallas import tpu as pltpu


# ------------------------------ Pallas kernel -------------------------------

def _make_fused_conv_kernel(Cin, C1, C2, Do, Ho, Wo, Kp):
    """Per-batch fused (conv1 + BN1 + ReLU + conv2 + BN2 + ReLU) kernel."""
    M = Do * Ho * Wo
    R = Ho * Wo + Wo + 1                      # max |flattened tap offset|
    offs = [(kd - 1) * Ho * Wo + (kh - 1) * Wo + (kw - 1)
            for kd in range(3) for kh in range(3) for kw in range(3)]
    K1, K2 = 27 * Cin, 27 * C1
    Kmin = min(K1, K2)

    def kernel(x_ref, m_ref, w1_ref, t1_ref, w2_ref, t2_ref, o_ref,
               xe1, xe2, p):
        # Zero the padded tail of the patch matrix once per step (the padded weight
        # columns are zero, but uninitialized VMEM could hold NaNs).
        if Kmin < Kp:
            p[Kmin:Kp, :] = jnp.zeros((Kp - Kmin, M), jnp.float32)

        # Stage conv1 input into a halo-extended buffer: zeros on both sides,
        # the flattened per-batch volume in the middle.
        xe1[:, 0:R] = jnp.zeros((Cin, R), jnp.float32)
        xe1[:, R + M:R + M + R] = jnp.zeros((Cin, R), jnp.float32)
        xe1[:, R:R + M] = x_ref[0]

        def conv_bn_relu(src, cin, w_ref, t_ref):
            # In-VMEM im2col: 27 statically shifted lane views x boundary masks.
            for ti, o in enumerate(offs):
                p[ti * cin:(ti + 1) * cin, :] = (
                    src[:, R + o:R + o + M] * m_ref[ti:ti + 1, :])
            acc = jnp.dot(w_ref[...], p[...],
                          preferred_element_type=jnp.float32)     # (Cout, M)
            return jnp.maximum(acc + t_ref[...], 0.0)

        h = conv_bn_relu(xe1, Cin, w1_ref, t1_ref)                # (C1, M)

        # Stage conv2 input (conv1 output stays in VMEM, never hits HBM).
        xe2[:, 0:R] = jnp.zeros((C1, R), jnp.float32)
        xe2[:, R + M:R + M + R] = jnp.zeros((C1, R), jnp.float32)
        xe2[:, R:R + M] = h

        y = conv_bn_relu(xe2, C1, w2_ref, t2_ref)                 # (C2, M)
        o_ref[0] = y.astype(o_ref.dtype)

    return kernel


# ------------------------------ module forward ------------------------------

def unet3d_down_forward(x_ncdhw, params, eps=1e-5):
    # MaxPool3d(2, stride=2): XLA reduce_window on native NCDHW (floors odd dims,
    # same as PyTorch).
    xp = jax.lax.reduce_window(x_ncdhw, -jnp.inf, jax.lax.max,
                               (1, 1, 2, 2, 2), (1, 1, 2, 2, 2), "VALID")
    N, Cin, Do, Ho, Wo = xp.shape
    M = Do * Ho * Wo
    xflat = xp.reshape(N, Cin, M)                 # zero-cost row-major reshape

    w1, b1 = params["conv1"]
    g1, be1, mu1, v1 = params["bn1"]
    w2, b2 = params["conv2"]
    g2, be2, mu2, v2 = params["bn2"]
    C1, C2 = w1.shape[0], w2.shape[0]
    K1, K2 = 27 * Cin, 27 * C1
    Kp = 128 * pl.cdiv(max(K1, K2), 128)          # pad contraction dim to lane multiple

    def fold(w, b, g, beta, mu, var):
        # (Cout, Cin, 3,3,3) -> (Cout, 27*Cin), K ordered (kd, kh, kw, cin).
        # Fold BN scale into the weight; fold conv bias + BN shift into t.
        cout, cin = w.shape[0], w.shape[1]
        wm = w.transpose(0, 2, 3, 4, 1).reshape(cout, 27 * cin)
        inv = g / jnp.sqrt(var + eps)
        wm = wm * inv[:, None]
        t = ((b - mu) * inv + beta)[:, None]                      # (Cout, 1)
        wm = jnp.pad(wm, ((0, 0), (0, Kp - 27 * cin)))
        return wm.astype(jnp.float32), t.astype(jnp.float32)

    w1m, t1 = fold(w1, b1, g1, be1, mu1, v1)
    w2m, t2 = fold(w2, b2, g2, be2, mu2, v2)

    # 27 per-tap boundary masks: 1 where the tap reads a real voxel, 0 where the
    # PyTorch conv would read zero padding (also kills cross-row wrap of the shifts).
    m_idx = jnp.arange(M, dtype=jnp.int32)
    d_i = m_idx // (Ho * Wo)
    h_i = (m_idx // Wo) % Ho
    w_i = m_idx % Wo
    masks = []
    for kd in range(3):
        for kh in range(3):
            for kw in range(3):
                ok = ((d_i + (kd - 1) >= 0) & (d_i + (kd - 1) < Do) &
                      (h_i + (kh - 1) >= 0) & (h_i + (kh - 1) < Ho) &
                      (w_i + (kw - 1) >= 0) & (w_i + (kw - 1) < Wo))
                masks.append(ok)
    masks = jnp.stack(masks, axis=0).astype(jnp.float32)          # (27, M)

    R = Ho * Wo + Wo + 1
    kernel = _make_fused_conv_kernel(Cin, C1, C2, Do, Ho, Wo, Kp)

    out = pl.pallas_call(
        kernel,
        out_shape=jax.ShapeDtypeStruct((N, C2, M), jnp.float32),
        grid=(N,),
        in_specs=[
            pl.BlockSpec((1, Cin, M), lambda n: (n, 0, 0)),      # per-batch volume
            pl.BlockSpec((27, M), lambda n: (0, 0)),             # boundary masks (resident)
            pl.BlockSpec((C1, Kp), lambda n: (0, 0)),            # folded conv1 weight
            pl.BlockSpec((C1, 1), lambda n: (0, 0)),             # conv1 bias/BN shift
            pl.BlockSpec((C2, Kp), lambda n: (0, 0)),            # folded conv2 weight
            pl.BlockSpec((C2, 1), lambda n: (0, 0)),             # conv2 bias/BN shift
        ],
        out_specs=pl.BlockSpec((1, C2, M), lambda n: (n, 0, 0)),
        scratch_shapes=[
            pltpu.VMEM((Cin, M + 2 * R), jnp.float32),           # halo-extended input
            pltpu.VMEM((C1, M + 2 * R), jnp.float32),            # halo-extended conv1 out
            pltpu.VMEM((Kp, M), jnp.float32),                    # im2col patch matrix
        ],
        compiler_params=pltpu.CompilerParams(
            dimension_semantics=("parallel",)),                  # 2 TCs on v7x
    )(xflat, masks, w1m, t1, w2m, t2)

    return out.reshape(N, C2, Do, Ho, Wo)                        # already NCDHW


# --------------------------------- params -----------------------------------

def init_params(key, in_channels, out_channels):
    inter = in_channels // 2 if in_channels > out_channels else out_channels // 2

    def conv_init(k, cin, cout):
        kw, kb = jax.random.split(k)
        bound = 1.0 / jnp.sqrt(cin * 27.0)
        w = jax.random.uniform(kw, (cout, cin, 3, 3, 3), jnp.float32, -bound, bound)
        b = jax.random.uniform(kb, (cout,), jnp.float32, -bound, bound)
        return w, b

    def bn_init(k, c):
        k1, k2, k3, k4 = jax.random.split(k, 4)
        gamma = 1.0 + 0.1 * jax.random.normal(k1, (c,), jnp.float32)
        beta = 0.1 * jax.random.normal(k2, (c,), jnp.float32)
        mean = 0.1 * jax.random.normal(k3, (c,), jnp.float32)
        var = jnp.abs(1.0 + 0.1 * jax.random.normal(k4, (c,), jnp.float32))
        return gamma, beta, mean, var

    k1, k2, k3, k4 = jax.random.split(key, 4)
    return {
        "conv1": conv_init(k1, in_channels, inter),
        "bn1": bn_init(k2, inter),
        "conv2": conv_init(k3, inter, out_channels),
        "bn2": bn_init(k4, out_channels),
    }


# --------------------------- pure-JAX reference -----------------------------

def reference_forward(x, params, eps=1e-5):
    y = jax.lax.reduce_window(x, -jnp.inf, jax.lax.max,
                              (1, 1, 2, 2, 2), (1, 1, 2, 2, 2), "VALID")

    def block(y, w, b, gamma, beta, mean, var):
        out = jax.lax.conv_general_dilated(
            y, w, window_strides=(1, 1, 1),
            padding=((1, 1), (1, 1), (1, 1)),
            dimension_numbers=("NCDHW", "OIDHW", "NCDHW"),
            precision=jax.lax.Precision.HIGHEST)
        rs = lambda a: a.reshape(1, -1, 1, 1, 1)
        out = out + rs(b)
        out = (out - rs(mean)) / jnp.sqrt(rs(var) + eps) * rs(gamma) + rs(beta)
        return jnp.maximum(out, 0.0)

    y = block(y, *params["conv1"], *params["bn1"])
    y = block(y, *params["conv2"], *params["bn2"])
    return y


# ------------------------------------ main -----------------------------------

if __name__ == "__main__":
    key = jax.random.PRNGKey(0)
    kx, kp = jax.random.split(key)

    N, Cin, Cout, D, H, W = 2, 4, 8, 16, 16, 16
    x = jax.random.normal(kx, (N, Cin, D, H, W), jnp.float32)
    params = init_params(kp, Cin, Cout)

    out = jax.block_until_ready(jax.jit(unet3d_down_forward)(x, params))
    ref = jax.block_until_ready(reference_forward(x, params))

    assert out.shape == (N, Cout, D // 2, H // 2, W // 2), out.shape
    assert jnp.allclose(out, ref, atol=1e-4, rtol=1e-4), float(jnp.max(jnp.abs(out - ref)))

    print("KERNEL_OK")
</pallas_src>

<mosaic_0001>
module attributes {stable_mosaic.version = 11 : i64} {
  func.func @kernel(%arg0: i32, %arg1: memref<1x4x512xf32, #tpu.memory_space<vmem>>, %arg2: memref<27x512xf32, #tpu.memory_space<vmem>>, %arg3: memref<4x128xf32, #tpu.memory_space<vmem>>, %arg4: memref<4x1xf32, #tpu.memory_space<vmem>>, %arg5: memref<8x128xf32, #tpu.memory_space<vmem>>, %arg6: memref<8x1xf32, #tpu.memory_space<vmem>>, %arg7: memref<1x8x512xf32, #tpu.memory_space<vmem>>, %arg8: memref<4x658xf32, #tpu.memory_space<vmem>>, %arg9: memref<4x658xf32, #tpu.memory_space<vmem>>, %arg10: memref<128x512xf32, #tpu.memory_space<vmem>>) attributes {dimension_semantics = [#tpu.dimension_semantics<parallel>], iteration_bounds = array<i64: 2>, scalar_prefetch = 0 : i64, scratch_operands = 3 : i64, tpu.core_type = #tpu.core_type<tc>, window_params = [{transform_indices = @transform_0, window_bounds = array<i64: 1, 4, 512>}, {pipeline_mode = #tpu.pipeline_mode<synchronous>, transform_indices = @transform_1, window_bounds = array<i64: 27, 512>}, {pipeline_mode = #tpu.pipeline_mode<synchronous>, transform_indices = @transform_2, window_bounds = array<i64: 4, 128>}, {pipeline_mode = #tpu.pipeline_mode<synchronous>, transform_indices = @transform_3, window_bounds = array<i64: 4, 1>}, {pipeline_mode = #tpu.pipeline_mode<synchronous>, transform_indices = @transform_4, window_bounds = array<i64: 8, 128>}, {pipeline_mode = #tpu.pipeline_mode<synchronous>, transform_indices = @transform_5, window_bounds = array<i64: 8, 1>}, {transform_indices = @transform_6, window_bounds = array<i64: 1, 8, 512>}]} {
    %cst = arith.constant 0.000000e+00 : f32
    %0 = vector.broadcast %cst : f32 to vector<20x512xf32>
    %c108 = arith.constant 108 : index
    %c0 = arith.constant 0 : index
    %1 = vector.load %arg10[%c108, %c0] : memref<128x512xf32, #tpu.memory_space<vmem>>, vector<20x512xf32>
    tpu.vector_store %arg10[%c108, %c0], %0 {strides = array<i32>} : memref<128x512xf32, #tpu.memory_space<vmem>>, vector<20x512xf32>,
    %cst_0 = arith.constant 0.000000e+00 : f32
    %2 = vector.broadcast %cst_0 : f32 to vector<4x73xf32>
    %c0_1 = arith.constant 0 : index
    %c0_2 = arith.constant 0 : index
    %3 = vector.load %arg8[%c0_1, %c0_2] : memref<4x658xf32, #tpu.memory_space<vmem>>, vector<4x73xf32>
    tpu.vector_store %arg8[%c0_1, %c0_2], %2 {strides = array<i32>} : memref<4x658xf32, #tpu.memory_space<vmem>>, vector<4x73xf32>,
    %cst_3 = arith.constant 0.000000e+00 : f32
    %4 = vector.broadcast %cst_3 : f32 to vector<4x73xf32>
    %c0_4 = arith.constant 0 : index
    %c585 = arith.constant 585 : index
    %5 = vector.load %arg8[%c0_4, %c585] : memref<4x658xf32, #tpu.memory_space<vmem>>, vector<4x73xf32>
    tpu.vector_store %arg8[%c0_4, %c585], %4 {strides = array<i32>} : memref<4x658xf32, #tpu.memory_space<vmem>>, vector<4x73xf32>,
    %c0_5 = arith.constant 0 : index
    %c0_6 = arith.constant 0 : index
    %c0_7 = arith.constant 0 : index
    %6 = vector.load %arg1[%c0_5, %c0_6, %c0_7] : memref<1x4x512xf32, #tpu.memory_space<vmem>>, vector<1x4x512xf32>
    %7 = vector.shape_cast %6 : vector<1x4x512xf32> to vector<4x512xf32>
    %c0_8 = arith.constant 0 : index
    %c73 = arith.constant 73 : index
    %8 = vector.load %arg8[%c0_8, %c73] : memref<4x658xf32, #tpu.memory_space<vmem>>, vector<4x512xf32>
    tpu.vector_store %arg8[%c0_8, %c73], %7 {strides = array<i32>} : memref<4x658xf32, #tpu.memory_space<vmem>>, vector<4x512xf32>,
    %c0_9 = arith.constant 0 : index
    %c0_10 = arith.constant 0 : index
    %9 = vector.load %arg8[%c0_9, %c0_10] : memref<4x658xf32, #tpu.memory_space<vmem>>, vector<4x512xf32>
    %c0_11 = arith.constant 0 : index
    %c0_12 = arith.constant 0 : index
    %10 = vector.load %arg2[%c0_11, %c0_12] : memref<27x512xf32, #tpu.memory_space<vmem>>, vector<1x512xf32>
    %11 = vector.broadcast %10 : vector<1x512xf32> to vector<4x512xf32>
    %12 = arith.mulf %9, %11 : vector<4x512xf32>
    %c0_13 = arith.constant 0 : index
    %c0_14 = arith.constant 0 : index
    %13 = vector.load %arg10[%c0_13, %c0_14] : memref<128x512xf32, #tpu.memory_space<vmem>>, vector<4x512xf32>
    tpu.vector_store %arg10[%c0_13, %c0_14], %12 {strides = array<i32>} : memref<128x512xf32, #tpu.memory_space<vmem>>, vector<4x512xf32>,
    %c0_15 = arith.constant 0 : index
    %c1 = arith.constant 1 : index
    %14 = vector.load %arg8[%c0_15, %c1] : memref<4x658xf32, #tpu.memory_space<vmem>>, vector<4x512xf32>
    %c1_16 = arith.constant 1 : index
    %c0_17 = arith.constant 0 : index
    %15 = vector.load %arg2[%c1_16, %c0_17] : memref<27x512xf32, #tpu.memory_space<vmem>>, vector<1x512xf32>
    %16 = vector.broadcast %15 : vector<1x512xf32> to vector<4x512xf32>
    %17 = arith.mulf %14, %16 : vector<4x512xf32>
    %c4 = arith.constant 4 : index
    %c0_18 = arith.constant 0 : index
    %18 = vector.load %arg10[%c4, %c0_18] : memref<128x512xf32, #tpu.memory_space<vmem>>, vector<4x512xf32>
    tpu.vector_store %arg10[%c4, %c0_18], %17 {strides = array<i32>} : memref<128x512xf32, #tpu.memory_space<vmem>>, vector<4x512xf32>,
    %c0_19 = arith.constant 0 : index
    %c2 = arith.constant 2 : index
    %19 = vector.load %arg8[%c0_19, %c2] : memref<4x658xf32, #tpu.memory_space<vmem>>, vector<4x512xf32>
    %c2_20 = arith.constant 2 : index
    %c0_21 = arith.constant 0 : index
    %20 = vector.load %arg2[%c2_20, %c0_21] : memref<27x512xf32, #tpu.memory_space<vmem>>, vector<1x512xf32>
    %21 = vector.broadcast %20 : vector<1x512xf32> to vector<4x512xf32>
    %22 = arith.mulf %19, %21 : vector<4x512xf32>
    %c8 = arith.constant 8 : index
    %c0_22 = arith.constant 0 : index
    %23 = vector.load %arg10[%c8, %c0_22] : memref<128x512xf32, #tpu.memory_space<vmem>>, vector<4x512xf32>
    tpu.vector_store %arg10[%c8, %c0_22], %22 {strides = array<i32>} : memref<128x512xf32, #tpu.memory_space<vmem>>, vector<4x512xf32>,
    %c0_23 = arith.constant 0 : index
    %c8_24 = arith.constant 8 : index
    %24 = vector.load %arg8[%c0_23, %c8_24] : memref<4x658xf32, #tpu.memory_space<vmem>>, vector<4x512xf32>
    %c3 = arith.constant 3 : index
    %c0_25 = arith.constant 0 : index
    %25 = vector.load %arg2[%c3, %c0_25] : memref<27x512xf32, #tpu.memory_space<vmem>>, vector<1x512xf32>
    %26 = vector.broadcast %25 : vector<1x512xf32> to vector<4x512xf32>
    %27 = arith.mulf %24, %26 : vector<4x512xf32>
    %c12 = arith.constant 12 : index
    %c0_26 = arith.constant 0 : index
    %28 = vector.load %arg10[%c12, %c0_26] : memref<128x512xf32, #tpu.memory_space<vmem>>, vector<4x512xf32>
    tpu.vector_store %arg10[%c12, %c0_26], %27 {strides = array<i32>} : memref<128x512xf32, #tpu.memory_space<vmem>>, vector<4x512xf32>,
    %c0_27 = arith.constant 0 : index
    %c9 = arith.constant 9 : index
    %29 = vector.load %arg8[%c0_27, %c9] : memref<4x658xf32, #tpu.memory_space<vmem>>, vector<4x512xf32>
    %c4_28 = arith.constant 4 : index
    %c0_29 = arith.constant 0 : index
    %30 = vector.load %arg2[%c4_28, %c0_29] : memref<27x512xf32, #tpu.memory_space<vmem>>, vector<1x512xf32>
    %31 = vector.broadcast %30 : vector<1x512xf32> to vector<4x512xf32>
    %32 = arith.mulf %29, %31 : vector<4x512xf32>
    %c16 = arith.constant 16 : index
    %c0_30 = arith.constant 0 : index
    %33 = vector.load %arg10[%c16, %c0_30] : memref<128x512xf32, #tpu.memory_space<vmem>>, vector<4x512xf32>
    tpu.vector_store %arg10[%c16, %c0_30], %32 {strides = array<i32>} : memref<128x512xf32, #tpu.memory_space<vmem>>, vector<4x512xf32>,
    %c0_31 = arith.constant 0 : index
    %c10 = arith.constant 10 : index
    %34 = vector.load %arg8[%c0_31, %c10] : memref<4x658xf32, #tpu.memory_space<vmem>>, vector<4x512xf32>
    %c5 = arith.constant 5 : index
    %c0_32 = arith.constant 0 : index
    %35 = vector.load %arg2[%c5, %c0_32] : memref<27x512xf32, #tpu.memory_space<vmem>>, vector<1x512xf32>
    %36 = vector.broadcast %35 : vector<1x512xf32> to vector<4x512xf32>
    %37 = arith.mulf %34, %36 : vector<4x512xf32>
    %c20 = arith.constant 20 : index
    %c0_33 = arith.constant 0 : index
    %38 = vector.load %arg10[%c20, %c0_33] : memref<128x512xf32, #tpu.memory_space<vmem>>, vector<4x512xf32>
    tpu.vector_store %arg10[%c20, %c0_33], %37 {strides = array<i32>} : memref<128x512xf32, #tpu.memory_space<vmem>>, vector<4x512xf32>,
    %c0_34 = arith.constant 0 : index
    %c16_35 = arith.constant 16 : index
    %39 = vector.load %arg8[%c0_34, %c16_35] : memref<4x658xf32, #tpu.memory_space<vmem>>, vector<4x512xf32>
    %c6 = arith.constant 6 : index
    %c0_36 = arith.constant 0 : index
    %40 = vector.load %arg2[%c6, %c0_36] : memref<27x512xf32, #tpu.memory_space<vmem>>, vector<1x512xf32>
    %41 = vector.broadcast %40 : vector<1x512xf32> to vector<4x512xf32>
    %42 = arith.mulf %39, %41 : vector<4x512xf32>
    %c24 = arith.constant 24 : index
    %c0_37 = arith.constant 0 : index
    %43 = vector.load %arg10[%c24, %c0_37] : memref<128x512xf32, #tpu.memory_space<vmem>>, vector<4x512xf32>
    tpu.vector_store %arg10[%c24, %c0_37], %42 {strides = array<i32>} : memref<128x512xf32, #tpu.memory_space<vmem>>, vector<4x512xf32>,
    %c0_38 = arith.constant 0 : index
    %c17 = arith.constant 17 : index
    %44 = vector.load %arg8[%c0_38, %c17] : memref<4x658xf32, #tpu.memory_space<vmem>>, vector<4x512xf32>
    %c7 = arith.constant 7 : index
    %c0_39 = arith.constant 0 : index
    %45 = vector.load %arg2[%c7, %c0_39] : memref<27x512xf32, #tpu.memory_space<vmem>>, vector<1x512xf32>
    %46 = vector.broadcast %45 : vector<1x512xf32> to vector<4x512xf32>
    %47 = arith.mulf %44, %46 : vector<4x512xf32>
    %c28 = arith.constant 28 : index
    %c0_40 = arith.constant 0 : index
    %48 = vector.load %arg10[%c28, %c0_40] : memref<128x512xf32, #tpu.memory_space<vmem>>, vector<4x512xf32>
    tpu.vector_store %arg10[%c28, %c0_40], %47 {strides = array<i32>} : memref<128x512xf32, #tpu.memory_space<vmem>>, vector<4x512xf32>,
    %c0_41 = arith.constant 0 : index
    %c18 = arith.constant 18 : index
    %49 = vector.load %arg8[%c0_41, %c18] : memref<4x658xf32, #tpu.memory_space<vmem>>, vector<4x512xf32>
    %c8_42 = arith.constant 8 : index
    %c0_43 = arith.constant 0 : index
    %50 = vector.load %arg2[%c8_42, %c0_43] : memref<27x512xf32, #tpu.memory_space<vmem>>, vector<1x512xf32>
    %51 = vector.broadcast %50 : vector<1x512xf32> to vector<4x512xf32>
    %52 = arith.mulf %49, %51 : vector<4x512xf32>
    %c32 = arith.constant 32 : index
    %c0_44 = arith.constant 0 : index
    %53 = vector.load %arg10[%c32, %c0_44] : memref<128x512xf32, #tpu.memory_space<vmem>>, vector<4x512xf32>
    tpu.vector_store %arg10[%c32, %c0_44], %52 {strides = array<i32>} : memref<128x512xf32, #tpu.memory_space<vmem>>, vector<4x512xf32>,
    %c0_45 = arith.constant 0 : index
    %c64 = arith.constant 64 : index
    %54 = vector.load %arg8[%c0_45, %c64] : memref<4x658xf32, #tpu.memory_space<vmem>>, vector<4x512xf32>
    %c9_46 = arith.constant 9 : index
    %c0_47 = arith.constant 0 : index
    %55 = vector.load %arg2[%c9_46, %c0_47] : memref<27x512xf32, #tpu.memory_space<vmem>>, vector<1x512xf32>
    %56 = vector.broadcast %55 : vector<1x512xf32> to vector<4x512xf32>
    %57 = arith.mulf %54, %56 : vector<4x512xf32>
    %c36 = arith.constant 36 : index
    %c0_48 = arith.constant 0 : index
    %58 = vector.load %arg10[%c36, %c0_48] : memref<128x512xf32, #tpu.memory_space<vmem>>, vector<4x512xf32>
    tpu.vector_store %arg10[%c36, %c0_48], %57 {strides = array<i32>} : memref<128x512xf32, #tpu.memory_space<vmem>>, vector<4x512xf32>,
    %c0_49 = arith.constant 0 : index
    %c65 = arith.constant 65 : index
    %59 = vector.load %arg8[%c0_49, %c65] : memref<4x658xf32, #tpu.memory_space<vmem>>, vector<4x512xf32>
    %c10_50 = arith.constant 10 : index
    %c0_51 = arith.constant 0 : index
    %60 = vector.load %arg2[%c10_50, %c0_51] : memref<27x512xf32, #tpu.memory_space<vmem>>, vector<1x512xf32>
    %61 = vector.broadcast %60 : vector<1x512xf32> to vector<4x512xf32>
    %62 = arith.mulf %59, %61 : vector<4x512xf32>
    %c40 = arith.constant 40 : index
    %c0_52 = arith.constant 0 : index
    %63 = vector.load %arg10[%c40, %c0_52] : memref<128x512xf32, #tpu.memory_space<vmem>>, vector<4x512xf32>
    tpu.vector_store %arg10[%c40, %c0_52], %62 {strides = array<i32>} : memref<128x512xf32, #tpu.memory_space<vmem>>, vector<4x512xf32>,
    %c0_53 = arith.constant 0 : index
    %c66 = arith.constant 66 : index
    %64 = vector.load %arg8[%c0_53, %c66] : memref<4x658xf32, #tpu.memory_space<vmem>>, vector<4x512xf32>
    %c11 = arith.constant 11 : index
    %c0_54 = arith.constant 0 : index
    %65 = vector.load %arg2[%c11, %c0_54] : memref<27x512xf32, #tpu.memory_space<vmem>>, vector<1x512xf32>
    %66 = vector.broadcast %65 : vector<1x512xf32> to vector<4x512xf32>
    %67 = arith.mulf %64, %66 : vector<4x512xf32>
    %c44 = arith.constant 44 : index
    %c0_55 = arith.constant 0 : index
    %68 = vector.load %arg10[%c44, %c0_55] : memref<128x512xf32, #tpu.memory_space<vmem>>, vector<4x512xf32>
    tpu.vector_store %arg10[%c44, %c0_55], %67 {strides = array<i32>} : memref<128x512xf32, #tpu.memory_space<vmem>>, vector<4x512xf32>,
    %c0_56 = arith.constant 0 : index
    %c72 = arith.constant 72 : index
    %69 = vector.load %arg8[%c0_56, %c72] : memref<4x658xf32, #tpu.memory_space<vmem>>, vector<4x512xf32>
    %c12_57 = arith.constant 12 : index
    %c0_58 = arith.constant 0 : index
    %70 = vector.load %arg2[%c12_57, %c0_58] : memref<27x512xf32, #tpu.memory_space<vmem>>, vector<1x512xf32>
    %71 = vector.broadcast %70 : vector<1x512xf32> to vector<4x512xf32>
    %72 = arith.mulf %69, %71 : vector<4x512xf32>
    %c48 = arith.constant 48 : index
    %c0_59 = arith.constant 0 : index
    %73 = vector.load %arg10[%c48, %c0_59] : memref<128x512xf32, #tpu.memory_space<vmem>>, vector<4x512xf32>
    tpu.vector_store %arg10[%c48, %c0_59], %72 {strides = array<i32>} : memref<128x512xf32, #tpu.memory_space<vmem>>, vector<4x512xf32>,
    %c0_60 = arith.constant 0 : index
    %c73_61 = arith.constant 73 : index
    %74 = vector.load %arg8[%c0_60, %c73_61] : memref<4x658xf32, #tpu.memory_space<vmem>>, vector<4x512xf32>
    %c13 = arith.constant 13 : index
    %c0_62 = arith.constant 0 : index
    %75 = vector.load %arg2[%c13, %c0_62] : memref<27x512xf32, #tpu.memory_space<vmem>>, vector<1x512xf32>
    %76 = vector.broadcast %75 : vector<1x512xf32> to vector<4x512xf32>
    %77 = arith.mulf %74, %76 : vector<4x512xf32>
    %c52 = arith.constant 52 : index
    %c0_63 = arith.constant 0 : index
    %78 = vector.load %arg10[%c52, %c0_63] : memref<128x512xf32, #tpu.memory_space<vmem>>, vector<4x512xf32>
    tpu.vector_store %arg10[%c52, %c0_63], %77 {strides = array<i32>} : memref<128x512xf32, #tpu.memory_space<vmem>>, vector<4x512xf32>,
    %c0_64 = arith.constant 0 : index
    %c74 = arith.constant 74 : index
    %79 = vector.load %arg8[%c0_64, %c74] : memref<4x658xf32, #tpu.memory_space<vmem>>, vector<4x512xf32>
    %c14 = arith.constant 14 : index
    %c0_65 = arith.constant 0 : index
    %80 = vector.load %arg2[%c14, %c0_65] : memref<27x512xf32, #tpu.memory_space<vmem>>, vector<1x512xf32>
    %81 = vector.broadcast %80 : vector<1x512xf32> to vector<4x512xf32>
    %82 = arith.mulf %79, %81 : vector<4x512xf32>
    %c56 = arith.constant 56 : index
    %c0_66 = arith.constant 0 : index
    %83 = vector.load %arg10[%c56, %c0_66] : memref<128x512xf32, #tpu.memory_space<vmem>>, vector<4x512xf32>
    tpu.vector_store %arg10[%c56, %c0_66], %82 {strides = array<i32>} : memref<128x512xf32, #tpu.memory_space<vmem>>, vector<4x512xf32>,
    %c0_67 = arith.constant 0 : index
    %c80 = arith.constant 80 : index
    %84 = vector.load %arg8[%c0_67, %c80] : memref<4x658xf32, #tpu.memory_space<vmem>>, vector<4x512xf32>
    %c15 = arith.constant 15 : index
    %c0_68 = arith.constant 0 : index
    %85 = vector.load %arg2[%c15, %c0_68] : memref<27x512xf32, #tpu.memory_space<vmem>>, vector<1x512xf32>
    %86 = vector.broadcast %85 : vector<1x512xf32> to vector<4x512xf32>
    %87 = arith.mulf %84, %86 : vector<4x512xf32>
    %c60 = arith.constant 60 : index
    %c0_69 = arith.constant 0 : index
    %88 = vector.load %arg10[%c60, %c0_69] : memref<128x512xf32, #tpu.memory_space<vmem>>, vector<4x512xf32>
    tpu.vector_store %arg10[%c60, %c0_69], %87 {strides = array<i32>} : memref<128x512xf32, #tpu.memory_space<vmem>>, vector<4x512xf32>,
    %c0_70 = arith.constant 0 : index
    %c81 = arith.constant 81 : index
    %89 = vector.load %arg8[%c0_70, %c81] : memref<4x658xf32, #tpu.memory_space<vmem>>, vector<4x512xf32>
    %c16_71 = arith.constant 16 : index
    %c0_72 = arith.constant 0 : index
    %90 = vector.load %arg2[%c16_71, %c0_72] : memref<27x512xf32, #tpu.memory_space<vmem>>, vector<1x512xf32>
    %91 = vector.broadcast %90 : vector<1x512xf32> to vector<4x512xf32>
    %92 = arith.mulf %89, %91 : vector<4x512xf32>
    %c64_73 = arith.constant 64 : index
    %c0_74 = arith.constant 0 : index
    %93 = vector.load %arg10[%c64_73, %c0_74] : memref<128x512xf32, #tpu.memory_space<vmem>>, vector<4x512xf32>
    tpu.vector_store %arg10[%c64_73, %c0_74], %92 {strides = array<i32>} : memref<128x512xf32, #tpu.memory_space<vmem>>, vector<4x512xf32>,
    %c0_75 = arith.constant 0 : index
    %c82 = arith.constant 82 : index
    %94 = vector.load %arg8[%c0_75, %c82] : memref<4x658xf32, #tpu.memory_space<vmem>>, vector<4x512xf32>
    %c17_76 = arith.constant 17 : index
    %c0_77 = arith.constant 0 : index
    %95 = vector.load %arg2[%c17_76, %c0_77] : memref<27x512xf32, #tpu.memory_space<vmem>>, vector<1x512xf32>
    %96 = vector.broadcast %95 : vector<1x512xf32> to vector<4x512xf32>
    %97 = arith.mulf %94, %96 : vector<4x512xf32>
    %c68 = arith.constant 68 : index
    %c0_78 = arith.constant 0 : index
    %98 = vector.load %arg10[%c68, %c0_78] : memref<128x512xf32, #tpu.memory_space<vmem>>, vector<4x512xf32>
    tpu.vector_store %arg10[%c68, %c0_78], %97 {strides = array<i32>} : memref<128x512xf32, #tpu.memory_space<vmem>>, vector<4x512xf32>,
    %c0_79 = arith.constant 0 : index
    %c128 = arith.constant 128 : index
    %99 = vector.load %arg8[%c0_79, %c128] : memref<4x658xf32, #tpu.memory_space<vmem>>, vector<4x512xf32>
    %c18_80 = arith.constant 18 : index
    %c0_81 = arith.constant 0 : index
    %100 = vector.load %arg2[%c18_80, %c0_81] : memref<27x512xf32, #tpu.memory_space<vmem>>, vector<1x512xf32>
    %101 = vector.broadcast %100 : vector<1x512xf32> to vector<4x512xf32>
    %102 = arith.mulf %99, %101 : vector<4x512xf32>
    %c72_82 = arith.constant 72 : index
    %c0_83 = arith.constant 0 : index
    %103 = vector.load %arg10[%c72_82, %c0_83] : memref<128x512xf32, #tpu.memory_space<vmem>>, vector<4x512xf32>
    tpu.vector_store %arg10[%c72_82, %c0_83], %102 {strides = array<i32>} : memref<128x512xf32, #tpu.memory_space<vmem>>, vector<4x512xf32>,
    %c0_84 = arith.constant 0 : index
    %c129 = arith.constant 129 : index
    %104 = vector.load %arg8[%c0_84, %c129] : memref<4x658xf32, #tpu.memory_space<vmem>>, vector<4x512xf32>
    %c19 = arith.constant 19 : index
    %c0_85 = arith.constant 0 : index
    %105 = vector.load %arg2[%c19, %c0_85] : memref<27x512xf32, #tpu.memory_space<vmem>>, vector<1x512xf32>
    %106 = vector.broadcast %105 : vector<1x512xf32> to vector<4x512xf32>
    %107 = arith.mulf %104, %106 : vector<4x512xf32>
    %c76 = arith.constant 76 : index
    %c0_86 = arith.constant 0 : index
    %108 = vector.load %arg10[%c76, %c0_86] : memref<128x512xf32, #tpu.memory_space<vmem>>, vector<4x512xf32>
    tpu.vector_store %arg10[%c76, %c0_86], %107 {strides = array<i32>} : memref<128x512xf32, #tpu.memory_space<vmem>>, vector<4x512xf32>,
    %c0_87 = arith.constant 0 : index
    %c130 = arith.constant 130 : index
    %109 = vector.load %arg8[%c0_87, %c130] : memref<4x658xf32, #tpu.memory_space<vmem>>, vector<4x512xf32>
    %c20_88 = arith.constant 20 : index
    %c0_89 = arith.constant 0 : index
    %110 = vector.load %arg2[%c20_88, %c0_89] : memref<27x512xf32, #tpu.memory_space<vmem>>, vector<1x512xf32>
    %111 = vector.broadcast %110 : vector<1x512xf32> to vector<4x512xf32>
    %112 = arith.mulf %109, %111 : vector<4x512xf32>
    %c80_90 = arith.constant 80 : index
    %c0_91 = arith.constant 0 : index
    %113 = vector.load %arg10[%c80_90, %c0_91] : memref<128x512xf32, #tpu.memory_space<vmem>>, vector<4x512xf32>
    tpu.vector_store %arg10[%c80_90, %c0_91], %112 {strides = array<i32>} : memref<128x512xf32, #tpu.memory_space<vmem>>, vector<4x512xf32>,
    %c0_92 = arith.constant 0 : index
    %c136 = arith.constant 136 : index
    %114 = vector.load %arg8[%c0_92, %c136] : memref<4x658xf32, #tpu.memory_space<vmem>>, vector<4x512xf32>
    %c21 = arith.constant 21 : index
    %c0_93 = arith.constant 0 : index
    %115 = vector.load %arg2[%c21, %c0_93] : memref<27x512xf32, #tpu.memory_space<vmem>>, vector<1x512xf32>
    %116 = vector.broadcast %115 : vector<1x512xf32> to vector<4x512xf32>
    %117 = arith.mulf %114, %116 : vector<4x512xf32>
    %c84 = arith.constant 84 : index
    %c0_94 = arith.constant 0 : index
    %118 = vector.load %arg10[%c84, %c0_94] : memref<128x512xf32, #tpu.memory_space<vmem>>, vector<4x512xf32>
    tpu.vector_store %arg10[%c84, %c0_94], %117 {strides = array<i32>} : memref<128x512xf32, #tpu.memory_space<vmem>>, vector<4x512xf32>,
    %c0_95 = arith.constant 0 : index
    %c137 = arith.constant 137 : index
    %119 = vector.load %arg8[%c0_95, %c137] : memref<4x658xf32, #tpu.memory_space<vmem>>, vector<4x512xf32>
    %c22 = arith.constant 22 : index
    %c0_96 = arith.constant 0 : index
    %120 = vector.load %arg2[%c22, %c0_96] : memref<27x512xf32, #tpu.memory_space<vmem>>, vector<1x512xf32>
    %121 = vector.broadcast %120 : vector<1x512xf32> to vector<4x512xf32>
    %122 = arith.mulf %119, %121 : vector<4x512xf32>
    %c88 = arith.constant 88 : index
    %c0_97 = arith.constant 0 : index
    %123 = vector.load %arg10[%c88, %c0_97] : memref<128x512xf32, #tpu.memory_space<vmem>>, vector<4x512xf32>
    tpu.vector_store %arg10[%c88, %c0_97], %122 {strides = array<i32>} : memref<128x512xf32, #tpu.memory_space<vmem>>, vector<4x512xf32>,
    %c0_98 = arith.constant 0 : index
    %c138 = arith.constant 138 : index
    %124 = vector.load %arg8[%c0_98, %c138] : memref<4x658xf32, #tpu.memory_space<vmem>>, vector<4x512xf32>
    %c23 = arith.constant 23 : index
    %c0_99 = arith.constant 0 : index
    %125 = vector.load %arg2[%c23, %c0_99] : memref<27x512xf32, #tpu.memory_space<vmem>>, vector<1x512xf32>
    %126 = vector.broadcast %125 : vector<1x512xf32> to vector<4x512xf32>
    %127 = arith.mulf %124, %126 : vector<4x512xf32>
    %c92 = arith.constant 92 : index
    %c0_100 = arith.constant 0 : index
    %128 = vector.load %arg10[%c92, %c0_100] : memref<128x512xf32, #tpu.memory_space<vmem>>, vector<4x512xf32>
    tpu.vector_store %arg10[%c92, %c0_100], %127 {strides = array<i32>} : memref<128x512xf32, #tpu.memory_space<vmem>>, vector<4x512xf32>,
    %c0_101 = arith.constant 0 : index
    %c144 = arith.constant 144 : index
    %129 = vector.load %arg8[%c0_101, %c144] : memref<4x658xf32, #tpu.memory_space<vmem>>, vector<4x512xf32>
    %c24_102 = arith.constant 24 : index
    %c0_103 = arith.constant 0 : index
    %130 = vector.load %arg2[%c24_102, %c0_103] : memref<27x512xf32, #tpu.memory_space<vmem>>, vector<1x512xf32>
    %131 = vector.broadcast %130 : vector<1x512xf32> to vector<4x512xf32>
    %132 = arith.mulf %129, %131 : vector<4x512xf32>
    %c96 = arith.constant 96 : index
    %c0_104 = arith.constant 0 : index
    %133 = vector.load %arg10[%c96, %c0_104] : memref<128x512xf32, #tpu.memory_space<vmem>>, vector<4x512xf32>
    tpu.vector_store %arg10[%c96, %c0_104], %132 {strides = array<i32>} : memref<128x512xf32, #tpu.memory_space<vmem>>, vector<4x512xf32>,
    %c0_105 = arith.constant 0 : index
    %c145 = arith.constant 145 : index
    %134 = vector.load %arg8[%c0_105, %c145] : memref<4x658xf32, #tpu.memory_space<vmem>>, vector<4x512xf32>
    %c25 = arith.constant 25 : index
    %c0_106 = arith.constant 0 : index
    %135 = vector.load %arg2[%c25, %c0_106] : memref<27x512xf32, #tpu.memory_space<vmem>>, vector<1x512xf32>
    %136 = vector.broadcast %135 : vector<1x512xf32> to vector<4x512xf32>
    %137 = arith.mulf %134, %136 : vector<4x512xf32>
    %c100 = arith.constant 100 : index
    %c0_107 = arith.constant 0 : index
    %138 = vector.load %arg10[%c100, %c0_107] : memref<128x512xf32, #tpu.memory_space<vmem>>, vector<4x512xf32>
    tpu.vector_store %arg10[%c100, %c0_107], %137 {strides = array<i32>} : memref<128x512xf32, #tpu.memory_space<vmem>>, vector<4x512xf32>,
    %c0_108 = arith.constant 0 : index
    %c146 = arith.constant 146 : index
    %139 = vector.load %arg8[%c0_108, %c146] : memref<4x658xf32, #tpu.memory_space<vmem>>, vector<4x512xf32>
    %c26 = arith.constant 26 : index
    %c0_109 = arith.constant 0 : index
    %140 = vector.load %arg2[%c26, %c0_109] : memref<27x512xf32, #tpu.memory_space<vmem>>, vector<1x512xf32>
    %141 = vector.broadcast %140 : vector<1x512xf32> to vector<4x512xf32>
    %142 = arith.mulf %139, %141 : vector<4x512xf32>
    %c104 = arith.constant 104 : index
    %c0_110 = arith.constant 0 : index
    %143 = vector.load %arg10[%c104, %c0_110] : memref<128x512xf32, #tpu.memory_space<vmem>>, vector<4x512xf32>
    tpu.vector_store %arg10[%c104, %c0_110], %142 {strides = array<i32>} : memref<128x512xf32, #tpu.memory_space<vmem>>, vector<4x512xf32>,
    %c0_111 = arith.constant 0 : index
    %c0_112 = arith.constant 0 : index
    %144 = vector.load %arg3[%c0_111, %c0_112] : memref<4x128xf32, #tpu.memory_space<vmem>>, vector<4x128xf32>
    %c0_113 = arith.constant 0 : index
    %c0_114 = arith.constant 0 : index
    %145 = vector.load %arg10[%c0_113, %c0_114] : memref<128x512xf32, #tpu.memory_space<vmem>>, vector<128x512xf32>
    %cst_115 = arith.constant dense<0.000000e+00> : vector<4x512xf32>
    %146 = tpu.matmul %144, %145, %cst_115 {dimension_numbers = #tpu.dot_dimension_numbers<[1], [0], [0], [1], [0, 0, 1, 1], [], []>} : vector<4x128xf32>, vector<128x512xf32>, vector<4x512xf32> -> vector<4x512xf32>
    %c0_116 = arith.constant 0 : index
    %c0_117 = arith.constant 0 : index
    %147 = vector.load %arg4[%c0_116, %c0_117] : memref<4x1xf32, #tpu.memory_space<vmem>>, vector<4x1xf32>
    %148 = vector.broadcast %147 : vector<4x1xf32> to vector<4x512xf32>
    %149 = arith.addf %146, %148 : vector<4x512xf32>
    %cst_118 = arith.constant 0.000000e+00 : f32
    %150 = vector.broadcast %cst_118 : f32 to vector<4x512xf32>
    %151 = arith.maximumf %149, %150 : vector<4x512xf32>
    %cst_119 = arith.constant 0.000000e+00 : f32
    %152 = vector.broadcast %cst_119 : f32 to vector<4x73xf32>
    %c0_120 = arith.constant 0 : index
    %c0_121 = arith.constant 0 : index
    %153 = vector.load %arg9[%c0_120, %c0_121] : memref<4x658xf32, #tpu.memory_space<vmem>>, vector<4x73xf32>
    tpu.vector_store %arg9[%c0_120, %c0_121], %152 {strides = array<i32>} : memref<4x658xf32, #tpu.memory_space<vmem>>, vector<4x73xf32>,
    %cst_122 = arith.constant 0.000000e+00 : f32
    %154 = vector.broadcast %cst_122 : f32 to vector<4x73xf32>
    %c0_123 = arith.constant 0 : index
    %c585_124 = arith.constant 585 : index
    %155 = vector.load %arg9[%c0_123, %c585_124] : memref<4x658xf32, #tpu.memory_space<vmem>>, vector<4x73xf32>
    tpu.vector_store %arg9[%c0_123, %c585_124], %154 {strides = array<i32>} : memref<4x658xf32, #tpu.memory_space<vmem>>, vector<4x73xf32>,
    %c0_125 = arith.constant 0 : index
    %c73_126 = arith.constant 73 : index
    %156 = vector.load %arg9[%c0_125, %c73_126] : memref<4x658xf32, #tpu.memory_space<vmem>>, vector<4x512xf32>
    tpu.vector_store %arg9[%c0_125, %c73_126], %151 {strides = array<i32>} : memref<4x658xf32, #tpu.memory_space<vmem>>, vector<4x512xf32>,
    %c0_127 = arith.constant 0 : index
    %c0_128 = arith.constant 0 : index
    %157 = vector.load %arg9[%c0_127, %c0_128] : memref<4x658xf32, #tpu.memory_space<vmem>>, vector<4x512xf32>
    %c0_129 = arith.constant 0 : index
    %c0_130 = arith.constant 0 : index
    %158 = vector.load %arg2[%c0_129, %c0_130] : memref<27x512xf32, #tpu.memory_space<vmem>>, vector<1x512xf32>
    %159 = vector.broadcast %158 : vector<1x512xf32> to vector<4x512xf32>
    %160 = arith.mulf %157, %159 : vector<4x512xf32>
    %c0_131 = arith.constant 0 : index
    %c0_132 = arith.constant 0 : index
    %161 = vector.load %arg10[%c0_131, %c0_132] : memref<128x512xf32, #tpu.memory_space<vmem>>, vector<4x512xf32>
    tpu.vector_store %arg10[%c0_131, %c0_132], %160 {strides = array<i32>} : memref<128x512xf32, #tpu.memory_space<vmem>>, vector<4x512xf32>,
    %c0_133 = arith.constant 0 : index
    %c1_134 = arith.constant 1 : index
    %162 = vector.load %arg9[%c0_133, %c1_134] : memref<4x658xf32, #tpu.memory_space<vmem>>, vector<4x512xf32>
    %c1_135 = arith.constant 1 : index
    %c0_136 = arith.constant 0 : index
    %163 = vector.load %arg2[%c1_135, %c0_136] : memref<27x512xf32, #tpu.memory_space<vmem>>, vector<1x512xf32>
    %164 = vector.broadcast %163 : vector<1x512xf32> to vector<4x512xf32>
    %165 = arith.mulf %162, %164 : vector<4x512xf32>
    %c4_137 = arith.constant 4 : index
    %c0_138 = arith.constant 0 : index
    %166 = vector.load %arg10[%c4_137, %c0_138] : memref<128x512xf32, #tpu.memory_space<vmem>>, vector<4x512xf32>
    tpu.vector_store %arg10[%c4_137, %c0_138], %165 {strides = array<i32>} : memref<128x512xf32, #tpu.memory_space<vmem>>, vector<4x512xf32>,
    %c0_139 = arith.constant 0 : index
    %c2_140 = arith.constant 2 : index
    %167 = vector.load %arg9[%c0_139, %c2_140] : memref<4x658xf32, #tpu.memory_space<vmem>>, vector<4x512xf32>
    %c2_141 = arith.constant 2 : index
    %c0_142 = arith.constant 0 : index
    %168 = vector.load %arg2[%c2_141, %c0_142] : memref<27x512xf32, #tpu.memory_space<vmem>>, vector<1x512xf32>
    %169 = vector.broadcast %168 : vector<1x512xf32> to vector<4x512xf32>
    %170 = arith.mulf %167, %169 : vector<4x512xf32>
    %c8_143 = arith.constant 8 : index
    %c0_144 = arith.constant 0 : index
    %171 = vector.load %arg10[%c8_143, %c0_144] : memref<128x512xf32, #tpu.memory_space<vmem>>, vector<4x512xf32>
    tpu.vector_store %arg10[%c8_143, %c0_144], %170 {strides = array<i32>} : memref<128x512xf32, #tpu.memory_space<vmem>>, vector<4x512xf32>,
    %c0_145 = arith.constant 0 : index
    %c8_146 = arith.constant 8 : index
    %172 = vector.load %arg9[%c0_145, %c8_146] : memref<4x658xf32, #tpu.memory_space<vmem>>, vector<4x512xf32>
    %c3_147 = arith.constant 3 : index
    %c0_148 = arith.constant 0 : index
    %173 = vector.load %arg2[%c3_147, %c0_148] : memref<27x512xf32, #tpu.memory_space<vmem>>, vector<1x512xf32>
    %174 = vector.broadcast %173 : vector<1x512xf32> to vector<4x512xf32>
    %175 = arith.mulf %172, %174 : vector<4x512xf32>
    %c12_149 = arith.constant 12 : index
    %c0_150 = arith.constant 0 : index
    %176 = vector.load %arg10[%c12_149, %c0_150] : memref<128x512xf32, #tpu.memory_space<vmem>>, vector<4x512xf32>
    tpu.vector_store %arg10[%c12_149, %c0_150], %175 {strides = array<i32>} : memref<128x512xf32, #tpu.memory_space<vmem>>, vector<4x512xf32>,
    %c0_151 = arith.constant 0 : index
    %c9_152 = arith.constant 9 : index
    %177 = vector.load %arg9[%c0_151, %c9_152] : memref<4x658xf32, #tpu.memory_space<vmem>>, vector<4x512xf32>
    %c4_153 = arith.constant 4 : index
    %c0_154 = arith.constant 0 : index
    %178 = vector.load %arg2[%c4_153, %c0_154] : memref<27x512xf32, #tpu.memory_space<vmem>>, vector<1x512xf32>
    %179 = vector.broadcast %178 : vector<1x512xf32> to vector<4x512xf32>
    %180 = arith.mulf %177, %179 : vector<4x512xf32>
    %c16_155 = arith.constant 16 : index
    %c0_156 = arith.constant 0 : index
    %181 = vector.load %arg10[%c16_155, %c0_156] : memref<128x512xf32, #tpu.memory_space<vmem>>, vector<4x512xf32>
    tpu.vector_store %arg10[%c16_155, %c0_156], %180 {strides = array<i32>} : memref<128x512xf32, #tpu.memory_space<vmem>>, vector<4x512xf32>,
    %c0_157 = arith.constant 0 : index
    %c10_158 = arith.constant 10 : index
    %182 = vector.load %arg9[%c0_157, %c10_158] : memref<4x658xf32, #tpu.memory_space<vmem>>, vector<4x512xf32>
    %c5_159 = arith.constant 5 : index
    %c0_160 = arith.constant 0 : index
    %183 = vector.load %arg2[%c5_159, %c0_160] : memref<27x512xf32, #tpu.memory_space<vmem>>, vector<1x512xf32>
    %184 = vector.broadcast %183 : vector<1x512xf32> to vector<4x512xf32>
    %185 = arith.mulf %182, %184 : vector<4x512xf32>
    %c20_161 = arith.constant 20 : index
    %c0_162 = arith.constant 0 : index
    %186 = vector.load %arg10[%c20_161, %c0_162] : memref<128x512xf32, #tpu.memory_space<vmem>>, vector<4x512xf32>
    tpu.vector_store %arg10[%c20_161, %c0_162], %185 {strides = array<i32>} : memref<128x512xf32, #tpu.memory_space<vmem>>, vector<4x512xf32>,
    %c0_163 = arith.constant 0 : index
    %c16_164 = arith.constant 16 : index
    %187 = vector.load %arg9[%c0_163, %c16_164] : memref<4x658xf32, #tpu.memory_space<vmem>>, vector<4x512xf32>
    %c6_165 = arith.constant 6 : index
    %c0_166 = arith.constant 0 : index
    %188 = vector.load %arg2[%c6_165, %c0_166] : memref<27x512xf32, #tpu.memory_space<vmem>>, vector<1x512xf32>
    %189 = vector.broadcast %188 : vector<1x512xf32> to vector<4x512xf32>
    %190 = arith.mulf %187, %189 : vector<4x512xf32>
    %c24_167 = arith.constant 24 : index
    %c0_168 = arith.constant 0 : index
    %191 = vector.load %arg10[%c24_167, %c0_168] : memref<128x512xf32, #tpu.memory_space<vmem>>, vector<4x512xf32>
    tpu.vector_store %arg10[%c24_167, %c0_168], %190 {strides = array<i32>} : memref<128x512xf32, #tpu.memory_space<vmem>>, vector<4x512xf32>,
    %c0_169 = arith.constant 0 : index
    %c17_170 = arith.constant 17 : index
    %192 = vector.load %arg9[%c0_169, %c17_170] : memref<4x658xf32, #tpu.memory_space<vmem>>, vector<4x512xf32>
    %c7_171 = arith.constant 7 : index
    %c0_172 = arith.constant 0 : index
    %193 = vector.load %arg2[%c7_171, %c0_172] : memref<27x512xf32, #tpu.memory_space<vmem>>, vector<1x512xf32>
    %194 = vector.broadcast %193 : vector<1x512xf32> to vector<4x512xf32>
    %195 = arith.mulf %192, %194 : vector<4x512xf32>
    %c28_173 = arith.constant 28 : index
    %c0_174 = arith.constant 0 : index
    %196 = vector.load %arg10[%c28_173, %c0_174] : memref<128x512xf32, #tpu.memory_space<vmem>>, vector<4x512xf32>
    tpu.vector_store %arg10[%c28_173, %c0_174], %195 {strides = array<i32>} : memref<128x512xf32, #tpu.memory_space<vmem>>, vector<4x512xf32>,
    %c0_175 = arith.constant 0 : index
    %c18_176 = arith.constant 18 : index
    %197 = vector.load %arg9[%c0_175, %c18_176] : memref<4x658xf32, #tpu.memory_space<vmem>>, vector<4x512xf32>
    %c8_177 = arith.constant 8 : index
    %c0_178 = arith.constant 0 : index
    %198 = vector.load %arg2[%c8_177, %c0_178] : memref<27x512xf32, #tpu.memory_space<vmem>>, vector<1x512xf32>
    %199 = vector.broadcast %198 : vector<1x512xf32> to vector<4x512xf32>
    %200 = arith.mulf %197, %199 : vector<4x512xf32>
    %c32_179 = arith.constant 32 : index
    %c0_180 = arith.constant 0 : index
    %201 = vector.load %arg10[%c32_179, %c0_180] : memref<128x512xf32, #tpu.memory_space<vmem>>, vector<4x512xf32>
    tpu.vector_store %arg10[%c32_179, %c0_180], %200 {strides = array<i32>} : memref<128x512xf32, #tpu.memory_space<vmem>>, vector<4x512xf32>,
    %c0_181 = arith.constant 0 : index
    %c64_182 = arith.constant 64 : index
    %202 = vector.load %arg9[%c0_181, %c64_182] : memref<4x658xf32, #tpu.memory_space<vmem>>, vector<4x512xf32>
    %c9_183 = arith.constant 9 : index
    %c0_184 = arith.constant 0 : index
    %203 = vector.load %arg2[%c9_183, %c0_184] : memref<27x512xf32, #tpu.memory_space<vmem>>, vector<1x512xf32>
    %204 = vector.broadcast %203 : vector<1x512xf32> to vector<4x512xf32>
    %205 = arith.mulf %202, %204 : vector<4x512xf32>
    %c36_185 = arith.constant 36 : index
    %c0_186 = arith.constant 0 : index
    %206 = vector.load %arg10[%c36_185, %c0_186] : memref<128x512xf32, #tpu.memory_space<vmem>>, vector<4x512xf32>
    tpu.vector_store %arg10[%c36_185, %c0_186], %205 {strides = array<i32>} : memref<128x512xf32, #tpu.memory_space<vmem>>, vector<4x512xf32>,
    %c0_187 = arith.constant 0 : index
    %c65_188 = arith.constant 65 : index
    %207 = vector.load %arg9[%c0_187, %c65_188] : memref<4x658xf32, #tpu.memory_space<vmem>>, vector<4x512xf32>
    %c10_189 = arith.constant 10 : index
    %c0_190 = arith.constant 0 : index
    %208 = vector.load %arg2[%c10_189, %c0_190] : memref<27x512xf32, #tpu.memory_space<vmem>>, vector<1x512xf32>
    %209 = vector.broadcast %208 : vector<1x512xf32> to vector<4x512xf32>
    %210 = arith.mulf %207, %209 : vector<4x512xf32>
    %c40_191 = arith.constant 40 : index
    %c0_192 = arith.constant 0 : index
    %211 = vector.load %arg10[%c40_191, %c0_192] : memref<128x512xf32, #tpu.memory_space<vmem>>, vector<4x512xf32>
    tpu.vector_store %arg10[%c40_191, %c0_192], %210 {strides = array<i32>} : memref<128x512xf32, #tpu.memory_space<vmem>>, vector<4x512xf32>,
    %c0_193 = arith.constant 0 : index
    %c66_194 = arith.constant 66 : index
    %212 = vector.load %arg9[%c0_193, %c66_194] : memref<4x658xf32, #tpu.memory_space<vmem>>, vector<4x512xf32>
    %c11_195 = arith.constant 11 : index
    %c0_196 = arith.constant 0 : index
    %213 = vector.load %arg2[%c11_195, %c0_196] : memref<27x512xf32, #tpu.memory_space<vmem>>, vector<1x512xf32>
    %214 = vector.broadcast %213 : vector<1x512xf32> to vector<4x512xf32>
    %215 = arith.mulf %212, %214 : vector<4x512xf32>
    %c44_197 = arith.constant 44 : index
    %c0_198 = arith.constant 0 : index
    %216 = vector.load %arg10[%c44_197, %c0_198] : memref<128x512xf32, #tpu.memory_space<vmem>>, vector<4x512xf32>
    tpu.vector_store %arg10[%c44_197, %c0_198], %215 {strides = array<i32>} : memref<128x512xf32, #tpu.memory_space<vmem>>, vector<4x512xf32>,
    %c0_199 = arith.constant 0 : index
    %c72_200 = arith.constant 72 : index
    %217 = vector.load %arg9[%c0_199, %c72_200] : memref<4x658xf32, #tpu.memory_space<vmem>>, vector<4x512xf32>
    %c12_201 = arith.constant 12 : index
    %c0_202 = arith.constant 0 : index
    %218 = vector.load %arg2[%c12_201, %c0_202] : memref<27x512xf32, #tpu.memory_space<vmem>>, vector<1x512xf32>
    %219 = vector.broadcast %218 : vector<1x512xf32> to vector<4x512xf32>
    %220 = arith.mulf %217, %219 : vector<4x512xf32>
    %c48_203 = arith.constant 48 : index
    %c0_204 = arith.constant 0 : index
    %221 = vector.load %arg10[%c48_203, %c0_204] : memref<128x512xf32, #tpu.memory_space<vmem>>, vector<4x512xf32>
    tpu.vector_store %arg10[%c48_203, %c0_204], %220 {strides = array<i32>} : memref<128x512xf32, #tpu.memory_space<vmem>>, vector<4x512xf32>,
    %c0_205 = arith.constant 0 : index
    %c73_206 = arith.constant 73 : index
    %222 = vector.load %arg9[%c0_205, %c73_206] : memref<4x658xf32, #tpu.memory_space<vmem>>, vector<4x512xf32>
    %c13_207 = arith.constant 13 : index
    %c0_208 = arith.constant 0 : index
    %223 = vector.load %arg2[%c13_207, %c0_208] : memref<27x512xf32, #tpu.memory_space<vmem>>, vector<1x512xf32>
    %224 = vector.broadcast %223 : vector<1x512xf32> to vector<4x512xf32>
    %225 = arith.mulf %222, %224 : vector<4x512xf32>
    %c52_209 = arith.constant 52 : index
    %c0_210 = arith.constant 0 : index
    %226 = vector.load %arg10[%c52_209, %c0_210] : memref<128x512xf32, #tpu.memory_space<vmem>>, vector<4x512xf32>
    tpu.vector_store %arg10[%c52_209, %c0_210], %225 {strides = array<i32>} : memref<128x512xf32, #tpu.memory_space<vmem>>, vector<4x512xf32>,
    %c0_211 = arith.constant 0 : index
    %c74_212 = arith.constant 74 : index
    %227 = vector.load %arg9[%c0_211, %c74_212] : memref<4x658xf32, #tpu.memory_space<vmem>>, vector<4x512xf32>
    %c14_213 = arith.constant 14 : index
    %c0_214 = arith.constant 0 : index
    %228 = vector.load %arg2[%c14_213, %c0_214] : memref<27x512xf32, #tpu.memory_space<vmem>>, vector<1x512xf32>
    %229 = vector.broadcast %228 : vector<1x512xf32> to vector<4x512xf32>
    %230 = arith.mulf %227, %229 : vector<4x512xf32>
    %c56_215 = arith.constant 56 : index
    %c0_216 = arith.constant 0 : index
    %231 = vector.load %arg10[%c56_215, %c0_216] : memref<128x512xf32, #tpu.memory_space<vmem>>, vector<4x512xf32>
    tpu.vector_store %arg10[%c56_215, %c0_216], %230 {strides = array<i32>} : memref<128x512xf32, #tpu.memory_space<vmem>>, vector<4x512xf32>,
    %c0_217 = arith.constant 0 : index
    %c80_218 = arith.constant 80 : index
    %232 = vector.load %arg9[%c0_217, %c80_218] : memref<4x658xf32, #tpu.memory_space<vmem>>, vector<4x512xf32>
    %c15_219 = arith.constant 15 : index
    %c0_220 = arith.constant 0 : index
    %233 = vector.load %arg2[%c15_219, %c0_220] : memref<27x512xf32, #tpu.memory_space<vmem>>, vector<1x512xf32>
    %234 = vector.broadcast %233 : vector<1x512xf32> to vector<4x512xf32>
    %235 = arith.mulf %232, %234 : vector<4x512xf32>
    %c60_221 = arith.constant 60 : index
    %c0_222 = arith.constant 0 : index
    %236 = vector.load %arg10[%c60_221, %c0_222] : memref<128x512xf32, #tpu.memory_space<vmem>>, vector<4x512xf32>
    tpu.vector_store %arg10[%c60_221, %c0_222], %235 {strides = array<i32>} : memref<128x512xf32, #tpu.memory_space<vmem>>, vector<4x512xf32>,
    %c0_223 = arith.constant 0 : index
    %c81_224 = arith.constant 81 : index
    %237 = vector.load %arg9[%c0_223, %c81_224] : memref<4x658xf32, #tpu.memory_space<vmem>>, vector<4x512xf32>
    %c16_225 = arith.constant 16 : index
    %c0_226 = arith.constant 0 : index
    %238 = vector.load %arg2[%c16_225, %c0_226] : memref<27x512xf32, #tpu.memory_space<vmem>>, vector<1x512xf32>
    %239 = vector.broadcast %238 : vector<1x512xf32> to vector<4x512xf32>
    %240 = arith.mulf %237, %239 : vector<4x512xf32>
    %c64_227 = arith.constant 64 : index
    %c0_228 = arith.constant 0 : index
    %241 = vector.load %arg10[%c64_227, %c0_228] : memref<128x512xf32, #tpu.memory_space<vmem>>, vector<4x512xf32>
    tpu.vector_store %arg10[%c64_227, %c0_228], %240 {strides = array<i32>} : memref<128x512xf32, #tpu.memory_space<vmem>>, vector<4x512xf32>,
    %c0_229 = arith.constant 0 : index
    %c82_230 = arith.constant 82 : index
    %242 = vector.load %arg9[%c0_229, %c82_230] : memref<4x658xf32, #tpu.memory_space<vmem>>, vector<4x512xf32>
    %c17_231 = arith.constant 17 : index
    %c0_232 = arith.constant 0 : index
    %243 = vector.load %arg2[%c17_231, %c0_232] : memref<27x512xf32, #tpu.memory_space<vmem>>, vector<1x512xf32>
    %244 = vector.broadcast %243 : vector<1x512xf32> to vector<4x512xf32>
    %245 = arith.mulf %242, %244 : vector<4x512xf32>
    %c68_233 = arith.constant 68 : index
    %c0_234 = arith.constant 0 : index
    %246 = vector.load %arg10[%c68_233, %c0_234] : memref<128x512xf32, #tpu.memory_space<vmem>>, vector<4x512xf32>
    tpu.vector_store %arg10[%c68_233, %c0_234], %245 {strides = array<i32>} : memref<128x512xf32, #tpu.memory_space<vmem>>, vector<4x512xf32>,
    %c0_235 = arith.constant 0 : index
    %c128_236 = arith.constant 128 : index
    %247 = vector.load %arg9[%c0_235, %c128_236] : memref<4x658xf32, #tpu.memory_space<vmem>>, vector<4x512xf32>
    %c18_237 = arith.constant 18 : index
    %c0_238 = arith.constant 0 : index
    %248 = vector.load %arg2[%c18_237, %c0_238] : memref<27x512xf32, #tpu.memory_space<vmem>>, vector<1x512xf32>
    %249 = vector.broadcast %248 : vector<1x512xf32> to vector<4x512xf32>
    %250 = arith.mulf %247, %249 : vector<4x512xf32>
    %c72_239 = arith.constant 72 : index
    %c0_240 = arith.constant 0 : index
    %251 = vector.load %arg10[%c72_239, %c0_240] : memref<128x512xf32, #tpu.memory_space<vmem>>, vector<4x512xf32>
    tpu.vector_store %arg10[%c72_239, %c0_240], %250 {strides = array<i32>} : memref<128x512xf32, #tpu.memory_space<vmem>>, vector<4x512xf32>,
    %c0_241 = arith.constant 0 : index
    %c129_242 = arith.constant 129 : index
    %252 = vector.load %arg9[%c0_241, %c129_242] : memref<4x658xf32, #tpu.memory_space<vmem>>, vector<4x512xf32>
    %c19_243 = arith.constant 19 : index
    %c0_244 = arith.constant 0 : index
    %253 = vector.load %arg2[%c19_243, %c0_244] : memref<27x512xf32, #tpu.memory_space<vmem>>, vector<1x512xf32>
    %254 = vector.broadcast %253 : vector<1x512xf32> to vector<4x512xf32>
    %255 = arith.mulf %252, %254 : vector<4x512xf32>
    %c76_245 = arith.constant 76 : index
    %c0_246 = arith.constant 0 : index
    %256 = vector.load %arg10[%c76_245, %c0_246] : memref<128x512xf32, #tpu.memory_space<vmem>>, vector<4x512xf32>
    tpu.vector_store %arg10[%c76_245, %c0_246], %255 {strides = array<i32>} : memref<128x512xf32, #tpu.memory_space<vmem>>, vector<4x512xf32>,
    %c0_247 = arith.constant 0 : index
    %c130_248 = arith.constant 130 : index
    %257 = vector.load %arg9[%c0_247, %c130_248] : memref<4x658xf32, #tpu.memory_space<vmem>>, vector<4x512xf32>
    %c20_249 = arith.constant 20 : index
    %c0_250 = arith.constant 0 : index
    %258 = vector.load %arg2[%c20_249, %c0_250] : memref<27x512xf32, #tpu.memory_space<vmem>>, vector<1x512xf32>
    %259 = vector.broadcast %258 : vector<1x512xf32> to vector<4x512xf32>
    %260 = arith.mulf %257, %259 : vector<4x512xf32>
    %c80_251 = arith.constant 80 : index
    %c0_252 = arith.constant 0 : index
    %261 = vector.load %arg10[%c80_251, %c0_252] : memref<128x512xf32, #tpu.memory_space<vmem>>, vector<4x512xf32>
    tpu.vector_store %arg10[%c80_251, %c0_252], %260 {strides = array<i32>} : memref<128x512xf32, #tpu.memory_space<vmem>>, vector<4x512xf32>,
    %c0_253 = arith.constant 0 : index
    %c136_254 = arith.constant 136 : index
    %262 = vector.load %arg9[%c0_253, %c136_254] : memref<4x658xf32, #tpu.memory_space<vmem>>, vector<4x512xf32>
    %c21_255 = arith.constant 21 : index
    %c0_256 = arith.constant 0 : index
    %263 = vector.load %arg2[%c21_255, %c0_256] : memref<27x512xf32, #tpu.memory_space<vmem>>, vector<1x512xf32>
    %264 = vector.broadcast %263 : vector<1x512xf32> to vector<4x512xf32>
    %265 = arith.mulf %262, %264 : vector<4x512xf32>
    %c84_257 = arith.constant 84 : index
    %c0_258 = arith.constant 0 : index
    %266 = vector.load %arg10[%c84_257, %c0_258] : memref<128x512xf32, #tpu.memory_space<vmem>>, vector<4x512xf32>
    tpu.vector_store %arg10[%c84_257, %c0_258], %265 {strides = array<i32>} : memref<128x512xf32, #tpu.memory_space<vmem>>, vector<4x512xf32>,
    %c0_259 = arith.constant 0 : index
    %c137_260 = arith.constant 137 : index
    %267 = vector.load %arg9[%c0_259, %c137_260] : memref<4x658xf32, #tpu.memory_space<vmem>>, vector<4x512xf32>
    %c22_261 = arith.constant 22 : index
    %c0_262 = arith.constant 0 : index
    %268 = vector.load %arg2[%c22_261, %c0_262] : memref<27x512xf32, #tpu.memory_space<vmem>>, vector<1x512xf32>
    %269 = vector.broadcast %268 : vector<1x512xf32> to vector<4x512xf32>
    %270 = arith.mulf %267, %269 : vector<4x512xf32>
    %c88_263 = arith.constant 88 : index
    %c0_264 = arith.constant 0 : index
    %271 = vector.load %arg10[%c88_263, %c0_264] : memref<128x512xf32, #tpu.memory_space<vmem>>, vector<4x512xf32>
    tpu.vector_store %arg10[%c88_263, %c0_264], %270 {strides = array<i32>} : memref<128x512xf32, #tpu.memory_space<vmem>>, vector<4x512xf32>,
    %c0_265 = arith.constant 0 : index
    %c138_266 = arith.constant 138 : index
    %272 = vector.load %arg9[%c0_265, %c138_266] : memref<4x658xf32, #tpu.memory_space<vmem>>, vector<4x512xf32>
    %c23_267 = arith.constant 23 : index
    %c0_268 = arith.constant 0 : index
    %273 = vector.load %arg2[%c23_267, %c0_268] : memref<27x512xf32, #tpu.memory_space<vmem>>, vector<1x512xf32>
    %274 = vector.broadcast %273 : vector<1x512xf32> to vector<4x512xf32>
    %275 = arith.mulf %272, %274 : vector<4x512xf32>
    %c92_269 = arith.constant 92 : index
    %c0_270 = arith.constant 0 : index
    %276 = vector.load %arg10[%c92_269, %c0_270] : memref<128x512xf32, #tpu.memory_space<vmem>>, vector<4x512xf32>
    tpu.vector_store %arg10[%c92_269, %c0_270], %275 {strides = array<i32>} : memref<128x512xf32, #tpu.memory_space<vmem>>, vector<4x512xf32>,
    %c0_271 = arith.constant 0 : index
    %c144_272 = arith.constant 144 : index
    %277 = vector.load %arg9[%c0_271, %c144_272] : memref<4x658xf32, #tpu.memory_space<vmem>>, vector<4x512xf32>
    %c24_273 = arith.constant 24 : index
    %c0_274 = arith.constant 0 : index
    %278 = vector.load %arg2[%c24_273, %c0_274] : memref<27x512xf32, #tpu.memory_space<vmem>>, vector<1x512xf32>
    %279 = vector.broadcast %278 : vector<1x512xf32> to vector<4x512xf32>
    %280 = arith.mulf %277, %279 : vector<4x512xf32>
    %c96_275 = arith.constant 96 : index
    %c0_276 = arith.constant 0 : index
    %281 = vector.load %arg10[%c96_275, %c0_276] : memref<128x512xf32, #tpu.memory_space<vmem>>, vector<4x512xf32>
    tpu.vector_store %arg10[%c96_275, %c0_276], %280 {strides = array<i32>} : memref<128x512xf32, #tpu.memory_space<vmem>>, vector<4x512xf32>,
    %c0_277 = arith.constant 0 : index
    %c145_278 = arith.constant 145 : index
    %282 = vector.load %arg9[%c0_277, %c145_278] : memref<4x658xf32, #tpu.memory_space<vmem>>, vector<4x512xf32>
    %c25_279 = arith.constant 25 : index
    %c0_280 = arith.constant 0 : index
    %283 = vector.load %arg2[%c25_279, %c0_280] : memref<27x512xf32, #tpu.memory_space<vmem>>, vector<1x512xf32>
    %284 = vector.broadcast %283 : vector<1x512xf32> to vector<4x512xf32>
    %285 = arith.mulf %282, %284 : vector<4x512xf32>
    %c100_281 = arith.constant 100 : index
    %c0_282 = arith.constant 0 : index
    %286 = vector.load %arg10[%c100_281, %c0_282] : memref<128x512xf32, #tpu.memory_space<vmem>>, vector<4x512xf32>
    tpu.vector_store %arg10[%c100_281, %c0_282], %285 {strides = array<i32>} : memref<128x512xf32, #tpu.memory_space<vmem>>, vector<4x512xf32>,
    %c0_283 = arith.constant 0 : index
    %c146_284 = arith.constant 146 : index
    %287 = vector.load %arg9[%c0_283, %c146_284] : memref<4x658xf32, #tpu.memory_space<vmem>>, vector<4x512xf32>
    %c26_285 = arith.constant 26 : index
    %c0_286 = arith.constant 0 : index
    %288 = vector.load %arg2[%c26_285, %c0_286] : memref<27x512xf32, #tpu.memory_space<vmem>>, vector<1x512xf32>
    %289 = vector.broadcast %288 : vector<1x512xf32> to vector<4x512xf32>
    %290 = arith.mulf %287, %289 : vector<4x512xf32>
    %c104_287 = arith.constant 104 : index
    %c0_288 = arith.constant 0 : index
    %291 = vector.load %arg10[%c104_287, %c0_288] : memref<128x512xf32, #tpu.memory_space<vmem>>, vector<4x512xf32>
    tpu.vector_store %arg10[%c104_287, %c0_288], %290 {strides = array<i32>} : memref<128x512xf32, #tpu.memory_space<vmem>>, vector<4x512xf32>,
    %c0_289 = arith.constant 0 : index
    %c0_290 = arith.constant 0 : index
    %292 = vector.load %arg5[%c0_289, %c0_290] : memref<8x128xf32, #tpu.memory_space<vmem>>, vector<8x128xf32>
    %c0_291 = arith.constant 0 : index
    %c0_292 = arith.constant 0 : index
    %293 = vector.load %arg10[%c0_291, %c0_292] : memref<128x512xf32, #tpu.memory_space<vmem>>, vector<128x512xf32>
    %cst_293 = arith.constant dense<0.000000e+00> : vector<8x512xf32>
    %294 = tpu.matmul %292, %293, %cst_293 {dimension_numbers = #tpu.dot_dimension_numbers<[1], [0], [0], [1], [0, 0, 1, 1], [], []>} : vector<8x128xf32>, vector<128x512xf32>, vector<8x512xf32> -> vector<8x512xf32>
    %c0_294 = arith.constant 0 : index
    %c0_295 = arith.constant 0 : index
    %295 = vector.load %arg6[%c0_294, %c0_295] : memref<8x1xf32, #tpu.memory_space<vmem>>, vector<8x1xf32>
    %296 = vector.broadcast %295 : vector<8x1xf32> to vector<8x512xf32>
    %297 = arith.addf %294, %296 : vector<8x512xf32>
    %cst_296 = arith.constant 0.000000e+00 : f32
    %298 = vector.broadcast %cst_296 : f32 to vector<8x512xf32>
    %299 = arith.maximumf %297, %298 : vector<8x512xf32>
    %c0_297 = arith.constant 0 : index
    %c0_298 = arith.constant 0 : index
    %c0_299 = arith.constant 0 : index
    %300 = vector.load %arg7[%c0_297, %c0_298, %c0_299] : memref<1x8x512xf32, #tpu.memory_space<vmem>>, vector<1x8x512xf32>
    %301 = vector.shape_cast %300 : vector<1x8x512xf32> to vector<8x512xf32>
    %302 = vector.shape_cast %299 : vector<8x512xf32> to vector<1x8x512xf32>
    tpu.vector_store %arg7[%c0_297, %c0_298, %c0_299], %302 {strides = array<i32>} : memref<1x8x512xf32, #tpu.memory_space<vmem>>, vector<1x8x512xf32>,
    return
  }
  func.func @transform_0(%arg0: i32) -> (i32, i32, i32) {
    %c0_i32 = arith.constant 0 : i32
    %c0_i32_0 = arith.constant 0 : i32
    %c0_i32_1 = arith.constant 0 : i32
    return %arg0, %c0_i32, %c0_i32_0 : i32, i32, i32
  }
  func.func @transform_1(%arg0: i32) -> (i32, i32) {
    %c0_i32 = arith.constant 0 : i32
    %c0_i32_0 = arith.constant 0 : i32
    %c0_i32_1 = arith.constant 0 : i32
    return %c0_i32, %c0_i32_0 : i32, i32
  }
  func.func @transform_2(%arg0: i32) -> (i32, i32) {
    %c0_i32 = arith.constant 0 : i32
    %c0_i32_0 = arith.constant 0 : i32
    %c0_i32_1 = arith.constant 0 : i32
    return %c0_i32, %c0_i32_0 : i32, i32
  }
  func.func @transform_3(%arg0: i32) -> (i32, i32) {
    %c0_i32 = arith.constant 0 : i32
    %c0_i32_0 = arith.constant 0 : i32
    %c0_i32_1 = arith.constant 0 : i32
    return %c0_i32, %c0_i32_0 : i32, i32
  }
  func.func @transform_4(%arg0: i32) -> (i32, i32) {
    %c0_i32 = arith.constant 0 : i32
    %c0_i32_0 = arith.constant 0 : i32
    %c0_i32_1 = arith.constant 0 : i32
    return %c0_i32, %c0_i32_0 : i32, i32
  }
  func.func @transform_5(%arg0: i32) -> (i32, i32) {
    %c0_i32 = arith.constant 0 : i32
    %c0_i32_0 = arith.constant 0 : i32
    %c0_i32_1 = arith.constant 0 : i32
    return %c0_i32, %c0_i32_0 : i32, i32
  }
  func.func @transform_6(%arg0: i32) -> (i32, i32, i32) {
    %c0_i32 = arith.constant 0 : i32
    %c0_i32_0 = arith.constant 0 : i32
    %c0_i32_1 = arith.constant 0 : i32
    return %arg0, %c0_i32, %c0_i32_0 : i32, i32, i32
  }
}

</mosaic_0001>

<bundles_post_ra>
// kernel: unet3d_down_forward.1
= control target key start
LH: loop header
LB: loop body
LE: loop exit
PB: predicated region body
PF: predicated region fallthrough
CT: control target
= control target key end

     0   :  { %s4242_s21 = smov 0   ;;  %s6685_s0 = inlined_call_operand.vmem [shape: f32[2,4,512], index: 0, kind: input, shape index: {}]   ;;  %s6686_s1 = inlined_call_operand.vmem [shape: f32[27,512], index: 1, kind: input, shape index: {}]   ;;  %s6687_s2 = inlined_call_operand.vmem [shape: f32[4,128], index: 2, kind: input, shape index: {}]   ;;  %s6688_s3 = inlined_call_operand.vmem [shape: f32[4,1], index: 3, kind: input, shape index: {}]   ;;  %s6689_s4 = inlined_call_operand.vmem [shape: f32[8,128], index: 4, kind: input, shape index: {}]   ;;  %s6690_s5 = inlined_call_operand.vmem [shape: f32[8,1], index: 5, kind: input, shape index: {}]   ;;  %s6691_s6 = inlined_call_operand.vmem [shape: f32[2,8,512], index: 6, kind: output, shape index: {}]  }
   0x1 LB: > { %s4053_s22 = sadd.s32 4294967295, %s4170_s21   ;;  %p4057_p0 = scmp.ge.s32.totalorder %s4170_s21, 1  ;;  %s4170_s21 = sphi %s4242_s21, %s16_s21  }
   0x2   : > { %p212_p1 = scmp.lt.s32.totalorder %s4170_s21, 3 }
   0x4   : > { %p213_p2 = pnand %p4057_p0, %p212_p1 }
   0x6   : > { %216 = sbr.rel (%p213_p2) target bundleno = 1648 (0x670), region = 44 }
   0xb   : > { %vm282_vm0 = vcmask 1043456   ;;  %v4253_v0 = vld [vmem:[%s6686_s1 + $0x3] ss:$8 sm:$0xf]  ;;  %p242_p3 = scmp.lt.s32.totalorder %s4053_s22, 1  ;;  %s4172_s30 = smov 8  }
   0xc   : > { %v467_v1 = vperm.slane %v4253_v0, 2  ;;  %v468_v2 = vperm.slane %v4253_v0, 3  ;;  %v4062_v3 = vld [vmem:[%s6686_s1 + $0x1] ss:$8 sm:$0xf]  ;;  %s4173_s10 = smov 1  }
   0xd   : > { %v332_v4 = vperm.slane %v4062_v3, 0  ;;  %v333_v5 = vperm.slane %v4062_v3, 1  ;;  %v4263_v6 = vld [vmem:[%s6686_s1 + $0x4] ss:$8 sm:$0xf]  ;;  %s7009_s22 = smov (!%p242_p3, %s4053_s22), 1 }
   0xe   : > { %v470_v7 = vrot.slane %v468_v2, 4  ;;  %v533_v8 = vperm.slane %v4263_v6, 1  ;;  %v335_v10 = vperm.slane %v4062_v3, 3  ;;  %s4116_s29 = sshll.u32 %s7009_s22, 4  ;;  %v532_v14 = vperm.slane %v4263_v6, 0  ;;  %s6702_s11 = smov 73  }
   0xf   : > { %v336_v9 = vrot.slane %v333_v5, 4  ;;  %s246_s9 = scalar_lea.vmem %s6685_s0, %s4116_s29  ;;  %v334_v16 = vperm.slane %v4062_v3, 2  ;;  %v4281_v18 = vld [vmem:[%s6686_s1 + $0x6] ss:$8 sm:$0xf]  ;;  %s4175_s16 = smov 9  }
  0x10   : > { %v472_v11 = vsel %vm282_vm0, %v467_v1, %v470_v7  ;;  %v270_v13 = vld [vmem:[%s246_s9] sm:$0xff]  ;;  %v536_v15 = vrot.slane %v533_v8, 4  ;;  %v337_v17 = vrot.slane %v335_v10, 4  ;;  %v668_v21 = vperm.slane %v4281_v18, 3  ;;  %v271_v24 = vld [vmem:[%s246_s9 + $0x8] sm:$0xff]  ;;  %s4176_s19 = smov 16  }
  0x11   : > { %475 = vrot.lane.b32.xlu2 %v472_v11, %s4172_s30  ;;  %v338_v12 = vsel %vm282_vm0, %v332_v4, %v336_v9  ;;  %274 = vrot.lane.b32.xlu0 %v270_v13, %s6702_s11  ;;  %v4063_v19 = vld [vmem:[%s6686_s1 + $0x2] ss:$8 sm:$0xf]  ;;  %v667_v26 = vperm.slane %v4281_v18, 2  ;;  %v466_v36 = vperm.slane %v4253_v0, 1  ;;  %v535_v38 = vperm.slane %v4263_v6, 3 }
  0x12   : > { %340 = vrot.lane.b32.xlu1 %v338_v12, %s4173_s10  ;;  %v538_v20 = vsel %vm282_vm0, %v532_v14, %v536_v15  ;;  %v339_v22 = vsel %vm282_vm0, %v334_v16, %v337_v17  ;;  %v402_v23 = vperm.slane %v4063_v19, 3  ;;  %v400_v25 = vperm.slane %v4063_v19, 1  ;;  %v4296_v30 = vld [vmem:[%s6686_s1 + $0x7] ss:$8 sm:$0xf]  ;;  %s4177_s20 = smov 2  }
  0x13   : > { %v670_v27 = vrot.slane %v668_v21, 4  ;;  %v401_v28 = vperm.slane %v4063_v19, 2  ;;  %v399_v31 = vperm.slane %v4063_v19, 0  ;;  %v732_v34 = vperm.slane %v4296_v30, 1  ;;  %s4178_s27 = smov 17   ;;  %s6712_s7 = smov 64  }
  0x14   : > { %v404_v29 = vrot.slane %v402_v23, 4  ;;  %v403_v32 = vrot.slane %v400_v25, 4  ;;  %v731_v39 = vperm.slane %v4296_v30, 0  ;;  %v465_v41 = vperm.slane %v4253_v0, 0  ;;  %s4180_s8 = smov 10   ;;  %s6695_s15 = smov 65  }
  0x15   : > { %v672_v33 = vsel %vm282_vm0, %v667_v26, %v670_v27  ;;  %v735_v40 = vrot.slane %v732_v34, 4  ;;  %v469_v42 = vrot.slane %v466_v36, 4  ;;  %v4312_v43 = vld [vmem:[%s6686_s1 + $0x21] ss:$8 sm:$0xf]  ;;  %v534_v44 = vperm.slane %v4263_v6, 2 }
  0x16   : > { %v406_v35 = vsel %vm282_vm0, %v401_v28, %v404_v29  ;;  %v405_v37 = vsel %vm282_vm0, %v399_v31, %v403_v32  ;;  %v537_v45 = vrot.slane %v535_v38, 4  ;;  %v4066_v46 = vld [vmem:[%s6686_s1 + $0x5] ss:$8 sm:$0xf]  ;;  %v867_v48 = vperm.slane %v4312_v43, 3  ;;  %s6700_s23 = smov 74  }
  0x17   : > { %v737_v47 = vsel %vm282_vm0, %v731_v39, %v735_v40  ;;  %v471_v49 = vsel %vm282_vm0, %v465_v41, %v469_v42  ;;  %v601_v50 = vperm.slane %v4066_v46, 3  ;;  %v599_v52 = vperm.slane %v4066_v46, 1  ;;  %v4329_v57 = vld [vmem:[%s6686_s1 + $0x22] ss:$8 sm:$0xf]  ;;  %s4183_s24 = smov 18  }
  0x18   : > { %v539_v51 = vsel %vm282_vm0, %v534_v44, %v537_v45  ;;  %v866_v53 = vperm.slane %v4312_v43, 2  ;;  %v869_v54 = vrot.slane %v867_v48, 4  ;;  %v600_v55 = vperm.slane %v4066_v46, 2  ;;  %v4345_v6 = vld [vmem:[%s6686_s1 + $0x26] ss:$8 sm:$0xf] }
  0x19   : > { %540 = vrot.lane.b32.xlu2 %v538_v20, %s4175_s16  ;;  %276 = vrot.lane.b32.xlu0 %v271_v24, %s6702_s11  ;;  %v603_v56 = vrot.slane %v601_v50, 4  ;;  %v598_v58 = vperm.slane %v4066_v46, 0  ;;  %v602_v59 = vrot.slane %v599_v52, 4  ;;  %v931_v61 = vperm.slane %v4329_v57, 1  ;;  %s6692_s9 = smov 80   ;;  %s6709_s14 = smov 81  }
  0x1a   : > { %342 = vrot.lane.b32.xlu1 %v339_v22, %s4173_s10  ;;  %v871_v60 = vsel %vm282_vm0, %v866_v53, %v869_v54  ;;  %v666_v63 = vperm.slane %v4281_v18, 1  ;;  %v734_v1 = vperm.slane %v4296_v30, 3  ;;  %v930_v2 = vperm.slane %v4329_v57, 0  ;;  %v4069_v9 = vld [vmem:[%s6686_s1 + $0x20] ss:$8 sm:$0xf] }
  0x1b   : > { %v605_v62 = vsel %vm282_vm0, %v600_v55, %v603_v56  ;;  %v604_v0 = vsel %vm282_vm0, %v598_v58, %v602_v59  ;;  %v934_v3 = vrot.slane %v931_v61, 4  ;;  %v665_v4 = vperm.slane %v4281_v18, 0  ;;  %v4362_v20 = vld [vmem:[%s6686_s1 + $0x27] ss:$8 sm:$0xf]  ;;  %s6714_s17 = smov 66  }
  0x1c   : > { %v669_v5 = vrot.slane %v666_v63, 4  ;;  %v733_v7 = vperm.slane %v4296_v30, 2  ;;  %v736_v8 = vrot.slane %v734_v1, 4  ;;  %v1196_v11 = vperm.slane %v4345_v6, 1  ;;  %s6704_s26 = smov 72   ;;  %s4189_s12 = smov 127  }
  0x1d   : > { %v936_v10 = vsel %vm282_vm0, %v930_v2, %v934_v3  ;;  %v801_v13 = vperm.slane %v4069_v9, 3  ;;  %v799_v15 = vperm.slane %v4069_v9, 1  ;;  %v1195_v16 = vperm.slane %v4345_v6, 0  ;;  %v4072_v36 = vld [vmem:[%s6686_s1 + $0x23] ss:$8 sm:$0xf] }
  0x1e   : > { %v671_v12 = vsel %vm282_vm0, %v665_v4, %v669_v5  ;;  %v738_v14 = vsel %vm282_vm0, %v733_v7, %v736_v8  ;;  %v1199_v17 = vrot.slane %v1196_v11, 4  ;;  %v800_v18 = vperm.slane %v4069_v9, 2  ;;  %v4074_v59 = vld [vmem:[%s6686_s1 + $0x25] ss:$8 sm:$0xf]  ;;  %s4190_s13 = smov 126  }
  0x1f   : > { %v803_v19 = vrot.slane %v801_v13, 4  ;;  %v798_v21 = vperm.slane %v4069_v9, 0  ;;  %v802_v22 = vrot.slane %v799_v15, 4  ;;  %v1262_v24 = vperm.slane %v4362_v20, 1  ;;  %s4191_s18 = smov 120   ;;  %s4192_s25 = smov 119  }
  0x20   : > { %v1201_v23 = vsel %vm282_vm0, %v1195_v16, %v1199_v17  ;;  %v865_v26 = vperm.slane %v4312_v43, 1  ;;  %v933_v28 = vperm.slane %v4329_v57, 3  ;;  %v1261_v29 = vperm.slane %v4362_v20, 0  ;;  %v295_v15 = vld [vmem:[%s6686_s1] ss:$8 sm:$0xf] }
  0x21   : > { %675 = vrot.lane.b32.xlu2 %v672_v33, %s4176_s19  ;;  %407 = vrot.lane.b32.xlu0 %v405_v37, %s4177_s20  ;;  %v805_v25 = vsel %vm282_vm0, %v800_v18, %v803_v19  ;;  %v804_v27 = vsel %vm282_vm0, %v798_v21, %v802_v22  ;;  %v1265_v30 = vrot.slane %v1262_v24, 4  ;;  %v864_v31 = vperm.slane %v4312_v43, 0  ;;  %v4378_v33 = vld [vmem:[%s6686_s1 + $0x40] ss:$8 sm:$0xf]  ;;  %s6755_s28 = smov 118  }
  0x22   : > { %409 = vrot.lane.b32.xlu1 %v406_v35, %s4177_s20  ;;  %v868_v32 = vrot.slane %v865_v26, 4  ;;  %v932_v34 = vperm.slane %v4329_v57, 2  ;;  %v935_v35 = vrot.slane %v933_v28, 4  ;;  %v1329_v38 = vperm.slane %v4378_v33, 1  ;;  %s6753_s29 = smov 112  }
  0x23   : > { %v1267_v37 = vsel %vm282_vm0, %v1261_v29, %v1265_v30  ;;  %v999_v40 = vperm.slane %v4072_v36, 3  ;;  %v997_v42 = vperm.slane %v4072_v36, 1  ;;  %v1328_v43 = vperm.slane %v4378_v33, 0 }
  0x24   : > { %v870_v39 = vsel %vm282_vm0, %v864_v31, %v868_v32  ;;  %v937_v41 = vsel %vm282_vm0, %v932_v34, %v935_v35  ;;  %v1332_v44 = vrot.slane %v1329_v38, 4  ;;  %v998_v45 = vperm.slane %v4072_v36, 2 }
  0x25   : > { %v1001_v46 = vrot.slane %v999_v40, 4  ;;  %v1000_v48 = vrot.slane %v997_v42, 4  ;;  %v1132_v61 = vperm.slane %v4074_v59, 3  ;;  %v1130_v63 = vperm.slane %v4074_v59, 1 }
  0x26   : > { %v1334_v50 = vsel %vm282_vm0, %v1328_v43, %v1332_v44  ;;  %v1129_v2 = vperm.slane %v4074_v59, 0  ;;  %v1198_v7 = vperm.slane %v4345_v6, 3  ;;  %v1197_v8 = vperm.slane %v4345_v6, 2 }
  0x27   : > { %v1134_v1 = vrot.slane %v1132_v61, 4  ;;  %v1133_v3 = vrot.slane %v1130_v63, 4  ;;  %vm6716_vm1 = vcmask 592896   ;;  %v1264_v11 = vperm.slane %v4362_v20, 3 }
  0x28   : > { %v1200_v9 = vrot.slane %v1198_v7, 4  ;;  %v1263_v6 = vperm.slane %v4362_v20, 2  ;;  %vm267_vm2 = vcmask 146436   ;;  %vm266_vm3 = vcmask 1044040  }
  0x29   : > { %739 = vrot.lane.b32.xlu2 %v737_v47, %s4178_s27  ;;  %542 = vrot.lane.b32.xlu0 %v539_v51, %s4175_s16  ;;  %v996_v47 = vperm.slane %v4072_v36, 0  ;;  %v1003_v51 = vsel %vm282_vm0, %v998_v45, %v1001_v46  ;;  %v1135_v5 = vsel %vm282_vm0, %v1129_v2, %v1133_v3  ;;  %v1266_v13 = vrot.slane %v1264_v11, 4  ;;  %vm268_vm4 = vmor %vm267_vm2, %vm266_vm3 }
  0x2a   : > { %473 = vrot.lane.b32.xlu1 %v471_v49, %s4172_s30  ;;  %v4073_v49 = vld [vmem:[%s6686_s1 + $0x24] ss:$8 sm:$0xf]  ;;  %vm288_vm5 = vcmask 1047556   ;;  %vm6711_vm6 = vcmask 596992   ;;  %v298_v19 = vperm.slane %v295_v15, 1 }
  0x2b   : > { %v1066_v52 = vperm.slane %v4073_v49, 3  ;;  %v1002_v53 = vsel %vm282_vm0, %v996_v47, %v1000_v48  ;;  %v1064_v54 = vperm.slane %v4073_v49, 1  ;;  %v1065_v55 = vperm.slane %v4073_v49, 2  ;;  %vm4425_vm7 = vmor %vm288_vm5, %vm266_vm3 }
  0x2c   : > { %v1063_v57 = vperm.slane %v4073_v49, 0  ;;  %v300_v22 = vperm.slane %v295_v15, 3  ;;  %v301_v24 = vrot.slane %v298_v19, 4  ;;  %v299_v26 = vperm.slane %v295_v15, 2 }
  0x2d   : > { %v1068_v56 = vrot.slane %v1066_v52, 4  ;;  %v1067_v58 = vrot.slane %v1064_v54, 4  ;;  %vm346_vm8 = vcmask 7168   ;;  %vm413_vm9 = vcmask 15360  }
  0x2e   : > { %vm6735_vm10 = vcmask 64512   ;;  %vm6731_vm11 = vcmask 72704   ;;  %vm612_vm12 = vcmask 80896   ;;  %vm679_vm13 = vcmask 130048  }
  0x2f   : > { %vm745_vm14 = vcmask 138240   ;;  %vm812_vm15 = vcmask 146432   ;;  %vm6726_vm2 = vcmask 523264   ;;  %vm6699_vm3 = vcmask 531456  }
  0x30   : > { %vm6694_vm5 = vcmask 588800  }
  0x31   : > { %874 = vrot.lane.b32.xlu2 %v871_v60, %s6712_s7  ;;  %606 = vrot.lane.b32.xlu0 %v604_v0, %s4180_s8  ;;  %v1070_v60 = vsel %vm282_vm0, %v1065_v55, %v1068_v56  ;;  %v1131_v0 = vperm.slane %v4074_v59, 2 }
  0x32   : > { %608 = vrot.lane.b32.xlu1 %v605_v62, %s4180_s8  ;;  %v1069_v62 = vsel %vm282_vm0, %v1063_v57, %v1067_v58 }
  0x33   : > { %v1136_v4 = vsel %vm282_vm0, %v1131_v0, %v1134_v1 }
  0x39   : > { %938 = vrot.lane.b32.xlu2 %v936_v10, %s6695_s15  ;;  %741 = vrot.lane.b32.xlu0 %v738_v14, %s4178_s27  ;;  %v1202_v10 = vsel %vm282_vm0, %v1197_v8, %v1200_v9  ;;  %v1268_v14 = vsel %vm282_vm0, %v1263_v6, %v1266_v13 }
  0x3a   : > { %673 = vrot.lane.b32.xlu1 %v671_v12, %s4176_s19  ;;  %v4188_v12 = vmov 0.0  }
  0x3b   : > { %265 = vst.msk [vmem:[#allocation2] sm:$0xf] %vm6716_vm1, %v4188_v12  ;;  %2136 = vmatpush.msra.mxu3 %v4188_v12  ;;  %2116 = vmatpush.msra.mxu2 %v4188_v12 }
  0x3c   : > { %256 = vst [vmem:[#allocation4 + $0x1f0] sm:$0xff] %v4188_v12  ;;  %2096 = vmatpush.msra.mxu1 %v4188_v12  ;;  %2076 = vmatpush.msra.mxu0 %v4188_v12 }
  0x3d   : > { %252 = vst [vmem:[#allocation4 + $0x50] sm:$0xf0] %v4188_v12  ;;  %2137 = vmatpush.msra.mxu3 %v4188_v12  ;;  %2117 = vmatpush.msra.mxu2 %v4188_v12 }
  0x3e   : > { %253 = vst [vmem:[#allocation4 + $0x150] sm:$0xf0] %v4188_v12  ;;  %2097 = vmatpush.msra.mxu1 %v4188_v12  ;;  %2077 = vmatpush.msra.mxu0 %v4188_v12 }
  0x3f   : > { %254 = vst [vmem:[#allocation4 + $0x78] sm:$0xf0] %v4188_v12 }
  0x40   : > { %255 = vst [vmem:[#allocation4 + $0x1b8] sm:$0xf0] %v4188_v12 }
  0x41   : > { %1203 = vrot.lane.b32.xlu2 %v1201_v23, %s6700_s23  ;;  %806 = vrot.lane.b32.xlu0 %v804_v27, %s4183_s24  ;;  %2160 = vst.msk [vmem:[#allocation3] sm:$0xf] %vm6716_vm1, %v4188_v12  ;;  %v297_v23 = vperm.slane %v295_v15, 0  ;;  %v302_v27 = vrot.slane %v300_v22, 4 }
  0x42   : > { %808 = vrot.lane.b32.xlu1 %v805_v25, %s4183_s24  ;;  %269 = vst.msk [vmem:[#allocation2 + $0x10] sm:$0xff] %vm268_vm4, %v4188_v12 }
  0x43   : > { %2161 = vst.msk [vmem:[#allocation3 + $0x10] sm:$0xff] %vm268_vm4, %v4188_v12  ;;  %v303_v29 = vsel %vm282_vm0, %v297_v23, %v301_v24  ;;  %v304_v34 = vsel %vm282_vm0, %v299_v26, %v302_v27  ;;  %vm6697_vm4 = vcmask 539648  }
  0x49   : > { %1269 = vrot.lane.b32.xlu2 %v1267_v37, %s6692_s9  ;;  %940 = vrot.lane.b32.xlu0 %v937_v41, %s6695_s15  ;;  %s6749_s15 = smov 110  }
  0x4a   : > { %872 = vrot.lane.b32.xlu1 %v870_v39, %s6712_s7 }
  0x51   : > { %1336 = vrot.lane.b32.xlu2 %v1334_v50, %s6709_s14  ;;  %1004 = vrot.lane.b32.xlu0 %v1002_v53, %s6714_s17 }
  0x52   : > { %1006 = vrot.lane.b32.xlu1 %v1003_v51, %s6714_s17  ;;  %s6743_s17 = smov 54  }
  0x59   : > { %1071 = vrot.lane.b32.xlu0 %v1069_v62, %s6704_s26 }
  0x5a   : > { %1073 = vrot.lane.b32.xlu1 %v1070_v60, %s6704_s26  ;;  %s6745_s26 = smov 62  }
  0x61   : > { %1137 = vrot.lane.b32.xlu0 %v1135_v5, %s6702_s11 }
  0x62   : > { %1139 = vrot.lane.b32.xlu1 %v1136_v4, %s6702_s11  ;;  %s6707_s11 = smov 82  }
  0x69   : > { %1205 = vrot.lane.b32.xlu0 %v1202_v10, %s6700_s23  ;;  %s6747_s23 = smov 63  }
  0x6b   : > { %v476_v55 = vpop.permute.xlu2 %475 }
  0x6c   : > { %v478_v4 = vrot.slane %v476_v55, 4 }
  0x71   : > { %1271 = vrot.lane.b32.xlu0 %v1268_v14, %s6692_s9  ;;  %s6751_s9 = smov 111  }
  0x73   : > { %v541_v10 = vpop.permute.xlu2 %540 }
  0x74   : > { %v544_v12 = vrot.slane %v541_v10, 4 }
  0x76   : > { %v547_v22 = vsel %vm6731_vm11, %v544_v12, %v541_v10 }
  0x83   : > { %v275_v17 = vpop.permute.xlu0 %274 }
  0x84   : > { %v341_v16 = vpop.permute.xlu1 %340  ;;  %v278_v20 = vrot.slane %v275_v17, 4 }
  0x85   : > { %v344_v39 = vrot.slane %v341_v16, 4 }
  0x86   : > { %v281_v21 = vsel %vm6711_vm6, %v278_v20, %v275_v17 }
  0x87   : > { %290 = vst.msk [vmem:[#allocation2] sm:$0xff] %vm4425_vm7, %v281_v21  ;;  %v347_v44 = vsel %vm346_vm8, %v344_v39, %v341_v16 }
  0x8b   : > { %v277_v28 = vpop.permute.xlu0 %276 }
  0x8c   : > { %v343_v25 = vpop.permute.xlu1 %342  ;;  %v279_v30 = vrot.slane %v277_v28, 4 }
  0x8d   : > { %v345_v37 = vrot.slane %v343_v25, 4 }
  0x8e   : > { %v4433_v31 = vld [vmem:[#allocation2] sm:$0xff]  ;;  %v283_v32 = vsel %vm282_vm0, %v278_v20, %v279_v30  ;;  %292 = vst.msk [vmem:[#allocation2 + $0x10] sm:$0xf] %vm6716_vm1, %v279_v30  ;;  %vm579_vm1 = vcmask 973824  }
  0x8f   : > { %v307_v35 = vmul.f32 %v303_v29, %v4433_v31  ;;  %v4440_v36 = vsel %vm6711_vm6, %v283_v32, %v277_v28  ;;  %v348_v42 = vsel %vm282_vm0, %v344_v39, %v345_v37  ;;  %v353_v45 = vmul.f32 %v347_v44, %v4433_v31 }
  0x90   : > { %v308_v38 = vmul.f32 %v304_v34, %v4440_v36  ;;  %291 = vst [vmem:[#allocation2 + $0x8] sm:$0xff] %v4440_v36  ;;  %v349_v49 = vsel %vm346_vm8, %v348_v42, %v343_v25  ;;  %v553_v28 = vmul.f32 %v547_v22, %v4433_v31 }
  0x91   : > { %311 = vst [vmem:[#allocation1] ss:$2 sm:$0xff] %v307_v35  ;;  %v354_v53 = vmul.f32 %v349_v49, %v4440_v36 }
  0x92   : > { %313 = vst [vmem:[#allocation1 + $0x10] ss:$2 sm:$0xff] %v308_v38 }
  0x93   : > { %v408_v41 = vpop.permute.xlu0 %407 }
  0x94   : > { %v410_v40 = vpop.permute.xlu1 %409  ;;  %v411_v46 = vrot.slane %v408_v41, 4 }
  0x95   : > { %v328_v43 = vld [vmem:[#allocation2 + $0x10] sm:$0xf]  ;;  %v412_v51 = vrot.slane %v410_v40, 4 }
  0x96   : > { %v355_v50 = vmul.f32 %v345_v37, %v328_v43  ;;  %v414_v56 = vsel %vm413_vm9, %v411_v46, %v408_v41  ;;  %v395_v59 = vld [vmem:[#allocation2 + $0x10] sm:$0xf] }
  0x97   : > { %v415_v58 = vsel %vm282_vm0, %v411_v46, %v412_v51  ;;  %v420_v60 = vmul.f32 %v414_v56, %v4433_v31  ;;  %v422_v1 = vmul.f32 %v412_v51, %v395_v59  ;;  %v461_v6 = vld [vmem:[#allocation2 + $0x10] sm:$0xf] }
  0x98   : > { %v314_v47 = vld.sshfl [vmem:[#allocation1] sm:$0xff pattern:$0x75316420]  ;;  %v315_v48 = vld.sshfl [vmem:[#allocation1 + $0x8] sm:$0xff pattern:$0x75316420]  ;;  %v416_v0 = vsel %vm413_vm9, %v415_v58, %v410_v40  ;;  %v488_v17 = vmul.f32 %v478_v4, %v461_v6  ;;  %v676_v40 = vpop.permute.xlu2 %675 }
  0x99   : > { %360 = vst [vmem:[#allocation1 + $0x1] ss:$2 sm:$0xff] %v353_v45  ;;  %v316_v52 = vld.sshfl [vmem:[#allocation1 + $0x10] sm:$0xff pattern:$0x75316420]  ;;  %v421_v7 = vmul.f32 %v416_v0, %v4440_v36  ;;  %v678_v56 = vrot.slane %v676_v40, 4 }
  0x9a   : > { %322 = vst [vmem:[#allocation4 + $0xc0] sm:$0xf] %v314_v47  ;;  %v317_v54 = vld.sshfl [vmem:[#allocation1 + $0x18] sm:$0xff pattern:$0x75316420] }
  0x9b   : > { %323 = vst [vmem:[#allocation4 + $0xf0] sm:$0xf] %v315_v48  ;;  %v543_v2 = vpop.permute.xlu0 %542  ;;  %v528_v34 = vld [vmem:[#allocation2 + $0x10] sm:$0xf] }
  0x9c   : > { %364 = vst [vmem:[#allocation1 + $0x21] ss:$2 sm:$0xff] %v355_v50  ;;  %v474_v57 = vpop.permute.xlu1 %473  ;;  %v545_v19 = vrot.slane %v543_v2, 4  ;;  %v594_v51 = vld [vmem:[#allocation2 + $0x10] sm:$0xf] }
  0x9d   : > { %362 = vst [vmem:[#allocation1 + $0x11] ss:$2 sm:$0xff] %v354_v53  ;;  %v477_v61 = vrot.slane %v474_v57, 4  ;;  %v661_v0 = vld [vmem:[#allocation2 + $0x10] sm:$0xf] }
  0x9e   : > { %324 = vst [vmem:[#allocation4 + $0xa8] sm:$0xf] %v316_v52  ;;  %v548_v27 = vsel %vm282_vm0, %v544_v12, %v545_v19  ;;  %v555_v37 = vmul.f32 %v545_v19, %v528_v34 }
  0x9f   : > { %325 = vst [vmem:[#allocation4] sm:$0xf] %v317_v54  ;;  %v480_v8 = vsel %vm6735_vm10, %v477_v61, %v474_v57  ;;  %v481_v11 = vsel %vm282_vm0, %v477_v61, %v478_v4  ;;  %v549_v35 = vsel %vm6731_vm11, %v548_v27, %v543_v2 }
  0xa0   : > { %v365_v62 = vld.sshfl [vmem:[#allocation1] sm:$0xff pattern:$0x75316420]  ;;  %v366_v63 = vld.sshfl [vmem:[#allocation1 + $0x8] sm:$0xff pattern:$0x75316420]  ;;  %v486_v13 = vmul.f32 %v480_v8, %v4433_v31  ;;  %v482_v16 = vsel %vm6735_vm10, %v481_v11, %v476_v55  ;;  %v554_v41 = vmul.f32 %v549_v35, %v4440_v36  ;;  %v740_v61 = vpop.permute.xlu2 %739 }
  0xa1   : > { %426 = vst [vmem:[#allocation1] ss:$2 sm:$0xff] %v420_v60  ;;  %v487_v23 = vmul.f32 %v482_v16, %v4440_v36 }
  0xa3   : > { %v369_v3 = vld.sshfl [vmem:[#allocation1 + $0x20] sm:$0xff pattern:$0x75316420]  ;;  %v607_v24 = vpop.permute.xlu0 %606 }
  0xa4   : > { %430 = vst [vmem:[#allocation1 + $0x20] ss:$2 sm:$0xff] %v422_v1  ;;  %v367_v5 = vld.sshfl [vmem:[#allocation1 + $0x10] sm:$0xff pattern:$0x75316420]  ;;  %378 = vrot.lane.b32.xlu2 %v369_v3, %s4189_s12  ;;  %v609_v20 = vpop.permute.xlu1 %608  ;;  %v610_v29 = vrot.slane %v607_v24, 4 }
  0xa5   : > { %v368_v9 = vld.sshfl [vmem:[#allocation1 + $0x18] sm:$0xff pattern:$0x75316420]  ;;  %v611_v38 = vrot.slane %v609_v20, 4 }
  0xa6   : > { %428 = vst [vmem:[#allocation1 + $0x10] ss:$2 sm:$0xff] %v421_v7  ;;  %376 = vrot.lane.b32.xlu1 %v368_v9, %s4189_s12  ;;  %v613_v42 = vsel %vm612_vm12, %v610_v29, %v607_v24 }
  0xa7   : > { %v614_v46 = vsel %vm282_vm0, %v610_v29, %v611_v38  ;;  %v619_v47 = vmul.f32 %v613_v42, %v4433_v31  ;;  %v621_v54 = vmul.f32 %v611_v38, %v594_v51 }
  0xa8   : > { %v431_v14 = vld.sshfl [vmem:[#allocation1] sm:$0xff pattern:$0x75316420]  ;;  %v432_v15 = vld.sshfl [vmem:[#allocation1 + $0x8] sm:$0xff pattern:$0x75316420]  ;;  %v615_v52 = vsel %vm612_vm12, %v614_v46, %v609_v20  ;;  %v875_v22 = vpop.permute.xlu2 %874 }
  0xa9   : > { %493 = vst [vmem:[#allocation1 + $0x1] ss:$2 sm:$0xff] %v486_v13  ;;  %v620_v57 = vmul.f32 %v615_v52, %v4440_v36  ;;  %v727_v20 = vld [vmem:[#allocation2 + $0x10] sm:$0xf] }
  0xab   : > { %v435_v21 = vld.sshfl [vmem:[#allocation1 + $0x20] sm:$0xff pattern:$0x75316420]  ;;  %v742_v53 = vpop.permute.xlu0 %741 }
  0xac   : > { %497 = vst [vmem:[#allocation1 + $0x21] ss:$2 sm:$0xff] %v488_v17  ;;  %370 = vrot.lane.b32.xlu2 %v365_v62, %s4189_s12  ;;  %444 = vrot.lane.b32.xlu0 %v435_v21, %s4190_s13  ;;  %v674_v43 = vpop.permute.xlu1 %673  ;;  %v744_v7 = vrot.slane %v742_v53, 4 }
  0xad   : > { %v433_v25 = vld.sshfl [vmem:[#allocation1 + $0x10] sm:$0xff pattern:$0x75316420]  ;;  %v4464_v26 = vld.sshfl [vmem:[#allocation1 + $0x18] sm:$0xff pattern:$0x75316420] }
  0xae   : > { %495 = vst [vmem:[#allocation1 + $0x11] ss:$2 sm:$0xff] %v487_v23  ;;  %v677_v48 = vrot.slane %v674_v43, 4  ;;  %v754_v23 = vmul.f32 %v744_v7, %v727_v20 }
  0xb0   : > { %v498_v30 = vld.sshfl [vmem:[#allocation1] sm:$0xff pattern:$0x75316420]  ;;  %v4468_v32 = vld.sshfl [vmem:[#allocation1 + $0x8] sm:$0xff pattern:$0x75316420]  ;;  %v680_v58 = vsel %vm679_vm13, %v677_v48, %v674_v43  ;;  %v681_v62 = vsel %vm282_vm0, %v677_v48, %v678_v56  ;;  %v939_v46 = vpop.permute.xlu2 %938 }
  0xb1   : > { %559 = vst [vmem:[#allocation1] ss:$2 sm:$0xff] %v553_v28  ;;  %v686_v1 = vmul.f32 %v680_v58, %v4433_v31  ;;  %v682_v4 = vsel %vm679_vm13, %v681_v62, %v676_v40  ;;  %v794_v40 = vld [vmem:[#allocation2 + $0x10] sm:$0xf] }
  0xb2   : > { %v687_v12 = vmul.f32 %v682_v4, %v4440_v36 }
  0xb3   : > { %v502_v39 = vld.sshfl [vmem:[#allocation1 + $0x20] sm:$0xff pattern:$0x75316420]  ;;  %v807_v10 = vpop.permute.xlu0 %806 }
  0xb4   : > { %563 = vst [vmem:[#allocation1 + $0x20] ss:$2 sm:$0xff] %v555_v37  ;;  %372 = vrot.lane.b32.xlu2 %v366_v63, %s4189_s12  ;;  %374 = vrot.lane.b32.xlu0 %v367_v5, %s4189_s12  ;;  %v743_v63 = vrot.slane %v740_v61, 4  ;;  %v688_v5 = vmul.f32 %v678_v56, %v661_v0  ;;  %v809_v8 = vpop.permute.xlu1 %808  ;;  %v810_v16 = vrot.slane %v807_v10, 4 }
  0xb5   : > { %v4475_v44 = vld.sshfl [vmem:[#allocation1 + $0x10] sm:$0xff pattern:$0x75316420]  ;;  %v4477_v45 = vld.sshfl [vmem:[#allocation1 + $0x18] sm:$0xff pattern:$0x75316420]  ;;  %511 = vrot.lane.b32.xlu1 %v502_v39, %s4191_s18 }
  0xb6   : > { %561 = vst [vmem:[#allocation1 + $0x10] ss:$2 sm:$0xff] %v554_v41  ;;  %v746_v11 = vsel %vm745_vm14, %v743_v63, %v740_v61  ;;  %v811_v24 = vrot.slane %v809_v8, 4  ;;  %v813_v27 = vsel %vm812_vm15, %v810_v16, %v807_v10 }
  0xb7   : > { %v819_v35 = vmul.f32 %v813_v27, %v4433_v31 }
  0xb8   : > { %v4482_v49 = vld.sshfl [vmem:[#allocation1] sm:$0xff pattern:$0x75316420]  ;;  %v4484_v50 = vld.sshfl [vmem:[#allocation1 + $0x8] sm:$0xff pattern:$0x75316420]  ;;  %v814_v34 = vsel %vm282_vm0, %v810_v16, %v811_v24  ;;  %v821_v42 = vmul.f32 %v811_v24, %v794_v40 }
  0xb9   : > { %626 = vst [vmem:[#allocation1 + $0x1] ss:$2 sm:$0xff] %v619_v47  ;;  %v815_v41 = vsel %vm812_vm15, %v814_v34, %v809_v8  ;;  %v992_v34 = vld [vmem:[#allocation2 + $0x10] sm:$0xf] }
  0xba   : > { %v820_v47 = vmul.f32 %v815_v41, %v4440_v36 }
  0xbb   : > { %v568_v55 = vld.sshfl [vmem:[#allocation1 + $0x20] sm:$0xff pattern:$0x75316420] }
  0xbc   : > { %630 = vst [vmem:[#allocation1 + $0x21] ss:$2 sm:$0xff] %v621_v54  ;;  %438 = vrot.lane.b32.xlu0 %v432_v15, %s4190_s13  ;;  %436 = vrot.lane.b32.xlu2 %v431_v14, %s4190_s13  ;;  %v747_v14 = vsel %vm282_vm0, %v743_v63, %v744_v7  ;;  %v752_v15 = vmul.f32 %v746_v11, %v4433_v31  ;;  %v873_v28 = vpop.permute.xlu1 %872  ;;  %v942_v54 = vrot.slane %v939_v46, 4 }
  0xbd   : > { %v4491_v59 = vld.sshfl [vmem:[#allocation1 + $0x10] sm:$0xff pattern:$0x75316420]  ;;  %v4493_v60 = vld.sshfl [vmem:[#allocation1 + $0x18] sm:$0xff pattern:$0x75316420]  ;;  %440 = vrot.lane.b32.xlu1 %v433_v25, %s4190_s13  ;;  %v748_v21 = vsel %vm745_vm14, %v747_v14, %v742_v53  ;;  %v4579_v14 = vpop.permute.xlu2 %1203 }
  0xbe   : > { %628 = vst [vmem:[#allocation1 + $0x11] ss:$2 sm:$0xff] %v620_v57  ;;  %v876_v37 = vrot.slane %v873_v28, 4  ;;  %v860_v53 = vld [vmem:[#allocation2 + $0x10] sm:$0xf]  ;;  %v945_v0 = vsel %vm6699_vm3, %v942_v54, %v939_v46 }
  0xbf   : > { %v951_v8 = vmul.f32 %v945_v0, %v4433_v31 }
  0xc0   : > { %v4498_v2 = vld.sshfl [vmem:[#allocation1] sm:$0xff pattern:$0x75316420]  ;;  %v4500_v3 = vld.sshfl [vmem:[#allocation1 + $0x8] sm:$0xff pattern:$0x75316420]  ;;  %v879_v48 = vsel %vm6726_vm2, %v876_v37, %v873_v28 }
  0xc1   : > { %692 = vst [vmem:[#allocation1] ss:$2 sm:$0xff] %v686_v1 }
  0xc3   : > { %v635_v9 = vld.sshfl [vmem:[#allocation1 + $0x20] sm:$0xff pattern:$0x75316420] }
  0xc4   : > { %696 = vst [vmem:[#allocation1 + $0x20] ss:$2 sm:$0xff] %v688_v5  ;;  %442 = vrot.lane.b32.xlu2 %v4464_v26, %s4190_s13  ;;  %503 = vrot.lane.b32.xlu0 %v498_v30, %s4191_s18  ;;  %v753_v26 = vmul.f32 %v748_v21, %v4440_v36 }
  0xc5   : > { %v4508_v6 = vld.sshfl [vmem:[#allocation1 + $0x10] sm:$0xff pattern:$0x75316420]  ;;  %v4510_v13 = vld.sshfl [vmem:[#allocation1 + $0x18] sm:$0xff pattern:$0x75316420]  ;;  %505 = vrot.lane.b32.xlu1 %v4468_v32, %s4191_s18  ;;  %v941_v32 = vpop.permute.xlu0 %940  ;;  %v4604_v41 = vpop.permute.xlu2 %1269 }
  0xc6   : > { %694 = vst [vmem:[#allocation1 + $0x10] ss:$2 sm:$0xff] %v687_v12  ;;  %v943_v62 = vrot.slane %v941_v32, 4 }
  0xc8   : > { %v4516_v17 = vld.sshfl [vmem:[#allocation1] sm:$0xff pattern:$0x75316420]  ;;  %v4518_v19 = vld.sshfl [vmem:[#allocation1 + $0x8] sm:$0xff pattern:$0x75316420]  ;;  %v946_v7 = vsel %vm282_vm0, %v942_v54, %v943_v62 }
  0xc9   : > { %759 = vst [vmem:[#allocation1 + $0x1] ss:$2 sm:$0xff] %v752_v15 }
  0xcb   : > { %v701_v25 = vld.sshfl [vmem:[#allocation1 + $0x20] sm:$0xff pattern:$0x75316420] }
  0xcc   : > { %763 = vst [vmem:[#allocation1 + $0x21] ss:$2 sm:$0xff] %v754_v23  ;;  %509 = vrot.lane.b32.xlu0 %v4477_v45, %s4191_s18  ;;  %577 = vrot.lane.b32.xlu2 %v568_v55, %s4192_s25  ;;  %v877_v45 = vrot.slane %v875_v22, 4  ;;  %v885_v55 = vmul.f32 %v879_v48, %v4433_v31 }
  0xcd   : > { %v4526_v29 = vld.sshfl [vmem:[#allocation1 + $0x10] sm:$0xff pattern:$0x75316420]  ;;  %v4528_v30 = vld.sshfl [vmem:[#allocation1 + $0x18] sm:$0xff pattern:$0x75316420]  ;;  %569 = vrot.lane.b32.xlu1 %v4482_v49, %s4192_s25  ;;  %v1005_v56 = vpop.permute.xlu0 %1004 }
  0xce   : > { %761 = vst [vmem:[#allocation1 + $0x11] ss:$2 sm:$0xff] %v753_v26  ;;  %v880_v52 = vsel %vm282_vm0, %v876_v37, %v877_v45  ;;  %v887_v61 = vmul.f32 %v877_v45, %v860_v53 }
  0xcf   : > { %v881_v58 = vsel %vm6726_vm2, %v880_v52, %v875_v22 }
  0xd0   : > { %v4534_v38 = vld.sshfl [vmem:[#allocation1] sm:$0xff pattern:$0x75316420]  ;;  %v4536_v39 = vld.sshfl [vmem:[#allocation1 + $0x8] sm:$0xff pattern:$0x75316420]  ;;  %v886_v1 = vmul.f32 %v881_v58, %v4440_v36 }
  0xd1   : > { %825 = vst [vmem:[#allocation1] ss:$2 sm:$0xff] %v819_v35 }
  0xd3   : > { %v4539_v43 = vld.sshfl [vmem:[#allocation1 + $0x20] sm:$0xff pattern:$0x75316420] }
  0xd4   : > { %829 = vst [vmem:[#allocation1 + $0x20] ss:$2 sm:$0xff] %v821_v42  ;;  %507 = vrot.lane.b32.xlu2 %v4475_v44, %s4191_s18  ;;  %644 = vrot.lane.b32.xlu0 %v635_v9, %s6755_s28  ;;  %v1008_v9 = vrot.slane %v1005_v56, 4 }
  0xd5   : > { %v4546_v49 = vld.sshfl [vmem:[#allocation1 + $0x10] sm:$0xff pattern:$0x75316420]  ;;  %v4548_v51 = vld.sshfl [vmem:[#allocation1 + $0x18] sm:$0xff pattern:$0x75316420]  ;;  %575 = vrot.lane.b32.xlu1 %v4493_v60, %s4192_s25  ;;  %v1007_v60 = vpop.permute.xlu1 %1006  ;;  %v1072_v12 = vpop.permute.xlu0 %1071 }
  0xd6   : > { %827 = vst [vmem:[#allocation1 + $0x10] ss:$2 sm:$0xff] %v820_v47  ;;  %v1009_v16 = vrot.slane %v1007_v60, 4  ;;  %v1011_v22 = vsel %vm6697_vm4, %v1008_v9, %v1005_v56  ;;  %v1075_v28 = vrot.slane %v1072_v12, 4  ;;  %v1059_v56 = vld [vmem:[#allocation2 + $0x10] sm:$0xf] }
  0xd7   : > { %v1017_v27 = vmul.f32 %v1011_v22, %v4433_v31 }
  0xd8   : > { %v4554_v57 = vld.sshfl [vmem:[#allocation1] sm:$0xff pattern:$0x75316420]  ;;  %v4556_v44 = vld.sshfl [vmem:[#allocation1 + $0x8] sm:$0xff pattern:$0x75316420]  ;;  %v1012_v26 = vsel %vm282_vm0, %v1008_v9, %v1009_v16  ;;  %v1019_v35 = vmul.f32 %v1009_v16, %v992_v34  ;;  %v1078_v45 = vsel %vm6694_vm5, %v1075_v28, %v1072_v12 }
  0xd9   : > { %892 = vst [vmem:[#allocation1 + $0x1] ss:$2 sm:$0xff] %v885_v55  ;;  %v1084_v52 = vmul.f32 %v1078_v45, %v4433_v31  ;;  %v1125_v12 = vld [vmem:[#allocation2 + $0x10] sm:$0xf] }
  0xdb   : > { %v4559_v63 = vld.sshfl [vmem:[#allocation1 + $0x20] sm:$0xff pattern:$0x75316420] }
  0xdc   : > { %896 = vst [vmem:[#allocation1 + $0x21] ss:$2 sm:$0xff] %v887_v61  ;;  %571 = vrot.lane.b32.xlu2 %v4484_v50, %s4192_s25  ;;  %573 = vrot.lane.b32.xlu0 %v4491_v59, %s4192_s25  ;;  %v926_v50 = vld [vmem:[#allocation2 + $0x10] sm:$0xf]  ;;  %v947_v59 = vsel %vm6699_vm3, %v946_v7, %v941_v32  ;;  %vm6717_vm3 = vcmask 1039360  }
  0xdd   : > { %v4567_v4 = vld.sshfl [vmem:[#allocation1 + $0x10] sm:$0xff pattern:$0x75316420]  ;;  %v4569_v5 = vld.sshfl [vmem:[#allocation1 + $0x18] sm:$0xff pattern:$0x75316420]  ;;  %710 = vrot.lane.b32.xlu1 %v701_v25, %s6753_s29  ;;  %v953_v15 = vmul.f32 %v943_v62, %v926_v50  ;;  %v952_v21 = vmul.f32 %v947_v59, %v4440_v36  ;;  %v1074_v25 = vpop.permute.xlu1 %1073 }
  0xde   : > { %894 = vst [vmem:[#allocation1 + $0x11] ss:$2 sm:$0xff] %v886_v1  ;;  %v1076_v37 = vrot.slane %v1074_v25, 4  ;;  %v1207_v50 = vrot.slane %v4579_v14, 4 }
  0xe0   : > { %v4574_v10 = vld.sshfl [vmem:[#allocation1] sm:$0xff pattern:$0x75316420]  ;;  %v4576_v11 = vld.sshfl [vmem:[#allocation1 + $0x8] sm:$0xff pattern:$0x75316420]  ;;  %v1079_v48 = vsel %vm282_vm0, %v1075_v28, %v1076_v37  ;;  %v1086_v58 = vmul.f32 %v1076_v37, %v1059_v56 }
  0xe1   : > { %957 = vst [vmem:[#allocation1] ss:$2 sm:$0xff] %v951_v8  ;;  %v4639_v8 = vpop.permute.xlu2 %1336 }
  0xe3   : > { %v4581_v20 = vld.sshfl [vmem:[#allocation1 + $0x20] sm:$0xff pattern:$0x75316420] }
  0xe4   : > { %961 = vst [vmem:[#allocation1 + $0x20] ss:$2 sm:$0xff] %v953_v15  ;;  %638 = vrot.lane.b32.xlu0 %v4500_v3, %s6755_s28  ;;  %636 = vrot.lane.b32.xlu2 %v4498_v2, %s6755_s28  ;;  %v1013_v2 = vsel %vm6697_vm4, %v1012_v26, %v1007_v60  ;;  %vm6706_vm4 = vcmask 654336  }
  0xe5   : > { %v4589_v23 = vld.sshfl [vmem:[#allocation1 + $0x10] sm:$0xff pattern:$0x75316420]  ;;  %v4591_v24 = vld.sshfl [vmem:[#allocation1 + $0x18] sm:$0xff pattern:$0x75316420]  ;;  %640 = vrot.lane.b32.xlu1 %v4508_v6, %s6755_s28  ;;  %v1138_v6 = vpop.permute.xlu0 %1137  ;;  %v1018_v42 = vmul.f32 %v1013_v2, %v4440_v36  ;;  %v1140_v53 = vpop.permute.xlu1 %1139 }
  0xe6   : > { %959 = vst [vmem:[#allocation1 + $0x10] ss:$2 sm:$0xff] %v952_v21  ;;  %v1141_v54 = vrot.slane %v1138_v6, 4  ;;  %v1142_v61 = vrot.slane %v1140_v53, 4  ;;  %v1273_v2 = vrot.slane %v4604_v41, 4 }
  0xe8   : > { %v4597_v32 = vld.sshfl [vmem:[#allocation1] sm:$0xff pattern:$0x75316420]  ;;  %v4599_v3 = vld.sshfl [vmem:[#allocation1 + $0x8] sm:$0xff pattern:$0x75316420]  ;;  %v1143_v60 = vsel %vm6711_vm6, %v1141_v54, %v1138_v6  ;;  %v1144_v9 = vsel %vm282_vm0, %v1141_v54, %v1142_v61  ;;  %v1151_v16 = vmul.f32 %v1142_v61, %v1125_v12 }
  0xe9   : > { %1024 = vst [vmem:[#allocation1 + $0x1] ss:$2 sm:$0xff] %v1017_v27  ;;  %v1145_v15 = vsel %vm6711_vm6, %v1144_v9, %v1140_v53  ;;  %vm6718_vm6 = vcmask 982016  }
  0xeb   : > { %v4602_v40 = vld.sshfl [vmem:[#allocation1 + $0x20] sm:$0xff pattern:$0x75316420] }
  0xec   : > { %1028 = vst [vmem:[#allocation1 + $0x21] ss:$2 sm:$0xff] %v1019_v35  ;;  %642 = vrot.lane.b32.xlu2 %v4510_v13, %s6755_s28  ;;  %702 = vrot.lane.b32.xlu0 %v4516_v17, %s6753_s29  ;;  %v1080_v17 = vsel %vm6694_vm5, %v1079_v48, %v1074_v25  ;;  %vm6698_vm5 = vcmask 605184   ;;  %v1150_v25 = vmul.f32 %v1145_v15, %v4440_v36 }
  0xed   : > { %v4612_v46 = vld.sshfl [vmem:[#allocation1 + $0x10] sm:$0xff pattern:$0x75316420]  ;;  %v4614_v47 = vld.sshfl [vmem:[#allocation1 + $0x18] sm:$0xff pattern:$0x75316420]  ;;  %704 = vrot.lane.b32.xlu1 %v4518_v19, %s6753_s29  ;;  %v1085_v19 = vmul.f32 %v1080_v17, %v4440_v36  ;;  %v1206_v7 = vpop.permute.xlu0 %1205  ;;  %v1210_v22 = vsel %vm6698_vm5, %v1207_v50, %v4579_v14  ;;  %v1276_v48 = vsel %vm6706_vm4, %v1273_v2, %v4604_v41 }
  0xee   : > { %1026 = vst [vmem:[#allocation1 + $0x11] ss:$2 sm:$0xff] %v1018_v42  ;;  %v1216_v34 = vmul.f32 %v1210_v22, %v4433_v31  ;;  %v1282_v41 = vmul.f32 %v1276_v48, %v4433_v31 }
  0xf0   : > { %v4620_v55 = vld.sshfl [vmem:[#allocation1] sm:$0xff pattern:$0x75316420]  ;;  %v4622_v13 = vld.sshfl [vmem:[#allocation1 + $0x8] sm:$0xff pattern:$0x75316420] }
  0xf1   : > { %1090 = vst [vmem:[#allocation1] ss:$2 sm:$0xff] %v1084_v52 }
  0xf3   : > { %v4625_v62 = vld.sshfl [vmem:[#allocation1 + $0x20] sm:$0xff pattern:$0x75316420] }
  0xf4   : > { %1094 = vst [vmem:[#allocation1 + $0x20] ss:$2 sm:$0xff] %v1086_v58  ;;  %708 = vrot.lane.b32.xlu0 %v4528_v30, %s6753_s29  ;;  %777 = vrot.lane.b32.xlu2 %v4539_v43, %s6751_s9  ;;  %v1149_v30 = vmul.f32 %v1143_v60, %v4433_v31 }
  0xf5   : > { %v4633_v0 = vld.sshfl [vmem:[#allocation1 + $0x10] sm:$0xff pattern:$0x75316420]  ;;  %v4635_v1 = vld.sshfl [vmem:[#allocation1 + $0x18] sm:$0xff pattern:$0x75316420]  ;;  %769 = vrot.lane.b32.xlu1 %v4534_v38, %s6751_s9 }
  0xf6   : > { %1092 = vst [vmem:[#allocation1 + $0x10] ss:$2 sm:$0xff] %v1085_v19  ;;  %v1208_v38 = vrot.slane %v1206_v7, 4 }
  0xf8   : > { %v4644_v59 = vld.sshfl [vmem:[#allocation1] sm:$0xff pattern:$0x75316420]  ;;  %v4646_v43 = vld.sshfl [vmem:[#allocation1 + $0x8] sm:$0xff pattern:$0x75316420]  ;;  %v1211_v14 = vsel %vm282_vm0, %v1207_v50, %v1208_v38 }
  0xf9   : > { %1156 = vst [vmem:[#allocation1 + $0x1] ss:$2 sm:$0xff] %v1149_v30  ;;  %v1212_v6 = vsel %vm6698_vm5, %v1211_v14, %v1206_v7  ;;  %vm6727_vm5 = vcmask 662528   ;;  %v1330_v14 = vperm.slane %v4378_v33, 2 }
  0xfa   : > { %v1217_v52 = vmul.f32 %v1212_v6, %v4440_v36 }
  0xfb   : > { %v4649_v21 = vld.sshfl [vmem:[#allocation1 + $0x20] sm:$0xff pattern:$0x75316420] }
  0xfc   : > { %1160 = vst [vmem:[#allocation1 + $0x21] ss:$2 sm:$0xff] %v1151_v16  ;;  %706 = vrot.lane.b32.xlu2 %v4526_v29, %s6753_s29  ;;  %843 = vrot.lane.b32.xlu0 %v4559_v63, %s6749_s15  ;;  %v1272_v29 = vpop.permute.xlu0 %1271  ;;  %v1191_v63 = vld [vmem:[#allocation2 + $0x10] sm:$0xf] }
  0xfd   : > { %v4658_v26 = vld.sshfl [vmem:[#allocation1 + $0x10] sm:$0xff pattern:$0x75316420]  ;;  %v4660_v27 = vld.sshfl [vmem:[#allocation1 + $0x18] sm:$0xff pattern:$0x75316420]  ;;  %775 = vrot.lane.b32.xlu1 %v4548_v51, %s6751_s9  ;;  %v1218_v42 = vmul.f32 %v1208_v38, %v1191_v63 }
  0xfe   : > { %1158 = vst [vmem:[#allocation1 + $0x11] ss:$2 sm:$0xff] %v1150_v25  ;;  %v379_v28 = vpop.permute.xlu2 %378  ;;  %v1274_v51 = vrot.slane %v1272_v29, 4  ;;  %v1331_v25 = vperm.slane %v4378_v33, 3 }
 0x100   : > { %v4667_v35 = vld.sshfl [vmem:[#allocation1] sm:$0xff pattern:$0x75316420]  ;;  %v4669_v37 = vld.sshfl [vmem:[#allocation1 + $0x8] sm:$0xff pattern:$0x75316420]  ;;  %v1277_v56 = vsel %vm282_vm0, %v1273_v2, %v1274_v51 }
 0x101   : > { %1222 = vst [vmem:[#allocation1] ss:$2 sm:$0xff] %v1216_v34  ;;  %v1278_v19 = vsel %vm6706_vm4, %v1277_v56, %v1272_v29  ;;  %vm6720_vm4 = vcmask 1031168  }
 0x102   : > { %v1283_v7 = vmul.f32 %v1278_v19, %v4440_v36 }
 0x103   : > { %v4672_v45 = vld.sshfl [vmem:[#allocation1 + $0x20] sm:$0xff pattern:$0x75316420] }
 0x104   : > { %1226 = vst [vmem:[#allocation1 + $0x20] ss:$2 sm:$0xff] %v1218_v42  ;;  %771 = vrot.lane.b32.xlu2 %v4536_v39, %s6751_s9  ;;  %773 = vrot.lane.b32.xlu0 %v4546_v49, %s6751_s9  ;;  %v1340_v39 = vrot.slane %v4639_v8, 4  ;;  %v1257_v49 = vld [vmem:[#allocation2 + $0x10] sm:$0xf] }
 0x105   : > { %v4681_v53 = vld.sshfl [vmem:[#allocation1 + $0x18] sm:$0xff pattern:$0x75316420]  ;;  %910 = vrot.lane.b32.xlu1 %v4581_v20, %s6712_s7  ;;  %v4685_v54 = vld.sshfl [vmem:[#allocation1 + $0x10] sm:$0xff pattern:$0x75316420]  ;;  %v1284_v20 = vmul.f32 %v1274_v51, %v1257_v49 }
 0x106   : > { %v371_v17 = vpop.permute.xlu2 %370  ;;  %1224 = vst [vmem:[#allocation1 + $0x10] ss:$2 sm:$0xff] %v1217_v52  ;;  %v1343_v9 = vsel %vm6727_vm5, %v1340_v39, %v4639_v8 }
 0x107   : > { %v1349_v12 = vmul.f32 %v1343_v9, %v4433_v31  ;;  %v4078_v31 = vld [vmem:[%s6686_s1 + $0x41] ss:$8 sm:$0xf] }
 0x108   : > { %v4689_v58 = vld.sshfl [vmem:[#allocation1 + $0x8] sm:$0xff pattern:$0x75316420]  ;;  %v4691_v61 = vld.sshfl [vmem:[#allocation1] sm:$0xff pattern:$0x75316420] }
 0x109   : > { %1289 = vst [vmem:[#allocation1 + $0x1] ss:$2 sm:$0xff] %v1282_v41  ;;  %v1397_v22 = vperm.slane %v4078_v31, 3  ;;  %v1394_v29 = vperm.slane %v4078_v31, 0 }
 0x10a   : > { %v4756_v41 = vld [vmem:[%s6686_s1 + $0x44] ss:$8 sm:$0xf] }
 0x10b   : > { %v4695_v60 = vld.sshfl [vmem:[#allocation1 + $0x20] sm:$0xff pattern:$0x75316420] }
 0x10c   : > { %1293 = vst [vmem:[#allocation1 + $0x21] ss:$2 sm:$0xff] %v1284_v20  ;;  %837 = vrot.lane.b32.xlu0 %v4556_v44, %s6749_s15  ;;  %835 = vrot.lane.b32.xlu2 %v4554_v57, %s6749_s15 }
 0x10d   : > { %839 = vrot.lane.b32.xlu1 %v4567_v4, %s6749_s15  ;;  %v4708_v50 = vld.sshfl [vmem:[#allocation1 + $0x18] sm:$0xff pattern:$0x75316420]  ;;  %v4710_v30 = vld.sshfl [vmem:[#allocation1 + $0x10] sm:$0xff pattern:$0x75316420] }
 0x10e   : > { %v373_v36 = vpop.permute.xlu2 %372  ;;  %1291 = vst [vmem:[#allocation1 + $0x11] ss:$2 sm:$0xff] %v1283_v7 }
 0x10f   : > { %v381_v44 = vsel %vm6717_vm3, %v371_v17, %v373_v36 }
 0x110   : > { %389 = vst [vmem:[#allocation4 + $0xc0] sm:$0xf0] %v381_v44  ;;  %v4714_v57 = vld.sshfl [vmem:[#allocation1] sm:$0xff pattern:$0x75316420] }
 0x111   : > { %v4716_v15 = vld.sshfl [vmem:[#allocation1 + $0x8] sm:$0xff pattern:$0x75316420] }
 0x112   : > { %1355 = vst [vmem:[#allocation1] ss:$2 sm:$0xff] %v1349_v12  ;;  %v4774_v44 = vld [vmem:[%s6686_s1 + $0x45] ss:$8 sm:$0xf] }
 0x114   : > { %841 = vrot.lane.b32.xlu2 %v4569_v5, %s6749_s15  ;;  %902 = vrot.lane.b32.xlu0 %v4574_v10, %s6712_s7  ;;  %v1395_v5 = vperm.slane %v4078_v31, 1  ;;  %v1396_v10 = vperm.slane %v4078_v31, 2  ;;  %v1625_v31 = vperm.slane %v4774_v44, 1 }
 0x115   : > { %975 = vrot.lane.b32.xlu1 %v4602_v40, %s6747_s23  ;;  %v1399_v40 = vrot.slane %v1397_v22, 4 }
 0x116   : > { %v437_v4 = vpop.permute.xlu2 %436  ;;  %v1398_v63 = vrot.slane %v1395_v5, 4  ;;  %v1628_v22 = vrot.slane %v1625_v31, 4 }
 0x118   : > { %v377_v16 = vpop.permute.xlu1 %376  ;;  %v1400_v42 = vsel %vm282_vm0, %v1394_v29, %v1398_v63 }
 0x119   : > { %v384_v38 = vsel %vm6717_vm3, %v377_v16, %v379_v28  ;;  %v1333_v28 = vrot.slane %v1331_v25, 4 }
 0x11a   : > { %392 = vst [vmem:[#allocation4] sm:$0xf0] %v384_v38  ;;  %v1624_v38 = vperm.slane %v4774_v44, 0 }
 0x11c   : > { %906 = vrot.lane.b32.xlu2 %v4589_v23, %s6712_s7  ;;  %908 = vrot.lane.b32.xlu0 %v4591_v24, %s6712_s7  ;;  %v1401_v23 = vsel %vm282_vm0, %v1396_v10, %v1399_v40  ;;  %v1335_v24 = vsel %vm282_vm0, %v1330_v14, %v1333_v28  ;;  %v4794_v14 = vld [vmem:[%s6686_s1 + $0x46] ss:$8 sm:$0xf] }
 0x11d   : > { %904 = vrot.lane.b32.xlu1 %v4576_v11, %s6712_s7  ;;  %v1690_v63 = vperm.slane %v4794_v14, 1  ;;  %s6722_s7 = smov 55  }
 0x11e   : > { %v443_v34 = vpop.permute.xlu2 %442  ;;  %v445_v2 = vpop.permute.xlu0 %444 }
 0x11f   : > { %v450_v6 = vsel %vm6720_vm4, %v443_v34, %v445_v2  ;;  %v1630_v2 = vsel %vm282_vm0, %v1624_v38, %v1628_v22 }
 0x120   : > { %458 = vst [vmem:[#allocation4 + $0xe0] sm:$0xf] %v450_v6 }
 0x124   : > { %1404 = vrot.lane.b32.xlu2 %v1401_v23, %s6707_s11  ;;  %1338 = vrot.lane.b32.xlu0 %v1335_v24, %s6709_s14  ;;  %v1563_v23 = vperm.slane %v4756_v41, 3  ;;  %s6724_s14 = smov 56  }
 0x125   : > { %1402 = vrot.lane.b32.xlu1 %v1400_v42, %s6707_s11  ;;  %s6741_s11 = smov 48  }
 0x126   : > { %v4743_v33 = vpop.permute.xlu2 %577  ;;  %v375_v11 = vpop.permute.xlu0 %374 }
 0x127   : > { %v382_v51 = vsel %vm6717_vm3, %v373_v36, %v375_v11  ;;  %v383_v48 = vsel %vm6717_vm3, %v375_v11, %v377_v16  ;;  %v512_v52 = vpop.permute.xlu1 %511  ;;  %vm6719_vm3 = vcmask 965632   ;;  %v1689_v11 = vperm.slane %v4794_v14, 0 }
 0x128   : > { %390 = vst [vmem:[#allocation4 + $0xf0] sm:$0xf0] %v382_v51  ;;  %v1693_v51 = vrot.slane %v1690_v63, 4 }
 0x129   : > { %391 = vst [vmem:[#allocation4 + $0xa8] sm:$0xf0] %v383_v48 }
 0x12c   : > { %969 = vrot.lane.b32.xlu2 %v4599_v3, %s6747_s23  ;;  %1036 = vrot.lane.b32.xlu0 %v4622_v13, %s6745_s26  ;;  %v1561_v13 = vperm.slane %v4756_v41, 1 }
 0x12d   : > { %967 = vrot.lane.b32.xlu1 %v4597_v32, %s6747_s23  ;;  %v1560_v32 = vperm.slane %v4756_v41, 0 }
 0x12e   : > { %v508_v56 = vpop.permute.xlu2 %507  ;;  %v439_v17 = vpop.permute.xlu0 %438  ;;  %v1564_v7 = vrot.slane %v1561_v13, 4  ;;  %v1695_v13 = vsel %vm282_vm0, %v1689_v11, %v1693_v51 }
 0x12f   : > { %v447_v49 = vsel %vm6720_vm4, %v437_v4, %v439_v17  ;;  %v441_v19 = vpop.permute.xlu1 %440 }
 0x130   : > { %455 = vst [vmem:[#allocation4 + $0x80] sm:$0xf] %v447_v49  ;;  %v448_v3 = vsel %vm6720_vm4, %v439_v17, %v441_v19  ;;  %v449_v20 = vsel %vm6720_vm4, %v441_v19, %v443_v34  ;;  %v1566_v4 = vsel %vm282_vm0, %v1560_v32, %v1564_v7  ;;  %v1565_v17 = vrot.slane %v1563_v23, 4  ;;  %v4813_v49 = vld [vmem:[%s6686_s1 + $0x47] ss:$8 sm:$0xf] }
 0x131   : > { %456 = vst [vmem:[#allocation4 + $0x128] sm:$0xf] %v448_v3  ;;  %v1627_v7 = vperm.slane %v4774_v44, 3  ;;  %v1753_v51 = vperm.slane %v4813_v49, 0  ;;  %vm6721_vm4 = vcmask 900096  }
 0x132   : > { %457 = vst [vmem:[#allocation4 + $0xd8] sm:$0xf] %v449_v20 }
 0x134   : > { %971 = vrot.lane.b32.xlu2 %v4612_v46, %s6747_s23  ;;  %1042 = vrot.lane.b32.xlu0 %v4625_v62, %s6745_s26  ;;  %v4080_v46 = vld [vmem:[%s6686_s1 + $0x43] ss:$8 sm:$0xf] }
 0x135   : > { %1034 = vrot.lane.b32.xlu1 %v4620_v55, %s6745_s26  ;;  %v1496_v16 = vperm.slane %v4080_v46, 1  ;;  %v1495_v10 = vperm.slane %v4080_v46, 0  ;;  %v1498_v29 = vperm.slane %v4080_v46, 3  ;;  %v1497_v24 = vperm.slane %v4080_v46, 2 }
 0x136   : > { %v4769_v9 = vpop.permute.xlu2 %571  ;;  %v504_v36 = vpop.permute.xlu0 %503 }
 0x137   : > { %v506_v12 = vpop.permute.xlu1 %505  ;;  %v1499_v40 = vrot.slane %v1496_v16, 4  ;;  %v1500_v42 = vrot.slane %v1498_v29, 4 }
 0x138   : > { %v514_v62 = vsel %vm6718_vm6, %v504_v36, %v506_v12  ;;  %v515_v55 = vsel %vm6718_vm6, %v506_v12, %v508_v56  ;;  %v1755_v36 = vperm.slane %v4813_v49, 2 }
 0x139   : > { %522 = vst [vmem:[#allocation4 + $0x80] sm:$0xf0] %v514_v62  ;;  %v1501_v6 = vsel %vm282_vm0, %v1495_v10, %v1499_v40  ;;  %v1502_v20 = vsel %vm282_vm0, %v1497_v24, %v1500_v42  ;;  %v1626_v62 = vperm.slane %v4774_v44, 2  ;;  %v1692_v10 = vperm.slane %v4794_v14, 3 }
 0x13a   : > { %523 = vst [vmem:[#allocation4 + $0x128] sm:$0xf0] %v515_v55  ;;  %v1629_v55 = vrot.slane %v1627_v7, 4  ;;  %v1754_v24 = vperm.slane %v4813_v49, 1 }
 0x13c   : > { %973 = vrot.lane.b32.xlu2 %v4614_v47, %s6747_s23  ;;  %1568 = vrot.lane.b32.xlu0 %v1566_v4, %s4177_s20  ;;  %v4833_v4 = vld [vmem:[%s6686_s1 + $0x60] ss:$8 sm:$0xf]  ;;  %v1631_v44 = vsel %vm282_vm0, %v1626_v62, %v1629_v55  ;;  %s6822_s23 = smov 64  }
 0x13d   : > { %1038 = vrot.lane.b32.xlu1 %v4633_v0, %s6745_s26 }
 0x13e   : > { %v4789_v25 = vpop.permute.xlu2 %636  ;;  %v510_v5 = vpop.permute.xlu0 %509 }
 0x13f   : > { %v516_v47 = vsel %vm6718_vm6, %v508_v56, %v510_v5  ;;  %v517_v28 = vsel %vm6718_vm6, %v510_v5, %v512_v52  ;;  %v570_v34 = vpop.permute.xlu1 %569  ;;  %v1562_v56 = vperm.slane %v4756_v41, 2  ;;  %v1756_v41 = vperm.slane %v4813_v49, 3 }
 0x140   : > { %524 = vst [vmem:[#allocation4 + $0xd8] sm:$0xf0] %v516_v47  ;;  %v580_v0 = vsel %vm579_vm1, %v570_v34, %v4769_v9  ;;  %v1821_v5 = vperm.slane %v4833_v4, 3  ;;  %v1691_v34 = vperm.slane %v4794_v14, 2  ;;  %vm712_vm6 = vcmask 916480  }
 0x141   : > { %525 = vst [vmem:[#allocation4 + $0xe0] sm:$0xf0] %v517_v28  ;;  %v1567_v32 = vsel %vm282_vm0, %v1562_v56, %v1565_v17  ;;  %v1818_v49 = vperm.slane %v4833_v4, 0 }
 0x142   : > { %588 = vst [vmem:[#allocation4 + $0x20] sm:$0xf] %v580_v0  ;;  %v1823_v40 = vrot.slane %v1821_v5, 4  ;;  %v1694_v0 = vrot.slane %v1692_v10, 4 }
 0x144   : > { %1040 = vrot.lane.b32.xlu2 %v4635_v1, %s6745_s26  ;;  %1632 = vrot.lane.b32.xlu0 %v1630_v2, %s4172_s30  ;;  %v4851_v2 = vld [vmem:[%s6686_s1 + $0x61] ss:$8 sm:$0xf]  ;;  %v1696_v42 = vsel %vm282_vm0, %v1691_v34, %v1694_v0  ;;  %s6820_s26 = smov 72  }
 0x145   : > { %1503 = vrot.lane.b32.xlu1 %v1501_v6, %s4173_s10  ;;  %v1885_v14 = vperm.slane %v4851_v2, 3  ;;  %v1883_v55 = vperm.slane %v4851_v2, 1 }
 0x146   : > { %v643_v48 = vpop.permute.xlu2 %642  ;;  %v645_v52 = vpop.permute.xlu0 %644 }
 0x147   : > { %v650_v1 = vsel %vm6719_vm3, %v643_v48, %v645_v52  ;;  %v576_v19 = vpop.permute.xlu1 %575  ;;  %v1887_v11 = vrot.slane %v1885_v14, 4 }
 0x148   : > { %658 = vst [vmem:[#allocation4 + $0x1c8] sm:$0xf0] %v650_v1  ;;  %v583_v3 = vsel %vm579_vm1, %v576_v19, %v4743_v33  ;;  %v1758_v33 = vrot.slane %v1756_v41, 4 }
 0x149   : > { %591 = vst [vmem:[#allocation4 + $0x1c8] sm:$0xf] %v583_v3 }
 0x14a   : > { %v1760_v22 = vsel %vm282_vm0, %v1755_v36, %v1758_v33 }
 0x14c   : > { %1505 = vrot.lane.b32.xlu2 %v1502_v20, %s4173_s10  ;;  %1697 = vrot.lane.b32.xlu0 %v1695_v13, %s4175_s16  ;;  %v1819_v20 = vperm.slane %v4833_v4, 1 }
 0x14d   : > { %1570 = vrot.lane.b32.xlu1 %v1567_v32, %s4177_s20 }
 0x14e   : > { %v4827_v12 = vpop.permute.xlu2 %777  ;;  %v574_v46 = vpop.permute.xlu0 %573  ;;  %v1822_v13 = vrot.slane %v1819_v20, 4 }
 0x14f   : > { %v581_v31 = vsel %vm579_vm1, %v4769_v9, %v574_v46  ;;  %v582_v16 = vsel %vm579_vm1, %v574_v46, %v576_v19  ;;  %v711_v38 = vpop.permute.xlu1 %710  ;;  %v1820_v9 = vperm.slane %v4833_v4, 2  ;;  %v4087_v46 = vld [vmem:[%s6686_s1 + $0x62] ss:$8 sm:$0xf] }
 0x150   : > { %589 = vst [vmem:[#allocation4 + $0x148] sm:$0xf] %v581_v31  ;;  %v1948_v4 = vperm.slane %v4087_v46, 1  ;;  %v1882_v31 = vperm.slane %v4851_v2, 0  ;;  %v1947_v5 = vperm.slane %v4087_v46, 0 }
 0x151   : > { %590 = vst [vmem:[#allocation4 + $0x158] sm:$0xf] %v582_v16  ;;  %v1825_v23 = vsel %vm282_vm0, %v1820_v9, %v1823_v40  ;;  %v1886_v16 = vrot.slane %v1883_v55, 4 }
 0x153   : > { %v1888_v40 = vsel %vm282_vm0, %v1882_v31, %v1886_v16  ;;  %v1297_v31 = vld.sshfl [vmem:[#allocation1 + $0x18] sm:$0xff pattern:$0x75316420] }
 0x154   : > { %1763 = vrot.lane.b32.xlu0 %v1760_v22, %s4180_s8  ;;  %1100 = vrot.lane.b32.xlu2 %v4644_v59, %s6724_s14 }
 0x155   : > { %1634 = vrot.lane.b32.xlu1 %v1631_v44, %s4172_s30  ;;  %v1951_v44 = vrot.slane %v1948_v4, 4  ;;  %v4952_v4 = vld.sshfl [vmem:[#allocation1] sm:$0xff pattern:$0x75316420] }
 0x156   : > { %v707_v47 = vpop.permute.xlu2 %706  ;;  %v639_v28 = vpop.permute.xlu0 %638 }
 0x157   : > { %v647_v29 = vsel %vm6719_vm3, %v4789_v25, %v639_v28  ;;  %v641_v63 = vpop.permute.xlu1 %640  ;;  %v1884_v25 = vperm.slane %v4851_v2, 2 }
 0x158   : > { %655 = vst [vmem:[#allocation4 + $0x20] sm:$0xf0] %v647_v29  ;;  %v648_v59 = vsel %vm6719_vm3, %v639_v28, %v641_v63  ;;  %v649_v6 = vsel %vm6719_vm3, %v641_v63, %v643_v48  ;;  %v1757_v48 = vrot.slane %v1754_v24, 4  ;;  %vm6740_vm3 = vcmask 908288  }
 0x159   : > { %656 = vst [vmem:[#allocation4 + $0x148] sm:$0xf0] %v648_v59  ;;  %v1889_v3 = vsel %vm282_vm0, %v1884_v25, %v1887_v11  ;;  %v1949_v28 = vperm.slane %v4087_v46, 2 }
 0x15a   : > { %657 = vst [vmem:[#allocation4 + $0x158] sm:$0xf0] %v649_v6 }
 0x15c   : > { %1828 = vrot.lane.b32.xlu0 %v1825_v23, %s4176_s19  ;;  %1102 = vrot.lane.b32.xlu2 %v4646_v43, %s6724_s14  ;;  %v1759_v43 = vsel %vm282_vm0, %v1753_v51, %v1757_v48 }
 0x15d   : > { %1699 = vrot.lane.b32.xlu1 %v1696_v42, %s4175_s16 }
 0x15e   : > { %v772_v52 = vpop.permute.xlu2 %771  ;;  %v703_v56 = vpop.permute.xlu0 %702 }
 0x15f   : > { %v705_v17 = vpop.permute.xlu1 %704 }
 0x160   : > { %v713_v1 = vsel %vm712_vm6, %v703_v56, %v705_v17  ;;  %v714_v19 = vsel %vm712_vm6, %v705_v17, %v707_v47 }
 0x161   : > { %721 = vst [vmem:[#allocation4 + $0x188] sm:$0xf] %v713_v1 }
 0x162   : > { %722 = vst [vmem:[#allocation4 + $0x98] sm:$0xf] %v714_v19 }
 0x164   : > { %1892 = vrot.lane.b32.xlu0 %v1889_v3, %s4178_s27  ;;  %1761 = vrot.lane.b32.xlu2 %v1759_v43, %s4180_s8 }
 0x165   : > { %1104 = vrot.lane.b32.xlu1 %v4658_v26, %s6724_s14  ;;  %v1824_v26 = vsel %vm282_vm0, %v1818_v49, %v1822_v13  ;;  %v1324_v49 = vld [vmem:[#allocation2 + $0x10] sm:$0xf] }
 0x166   : > { %v836_v41 = vpop.permute.xlu2 %835  ;;  %v709_v32 = vpop.permute.xlu0 %708 }
 0x167   : > { %v715_v7 = vsel %vm712_vm6, %v707_v47, %v709_v32  ;;  %v716_v36 = vsel %vm712_vm6, %v709_v32, %v711_v38  ;;  %v770_v33 = vpop.permute.xlu1 %769  ;;  %v1950_v47 = vperm.slane %v4087_v46, 3  ;;  %v1323_v32 = vld [vmem:[#allocation2 + $0x8] sm:$0xff] }
 0x168   : > { %723 = vst [vmem:[#allocation4 + $0x100] sm:$0xf] %v715_v7  ;;  %v780_v62 = vsel %vm6740_vm3, %v770_v33, %v772_v52 }
 0x169   : > { %724 = vst [vmem:[#allocation4 + $0x1d0] sm:$0xf] %v716_v36  ;;  %v1952_v34 = vrot.slane %v1950_v47, 4  ;;  %v1388_v36 = vld [vmem:[#allocation2] sm:$0xff] }
 0x16a   : > { %788 = vst [vmem:[#allocation4 + $0x188] sm:$0xf0] %v780_v62  ;;  %v1296_v62 = vld.sshfl [vmem:[#allocation1 + $0x10] sm:$0xff pattern:$0x75316420] }
 0x16b   : > { %v1954_v59 = vsel %vm282_vm0, %v1949_v28, %v1952_v34 }
 0x16c   : > { %1108 = vrot.lane.b32.xlu0 %v4649_v21, %s6724_s14  ;;  %1826 = vrot.lane.b32.xlu2 %v1824_v26, %s4176_s19 }
 0x16d   : > { %1106 = vrot.lane.b32.xlu1 %v4660_v27, %s6724_s14  ;;  %v1953_v27 = vsel %vm282_vm0, %v1947_v5, %v1951_v44  ;;  %v1390_v44 = vld [vmem:[#allocation2 + $0x10] sm:$0xf]  ;;  %s6736_s14 = smov 46  }
 0x16e   : > { %v842_v38 = vpop.permute.xlu2 %841  ;;  %v844_v22 = vpop.permute.xlu0 %843 }
 0x16f   : > { %v849_v10 = vsel %vm6721_vm4, %v842_v38, %v844_v22  ;;  %v776_v9 = vpop.permute.xlu1 %775 }
 0x170   : > { %857 = vst [vmem:[#allocation4 + $0x1a8] sm:$0xf] %v849_v10  ;;  %v783_v21 = vsel %vm6740_vm3, %v776_v9, %v4827_v12 }
 0x171   : > { %791 = vst [vmem:[#allocation4 + $0x1d0] sm:$0xf0] %v783_v21 }
 0x174   : > { %1890 = vrot.lane.b32.xlu2 %v1888_v40, %s4178_s27  ;;  %1170 = vrot.lane.b32.xlu0 %v4685_v54, %s6722_s7 }
 0x175   : > { %1955 = vrot.lane.b32.xlu1 %v1953_v27, %s4183_s24 }
 0x176   : > { %v907_v0 = vpop.permute.xlu2 %906  ;;  %v774_v2 = vpop.permute.xlu0 %773 }
 0x177   : > { %v781_v12 = vsel %vm6740_vm3, %v772_v52, %v774_v2  ;;  %v782_v29 = vsel %vm6740_vm3, %v774_v2, %v776_v9  ;;  %v911_v63 = vpop.permute.xlu1 %910  ;;  %v1298_v52 = vld.sshfl [vmem:[#allocation1 + $0x20] sm:$0xff pattern:$0x75316420] }
 0x178   : > { %789 = vst [vmem:[#allocation4 + $0x98] sm:$0xf0] %v781_v12 }
 0x179   : > { %790 = vst [vmem:[#allocation4 + $0x100] sm:$0xf0] %v782_v29 }
 0x17c   : > { %1957 = vrot.lane.b32.xlu2 %v1954_v59, %s4183_s24  ;;  %1232 = vrot.lane.b32.xlu0 %v4691_v61, %s6743_s17 }
 0x17d   : > { %1166 = vrot.lane.b32.xlu1 %v4667_v35, %s6722_s7 }
 0x17e   : > { %v4908_v54 = vpop.permute.xlu2 %1404  ;;  %v838_v6 = vpop.permute.xlu0 %837 }
 0x17f   : > { %v846_v23 = vsel %vm6721_vm4, %v836_v41, %v838_v6  ;;  %v840_v14 = vpop.permute.xlu1 %839  ;;  %v1407_v8 = vrot.slane %v4908_v54, 4 }
 0x180   : > { %854 = vst [vmem:[#allocation4 + $0x180] sm:$0xf] %v846_v23  ;;  %v847_v24 = vsel %vm6721_vm4, %v838_v6, %v840_v14  ;;  %v848_v42 = vsel %vm6721_vm4, %v840_v14, %v842_v38  ;;  %vm6728_vm4 = vcmask 515072  }
 0x181   : > { %855 = vst [vmem:[#allocation4 + $0x1a0] sm:$0xf] %v847_v24  ;;  %v1417_v21 = vmul.f32 %v1407_v8, %v1390_v44 }
 0x182   : > { %856 = vst [vmem:[#allocation4 + $0x90] sm:$0xf] %v848_v42 }
 0x184   : > { %1168 = vrot.lane.b32.xlu2 %v4669_v37, %s6722_s7  ;;  %1238 = vrot.lane.b32.xlu0 %v4708_v50, %s6743_s17 }
 0x185   : > { %1172 = vrot.lane.b32.xlu1 %v4681_v53, %s6722_s7 }
 0x186   : > { %v4919_v35 = vpop.permute.xlu2 %969  ;;  %v903_v61 = vpop.permute.xlu0 %902 }
 0x187   : > { %v976_v25 = vpop.permute.xlu1 %975 }
 0x18c   : > { %1174 = vrot.lane.b32.xlu2 %v4672_v45, %s6722_s7  ;;  %1301 = vrot.lane.b32.xlu0 %v4716_v15, %s6741_s11  ;;  %s6738_s7 = smov 47  }
 0x18d   : > { %1234 = vrot.lane.b32.xlu1 %v4689_v58, %s6743_s17  ;;  %v4936_v58 = vld [vmem:[%s6686_s1 + $0x42] ss:$8 sm:$0xf] }
 0x18e   : > { %v972_v37 = vpop.permute.xlu2 %971  ;;  %v909_v50 = vpop.permute.xlu0 %908  ;;  %v1461_v56 = vperm.slane %v4936_v58, 1  ;;  %v1460_v41 = vperm.slane %v4936_v58, 0  ;;  %v1463_v27 = vperm.slane %v4936_v58, 3  ;;  %v1462_v6 = vperm.slane %v4936_v58, 2 }
 0x18f   : > { %v979_v53 = vsel %vm6728_vm4, %v4919_v35, %v972_v37  ;;  %v914_v11 = vsel %vm6726_vm2, %v907_v0, %v909_v50  ;;  %v915_v51 = vsel %vm6726_vm2, %v909_v50, %v911_v63  ;;  %v905_v48 = vpop.permute.xlu1 %904  ;;  %v1491_v63 = vld [vmem:[#allocation2 + $0x14] sm:$0xf]  ;;  %v1456_v50 = vld [vmem:[#allocation2 + $0xc] sm:$0xff] }
 0x190   : > { %987 = vst [vmem:[#allocation4 + $0x170] sm:$0xf] %v979_v53  ;;  %v912_v45 = vsel %vm6726_vm2, %v903_v61, %v905_v48  ;;  %v913_v15 = vsel %vm6726_vm2, %v905_v48, %v907_v0  ;;  %vm1408_vm2 = vcmask 670720   ;;  %v1464_v46 = vrot.slane %v1461_v56, 4 }
 0x191   : > { %922 = vst [vmem:[#allocation4 + $0x90] sm:$0xf0] %v914_v11  ;;  %v1465_v23 = vrot.slane %v1463_v27, 4 }
 0x192   : > { %923 = vst [vmem:[#allocation4 + $0x1a8] sm:$0xf0] %v915_v51  ;;  %v1466_v9 = vsel %vm282_vm0, %v1460_v41, %v1464_v46 }
 0x193   : > { %920 = vst [vmem:[#allocation4 + $0x180] sm:$0xf0] %v912_v45 }
 0x194   : > { %921 = vst [vmem:[#allocation4 + $0x1a0] sm:$0xf0] %v913_v15  ;;  %1236 = vrot.lane.b32.xlu2 %v4710_v30, %s6743_s17  ;;  %1307 = vrot.lane.b32.xlu0 %v1298_v52, %s6741_s11 }
 0x195   : > { %1240 = vrot.lane.b32.xlu1 %v4695_v60, %s6743_s17  ;;  %s6819_s17 = smov 66  }
 0x196   : > { %v974_v17 = vpop.permute.xlu2 %973  ;;  %v1339_v1 = vpop.permute.xlu0 %1338 }
 0x197   : > { %v980_v19 = vsel %vm6728_vm4, %v972_v37, %v974_v17  ;;  %v981_v3 = vsel %vm6728_vm4, %v974_v17, %v976_v25  ;;  %v1341_v43 = vrot.slane %v1339_v1, 4  ;;  %v1403_v20 = vpop.permute.xlu1 %1402  ;;  %v1467_v37 = vsel %vm282_vm0, %v1462_v6, %v1465_v23 }
 0x198   : > { %988 = vst [vmem:[#allocation4 + $0xa0] sm:$0xf] %v980_v19  ;;  %v1406_v13 = vrot.slane %v1403_v20, 4  ;;  %v1471_v51 = vmul.f32 %v1467_v37, %v1456_v50 }
 0x199   : > { %989 = vst [vmem:[#allocation4 + $0x68] sm:$0xf] %v981_v3  ;;  %v1344_v30 = vsel %vm282_vm0, %v1340_v39, %v1341_v43  ;;  %v1351_v60 = vmul.f32 %v1341_v43, %v1324_v49  ;;  %v4957_v39 = vld.sshfl [vmem:[#allocation1 + $0x8] sm:$0xff pattern:$0x75316420] }
 0x19a   : > { %v1345_v7 = vsel %vm6727_vm5, %v1344_v30, %v1339_v1  ;;  %v1409_v33 = vsel %vm1408_vm2, %v1406_v13, %v1403_v20  ;;  %v1410_v22 = vsel %vm282_vm0, %v1406_v13, %v1407_v8  ;;  %vm6729_vm5 = vcmask 506880   ;;  %v4994_v30 = vld [vmem:[#allocation2 + $0x4] sm:$0xff] }
 0x19b   : > { %v1350_v26 = vmul.f32 %v1345_v7, %v1323_v32  ;;  %1359 = vst [vmem:[#allocation1 + $0x20] ss:$2 sm:$0xff] %v1351_v60  ;;  %v1415_v55 = vmul.f32 %v1409_v33, %v1388_v36  ;;  %v1411_v47 = vsel %vm1408_vm2, %v1410_v22, %v4908_v54 }
 0x19c   : > { %1299 = vrot.lane.b32.xlu2 %v4714_v57, %s6741_s11  ;;  %v1455_v57 = vld [vmem:[#allocation2 + $0x4] sm:$0xff]  ;;  %v1416_v2 = vmul.f32 %v1411_v47, %v1323_v32  ;;  %v4998_v32 = vld [vmem:[#allocation2 + $0xc] sm:$0xff] }
 0x19d   : > { %1357 = vst [vmem:[#allocation1 + $0x10] ss:$2 sm:$0xff] %v1350_v26  ;;  %1303 = vrot.lane.b32.xlu1 %v1296_v62, %s6741_s11  ;;  %v1470_v28 = vmul.f32 %v1466_v9, %v1455_v57 }
 0x19e   : > { %1422 = vst [vmem:[#allocation1 + $0x1] ss:$2 sm:$0xff] %v1415_v55  ;;  %v1041_v16 = vpop.permute.xlu2 %1040  ;;  %v1037_v38 = vpop.permute.xlu0 %1036  ;;  %v1556_v55 = vld [vmem:[#allocation2 + $0x14] sm:$0xf] }
 0x19f   : > { %v968_v5 = vpop.permute.xlu1 %967 }
 0x1a0   : > { %v978_v10 = vsel %vm6728_vm4, %v968_v5, %v4919_v35  ;;  %vm6730_vm4 = vcmask 457728  }
 0x1a1   : > { %986 = vst [vmem:[#allocation4 + $0xe8] sm:$0xf] %v978_v10 }
 0x1a2   : > { %v4964_v40 = vld.sshfl [vmem:[#allocation1 + $0x20] sm:$0xff pattern:$0x75316420] }
 0x1a3   : > { %1426 = vst [vmem:[#allocation1 + $0x21] ss:$2 sm:$0xff] %v1417_v21 }
 0x1a4   : > { %v4969_v34 = vld.sshfl [vmem:[#allocation1 + $0x10] sm:$0xff pattern:$0x75316420]  ;;  %v4971_v0 = vld.sshfl [vmem:[#allocation1 + $0x18] sm:$0xff pattern:$0x75316420]  ;;  %1305 = vrot.lane.b32.xlu2 %v1297_v31, %s6741_s11 }
 0x1a5   : > { %v4974_v12 = vld.sshfl [vmem:[#allocation1] sm:$0xff pattern:$0x75316420]  ;;  %v4976_v29 = vld.sshfl [vmem:[#allocation1 + $0x8] sm:$0xff pattern:$0x75316420] }
 0x1a6   : > { %1474 = vst [vmem:[#allocation1] ss:$2 sm:$0xff] %v1470_v28  ;;  %v1506_v59 = vpop.permute.xlu2 %1505  ;;  %v1043_v54 = vpop.permute.xlu0 %1042  ;;  %s6821_s11 = smov 73  }
 0x1a7   : > { %1424 = vst [vmem:[#allocation1 + $0x11] ss:$2 sm:$0xff] %v1416_v2  ;;  %v1508_v14 = vrot.slane %v1506_v59, 4  ;;  %v1048_v24 = vsel %vm6729_vm5, %v1041_v16, %v1043_v54  ;;  %v1035_v42 = vpop.permute.xlu1 %1034 }
 0x1a8   : > { %1056 = vst [vmem:[#allocation4 + $0x68] sm:$0xf0] %v1048_v24  ;;  %v1045_v35 = vsel %vm6729_vm5, %v1035_v42, %v1037_v38 }
 0x1a9   : > { %v1517_v61 = vmul.f32 %v1508_v14, %v1491_v63  ;;  %1053 = vst [vmem:[#allocation4 + $0xe8] sm:$0xf0] %v1045_v35 }
 0x1aa   : > { %v4981_v25 = vld.sshfl [vmem:[#allocation1 + $0x20] sm:$0xff pattern:$0x75316420] }
 0x1ab   : > { %1526 = vst [vmem:[#allocation1 + $0x21] ss:$2 sm:$0xff] %v1517_v61 }
 0x1ad   : > { %v1477_v53 = vld.sshfl [vmem:[#allocation1] sm:$0xff pattern:$0x75316420]  ;;  %v1478_v11 = vld.sshfl [vmem:[#allocation1 + $0x8] sm:$0xff pattern:$0x75316420] }
 0x1ae   : > { %1485 = vst [vmem:[#allocation4 + $0x58] sm:$0xf] %v1477_v53  ;;  %v4984_v48 = vld.sshfl [vmem:[#allocation1 + $0x10] sm:$0xff pattern:$0x75316420]  ;;  %v1101_v45 = vpop.permute.xlu2 %1100  ;;  %v1569_v15 = vpop.permute.xlu0 %1568 }
 0x1af   : > { %1486 = vst [vmem:[#allocation4 + $0x28] sm:$0xf] %v1478_v11  ;;  %v4986_v58 = vld.sshfl [vmem:[#allocation1 + $0x18] sm:$0xff pattern:$0x75316420]  ;;  %v1039_v52 = vpop.permute.xlu1 %1038  ;;  %v1572_v33 = vrot.slane %v1569_v15, 4 }
 0x1b0   : > { %1476 = vst [vmem:[#allocation1 + $0x10] ss:$2 sm:$0xff] %v1471_v51  ;;  %v1046_v56 = vsel %vm6729_vm5, %v1037_v38, %v1039_v52  ;;  %v1047_v17 = vsel %vm6729_vm5, %v1039_v52, %v1041_v16  ;;  %v1685_v52 = vld [vmem:[#allocation2 + $0x14] sm:$0xf]  ;;  %vm6732_vm5 = vcmask 449536  }
 0x1b1   : > { %1054 = vst [vmem:[#allocation4 + $0x170] sm:$0xf0] %v1046_v56  ;;  %v1574_v8 = vsel %vm413_vm9, %v1572_v33, %v1569_v15 }
 0x1b2   : > { %1055 = vst [vmem:[#allocation4 + $0xa0] sm:$0xf0] %v1047_v17  ;;  %v5007_v5 = vld.sshfl [vmem:[#allocation1 + $0x20] sm:$0xff pattern:$0x75316420]  ;;  %v1580_v44 = vmul.f32 %v1574_v8, %v4994_v30 }
 0x1b6   : > { %v4990_v1 = vpop.permute.xlu2 %1102  ;;  %v1633_v19 = vpop.permute.xlu0 %1632 }
 0x1b7   : > { %v1479_v3 = vld.sshfl [vmem:[#allocation1 + $0x10] sm:$0xff pattern:$0x75316420]  ;;  %v1480_v43 = vld.sshfl [vmem:[#allocation1 + $0x18] sm:$0xff pattern:$0x75316420]  ;;  %v1111_v20 = vsel %vm6730_vm4, %v1101_v45, %v4990_v1  ;;  %v1504_v49 = vpop.permute.xlu1 %1503 }
 0x1b8   : > { %1487 = vst [vmem:[#allocation4 + $0x48] sm:$0xf] %v1479_v3  ;;  %v1507_v13 = vrot.slane %v1504_v49, 4  ;;  %v1636_v10 = vrot.slane %v1633_v19, 4 }
 0x1b9   : > { %1488 = vst [vmem:[#allocation4 + $0x168] sm:$0xf] %v1480_v43 }
 0x1ba   : > { %1119 = vst [vmem:[#allocation4 + $0x1e0] sm:$0xf] %v1111_v20  ;;  %v1509_v60 = vsel %vm346_vm8, %v1507_v13, %v1504_v49  ;;  %v1510_v41 = vsel %vm282_vm0, %v1507_v13, %v1508_v14  ;;  %v1638_v6 = vsel %vm6735_vm10, %v1636_v10, %v1633_v19 }
 0x1bb   : > { %v1511_v7 = vsel %vm346_vm8, %v1510_v41, %v1506_v59  ;;  %v1515_v36 = vmul.f32 %v4994_v30, %v1509_v60  ;;  %v1620_v59 = vld [vmem:[#allocation2 + $0x14] sm:$0xf]  ;;  %v1644_v42 = vmul.f32 %v1638_v6, %v4994_v30 }
 0x1bc   : > { %v1516_v46 = vmul.f32 %v1511_v7, %v4998_v32 }
 0x1bd   : > { %1522 = vst [vmem:[#allocation1 + $0x1] ss:$2 sm:$0xff] %v1515_v36 }
 0x1be   : > { %1524 = vst [vmem:[#allocation1 + $0x11] ss:$2 sm:$0xff] %v1516_v46  ;;  %v5003_v62 = vpop.permute.xlu2 %1761  ;;  %v1698_v26 = vpop.permute.xlu0 %1697 }
 0x1bf   : > { %v1571_v31 = vpop.permute.xlu1 %1570  ;;  %v1701_v35 = vrot.slane %v1698_v26, 4  ;;  %v1765_v49 = vrot.slane %v5003_v62, 4 }
 0x1c0   : > { %v1573_v16 = vrot.slane %v1571_v31, 4 }
 0x1c1   : > { %v1703_v19 = vsel %vm6731_vm11, %v1701_v35, %v1698_v26 }
 0x1c2   : > { %v1575_v38 = vsel %vm282_vm0, %v1572_v33, %v1573_v16  ;;  %v1582_v22 = vmul.f32 %v1573_v16, %v1556_v55  ;;  %v1709_v13 = vmul.f32 %v1703_v19, %v4994_v30  ;;  %v1749_v55 = vld [vmem:[#allocation2 + $0x14] sm:$0xf] }
 0x1c3   : > { %v1576_v9 = vsel %vm413_vm9, %v1575_v38, %v1571_v31  ;;  %v1767_v38 = vsel %vm612_vm12, %v1765_v49, %v5003_v62 }
 0x1c4   : > { %v5011_v57 = vld.sshfl [vmem:[#allocation1] sm:$0xff pattern:$0x75316420]  ;;  %v5013_v21 = vld.sshfl [vmem:[#allocation1 + $0x8] sm:$0xff pattern:$0x75316420]  ;;  %v1581_v47 = vmul.f32 %v1576_v9, %v4998_v32  ;;  %v1773_v9 = vmul.f32 %v1767_v38, %v4994_v30 }
 0x1c5   : > { %1586 = vst [vmem:[#allocation1] ss:$2 sm:$0xff] %v1580_v44  ;;  %v5016_v27 = vld.sshfl [vmem:[#allocation1 + $0x10] sm:$0xff pattern:$0x75316420] }
 0x1c6   : > { %1590 = vst [vmem:[#allocation1 + $0x20] ss:$2 sm:$0xff] %v1582_v22  ;;  %v5018_v28 = vpop.permute.xlu2 %1826  ;;  %v1764_v2 = vpop.permute.xlu0 %1763  ;;  %v5020_v63 = vld.sshfl [vmem:[#allocation1 + $0x18] sm:$0xff pattern:$0x75316420] }
 0x1c7   : > { %v1635_v54 = vpop.permute.xlu1 %1634  ;;  %1588 = vst [vmem:[#allocation1 + $0x10] ss:$2 sm:$0xff] %v1581_v47  ;;  %v1766_v31 = vrot.slane %v1764_v2, 4  ;;  %v1830_v47 = vrot.slane %v5018_v28, 4 }
 0x1c8   : > { %v1637_v23 = vrot.slane %v1635_v54, 4 }
 0x1ca   : > { %v1639_v14 = vsel %vm282_vm0, %v1636_v10, %v1637_v23  ;;  %v1646_v24 = vmul.f32 %v1637_v23, %v1620_v59  ;;  %v1775_v10 = vmul.f32 %v1766_v31, %v1749_v55  ;;  %v1768_v59 = vsel %vm282_vm0, %v1765_v49, %v1766_v31  ;;  %v1878_v31 = vld [vmem:[#allocation2 + $0x14] sm:$0xf] }
 0x1cb   : > { %v1640_v61 = vsel %vm6735_vm10, %v1639_v14, %v1635_v54 }
 0x1cc   : > { %v5026_v37 = vld.sshfl [vmem:[#allocation1] sm:$0xff pattern:$0x75316420]  ;;  %v5028_v50 = vld.sshfl [vmem:[#allocation1 + $0x8] sm:$0xff pattern:$0x75316420]  ;;  %v1645_v53 = vmul.f32 %v1640_v61, %v4998_v32  ;;  %v1832_v61 = vsel %vm679_vm13, %v1830_v47, %v5018_v28 }
 0x1cd   : > { %1651 = vst [vmem:[#allocation1 + $0x1] ss:$2 sm:$0xff] %v1644_v42  ;;  %v5031_v11 = vld.sshfl [vmem:[#allocation1 + $0x20] sm:$0xff pattern:$0x75316420] }
 0x1ce   : > { %1655 = vst [vmem:[#allocation1 + $0x21] ss:$2 sm:$0xff] %v1646_v24  ;;  %v5033_v51 = vpop.permute.xlu2 %1890  ;;  %v5035_v45 = vpop.permute.xlu0 %1828  ;;  %v5037_v15 = vld.sshfl [vmem:[#allocation1 + $0x10] sm:$0xff pattern:$0x75316420] }
 0x1cf   : > { %v1700_v56 = vpop.permute.xlu1 %1699  ;;  %v5039_v17 = vld.sshfl [vmem:[#allocation1 + $0x18] sm:$0xff pattern:$0x75316420]  ;;  %v1831_v42 = vrot.slane %v5035_v45, 4 }
 0x1d0   : > { %v1702_v3 = vrot.slane %v1700_v56, 4  ;;  %1653 = vst [vmem:[#allocation1 + $0x11] ss:$2 sm:$0xff] %v1645_v53  ;;  %v1814_v24 = vld [vmem:[#allocation2 + $0x14] sm:$0xf] }
 0x1d1   : > { %v1833_v49 = vsel %vm282_vm0, %v1830_v47, %v1831_v42 }
 0x1d2   : > { %v1704_v43 = vsel %vm282_vm0, %v1701_v35, %v1702_v3  ;;  %v1711_v20 = vmul.f32 %v1702_v3, %v1685_v52 }
 0x1d3   : > { %v1705_v60 = vsel %vm6731_vm11, %v1704_v43, %v1700_v56  ;;  %v1838_v43 = vmul.f32 %v1832_v61, %v4994_v30  ;;  %vm6733_vm11 = vcmask 392192  }
 0x1d4   : > { %v5046_v41 = vld.sshfl [vmem:[#allocation1] sm:$0xff pattern:$0x75316420]  ;;  %v5048_v7 = vld.sshfl [vmem:[#allocation1 + $0x8] sm:$0xff pattern:$0x75316420]  ;;  %v1710_v33 = vmul.f32 %v1705_v60, %v4998_v32 }
 0x1d5   : > { %v5050_v36 = vld.sshfl [vmem:[#allocation1 + $0x20] sm:$0xff pattern:$0x75316420]  ;;  %1715 = vst [vmem:[#allocation1] ss:$2 sm:$0xff] %v1709_v13 }
 0x1d6   : > { %1719 = vst [vmem:[#allocation1 + $0x20] ss:$2 sm:$0xff] %v1711_v20  ;;  %v5053_v46 = vpop.permute.xlu2 %1957  ;;  %v5055_v26 = vpop.permute.xlu0 %1892  ;;  %v1894_v20 = vrot.slane %v5033_v51, 4 }
 0x1d7   : > { %v1105_v8 = vpop.permute.xlu1 %1104  ;;  %v5057_v16 = vld.sshfl [vmem:[#allocation1 + $0x10] sm:$0xff pattern:$0x75316420]  ;;  %v5063_v44 = vld.sshfl [vmem:[#allocation1 + $0x18] sm:$0xff pattern:$0x75316420] }
 0x1d8   : > { %v1112_v22 = vsel %vm6730_vm4, %v4990_v1, %v1105_v8  ;;  %1717 = vst [vmem:[#allocation1 + $0x10] ss:$2 sm:$0xff] %v1710_v33  ;;  %v1769_v1 = vsel %vm612_vm12, %v1768_v59, %v1764_v2  ;;  %v1840_v2 = vmul.f32 %v1831_v42, %v1814_v24  ;;  %v1834_v33 = vsel %vm679_vm13, %v1833_v49, %v5035_v45 }
 0x1d9   : > { %1120 = vst [vmem:[#allocation4 + $0x198] sm:$0xf] %v1112_v22  ;;  %v1774_v56 = vmul.f32 %v1769_v1, %v4998_v32  ;;  %v1839_v47 = vmul.f32 %v1834_v33, %v4998_v32 }
 0x1dc   : > { %v5068_v54 = vld.sshfl [vmem:[#allocation1] sm:$0xff pattern:$0x75316420]  ;;  %v5070_v6 = vld.sshfl [vmem:[#allocation1 + $0x8] sm:$0xff pattern:$0x75316420] }
 0x1dd   : > { %v5072_v23 = vld.sshfl [vmem:[#allocation1 + $0x20] sm:$0xff pattern:$0x75316420]  ;;  %1780 = vst [vmem:[#allocation1 + $0x1] ss:$2 sm:$0xff] %v1773_v9 }
 0x1de   : > { %1784 = vst [vmem:[#allocation1 + $0x21] ss:$2 sm:$0xff] %v1775_v10  ;;  %v1169_v62 = vpop.permute.xlu2 %1168  ;;  %v1109_v14 = vpop.permute.xlu0 %1108  ;;  %v1896_v10 = vsel %vm745_vm14, %v1894_v20, %v5033_v51 }
 0x1df   : > { %v1107_v35 = vpop.permute.xlu1 %1106  ;;  %v5081_v19 = vld.sshfl [vmem:[#allocation1 + $0x10] sm:$0xff pattern:$0x75316420]  ;;  %v5083_v3 = vld.sshfl [vmem:[#allocation1 + $0x18] sm:$0xff pattern:$0x75316420]  ;;  %v1902_v45 = vmul.f32 %v1896_v10, %v4994_v30 }
 0x1e0   : > { %v1113_v53 = vsel %vm6730_vm4, %v1105_v8, %v1107_v35  ;;  %v1114_v52 = vsel %vm6730_vm4, %v1107_v35, %v1109_v14  ;;  %1782 = vst [vmem:[#allocation1 + $0x11] ss:$2 sm:$0xff] %v1774_v56  ;;  %v1895_v8 = vrot.slane %v5055_v26, 4  ;;  %v1943_v56 = vld [vmem:[#allocation2 + $0x14] sm:$0xf]  ;;  %vm6734_vm4 = vcmask 441344  }
 0x1e1   : > { %1121 = vst [vmem:[#allocation4 + $0x1c0] sm:$0xf] %v1113_v53 }
 0x1e2   : > { %1122 = vst [vmem:[#allocation4 + $0xc8] sm:$0xf] %v1114_v52  ;;  %v1904_v59 = vmul.f32 %v1895_v8, %v1878_v31  ;;  %v1897_v24 = vsel %vm282_vm0, %v1894_v20, %v1895_v8 }
 0x1e3   : > { %v1898_v53 = vsel %vm745_vm14, %v1897_v24, %v5055_v26 }
 0x1e4   : > { %v5088_v28 = vld.sshfl [vmem:[#allocation1] sm:$0xff pattern:$0x75316420]  ;;  %v5090_v13 = vld.sshfl [vmem:[#allocation1 + $0x8] sm:$0xff pattern:$0x75316420]  ;;  %v1903_v33 = vmul.f32 %v1898_v53, %v4998_v32 }
 0x1e5   : > { %v5092_v60 = vld.sshfl [vmem:[#allocation1 + $0x20] sm:$0xff pattern:$0x75316420]  ;;  %1844 = vst [vmem:[#allocation1] ss:$2 sm:$0xff] %v1838_v43  ;;  %v1960_v43 = vrot.slane %v5053_v46, 4 }
 0x1e6   : > { %v1171_v55 = vpop.permute.xlu0 %1170  ;;  %1848 = vst [vmem:[#allocation1 + $0x20] ss:$2 sm:$0xff] %v1840_v2  ;;  %v1175_v9 = vpop.permute.xlu2 %1174 }
 0x1e7   : > { %v1178_v38 = vsel %vm6732_vm5, %v1169_v62, %v1171_v55  ;;  %v1956_v22 = vpop.permute.xlu1 %1955  ;;  %v5101_v1 = vld.sshfl [vmem:[#allocation1 + $0x10] sm:$0xff pattern:$0x75316420]  ;;  %v5103_v14 = vld.sshfl [vmem:[#allocation1 + $0x18] sm:$0xff pattern:$0x75316420]  ;;  %v1969_v31 = vmul.f32 %v1960_v43, %v1943_v56 }
 0x1e8   : > { %1186 = vst [vmem:[#allocation4 + $0x198] sm:$0xf0] %v1178_v38  ;;  %v1959_v42 = vrot.slane %v1956_v22, 4 }
 0x1e9   : > { %1846 = vst [vmem:[#allocation1 + $0x10] ss:$2 sm:$0xff] %v1839_v47 }
 0x1ea   : > { %v1961_v20 = vsel %vm812_vm15, %v1959_v42, %v1956_v22  ;;  %v1962_v47 = vsel %vm282_vm0, %v1959_v42, %v1960_v43 }
 0x1eb   : > { %v1967_v26 = vmul.f32 %v1961_v20, %v4994_v30  ;;  %v1963_v24 = vsel %vm812_vm15, %v1962_v47, %v5053_v46 }
 0x1ec   : > { %v5107_v35 = vld.sshfl [vmem:[#allocation1] sm:$0xff pattern:$0x75316420]  ;;  %v5109_v61 = vld.sshfl [vmem:[#allocation1 + $0x8] sm:$0xff pattern:$0x75316420]  ;;  %v1968_v42 = vmul.f32 %v1963_v24, %v4998_v32 }
 0x1ed   : > { %v1853_v51 = vld.sshfl [vmem:[#allocation1 + $0x20] sm:$0xff pattern:$0x75316420]  ;;  %1909 = vst [vmem:[#allocation1 + $0x1] ss:$2 sm:$0xff] %v1902_v45 }
 0x1ee   : > { %1862 = vrot.lane.b32.xlu1 %v1853_v51, %s6753_s29  ;;  %1913 = vst [vmem:[#allocation1 + $0x21] ss:$2 sm:$0xff] %v1904_v59  ;;  %v1233_v52 = vpop.permute.xlu0 %1232  ;;  %v1237_v8 = vpop.permute.xlu2 %1236 }
 0x1ef   : > { %v1167_v2 = vpop.permute.xlu1 %1166 }
 0x1f0   : > { %v1177_v49 = vsel %vm6732_vm5, %v1167_v2, %v1169_v62  ;;  %v1852_v38 = vld.sshfl [vmem:[#allocation1 + $0x18] sm:$0xff pattern:$0x75316420]  ;;  %v1851_v10 = vld.sshfl [vmem:[#allocation1 + $0x10] sm:$0xff pattern:$0x75316420] }
 0x1f1   : > { %1185 = vst [vmem:[#allocation4 + $0x1e0] sm:$0xf0] %v1177_v49  ;;  %1860 = vrot.lane.b32.xlu0 %v1852_v38, %s6753_s29 }
 0x1f2   : > { %1911 = vst [vmem:[#allocation1 + $0x11] ss:$2 sm:$0xff] %v1903_v33 }
 0x1f4   : > { %v5121_v59 = vld.sshfl [vmem:[#allocation1] sm:$0xff pattern:$0x75316420]  ;;  %v5123_v22 = vld.sshfl [vmem:[#allocation1 + $0x8] sm:$0xff pattern:$0x75316420] }
 0x1f5   : > { %v1918_v62 = vld.sshfl [vmem:[#allocation1 + $0x20] sm:$0xff pattern:$0x75316420]  ;;  %1973 = vst [vmem:[#allocation1] ss:$2 sm:$0xff] %v1967_v26 }
 0x1f6   : > { %v1239_v45 = vpop.permute.xlu0 %1238  ;;  %1977 = vst [vmem:[#allocation1 + $0x20] ss:$2 sm:$0xff] %v1969_v31  ;;  %v1300_v20 = vpop.permute.xlu2 %1299 }
 0x1f7   : > { %v1245_v51 = vsel %vm6734_vm4, %v1237_v8, %v1239_v45  ;;  %v1173_v30 = vpop.permute.xlu1 %1172 }
 0x1f8   : > { %1253 = vst [vmem:[#allocation4 + $0x88] sm:$0xf] %v1245_v51  ;;  %v1179_v53 = vsel %vm6732_vm5, %v1171_v55, %v1173_v30  ;;  %v1180_v56 = vsel %vm6732_vm5, %v1173_v30, %v1175_v9  ;;  %vm6799_vm5 = vcmask 900096  }
 0x1f9   : > { %1187 = vst [vmem:[#allocation4 + $0x1c0] sm:$0xf0] %v1179_v53  ;;  %v1916_v2 = vld.sshfl [vmem:[#allocation1 + $0x10] sm:$0xff pattern:$0x75316420]  ;;  %1927 = vrot.lane.b32.xlu0 %v1918_v62, %s6751_s9 }
 0x1fa   : > { %1188 = vst [vmem:[#allocation4 + $0xc8] sm:$0xf0] %v1180_v56  ;;  %v1917_v43 = vld.sshfl [vmem:[#allocation1 + $0x18] sm:$0xff pattern:$0x75316420] }
 0x1fb   : > { %1975 = vst [vmem:[#allocation1 + $0x10] ss:$2 sm:$0xff] %v1968_v42 }
 0x1fd   : > { %v1982_v46 = vld.sshfl [vmem:[#allocation1 + $0x20] sm:$0xff pattern:$0x75316420] }
 0x1fe   : > { %1991 = vrot.lane.b32.xlu2 %v1982_v46, %s6749_s15  ;;  %v1302_v49 = vpop.permute.xlu0 %1301  ;;  %v1306_v38 = vpop.permute.xlu2 %1305 }
 0x1ff   : > { %v1310_v33 = vsel %vm6733_vm11, %v1300_v20, %v1302_v49  ;;  %v1235_v55 = vpop.permute.xlu1 %1234 }
 0x200   : > { %1318 = vst [vmem:[#allocation4 + $0x140] sm:$0xf0] %v1310_v33  ;;  %v1243_v9 = vsel %vm6734_vm4, %v1233_v52, %v1235_v55  ;;  %v1244_v32 = vsel %vm6734_vm4, %v1235_v55, %v1237_v8 }
 0x201   : > { %1251 = vst [vmem:[#allocation4 + $0x140] sm:$0xf] %v1243_v9  ;;  %1733 = vrot.lane.b32.xlu0 %v5072_v23, %s4192_s25 }
 0x202   : > { %1252 = vst [vmem:[#allocation4 + $0x190] sm:$0xf] %v1244_v32  ;;  %v1981_v31 = vld.sshfl [vmem:[#allocation1 + $0x18] sm:$0xff pattern:$0x75316420] }
 0x203   : > { %1989 = vrot.lane.b32.xlu1 %v1981_v31, %s6749_s15  ;;  %v1980_v8 = vld.sshfl [vmem:[#allocation1 + $0x10] sm:$0xff pattern:$0x75316420] }
 0x206   : > { %1925 = vrot.lane.b32.xlu2 %v1917_v43, %s6751_s9  ;;  %v1308_v26 = vpop.permute.xlu0 %1307 }
 0x207   : > { %v1313_v47 = vsel %vm6733_vm11, %v1306_v38, %v1308_v26  ;;  %v1241_v62 = vpop.permute.xlu1 %1240 }
 0x208   : > { %1321 = vst [vmem:[#allocation4 + $0x18] sm:$0xf0] %v1313_v47  ;;  %v1246_v52 = vsel %vm6734_vm4, %v1239_v45, %v1241_v62  ;;  %vm6802_vm4 = vcmask 965632  }
 0x209   : > { %1254 = vst [vmem:[#allocation4 + $0x18] sm:$0xf] %v1246_v52  ;;  %1858 = vrot.lane.b32.xlu0 %v1851_v10, %s6753_s29 }
 0x20b   : > { %1987 = vrot.lane.b32.xlu1 %v1980_v8, %s6749_s15 }
 0x20e   : > { %1731 = vrot.lane.b32.xlu2 %v5083_v3, %s4192_s25 }
 0x20f   : > { %v1304_v23 = vpop.permute.xlu1 %1303 }
 0x210   : > { %v1311_v24 = vsel %vm6733_vm11, %v1302_v49, %v1304_v23  ;;  %v1312_v51 = vsel %vm6733_vm11, %v1304_v23, %v1306_v38  ;;  %vm6800_vm11 = vmmov %vm6799_vm5 }
 0x211   : > { %1319 = vst [vmem:[#allocation4 + $0x190] sm:$0xf0] %v1311_v24  ;;  %1604 = vrot.lane.b32.xlu0 %v5031_v11, %s4190_s13  ;;  %v1979_v11 = vld.sshfl [vmem:[#allocation1 + $0x8] sm:$0xff pattern:$0x75316420]  ;;  %vm6803_vm10 = vmmov %vm6800_vm11 }
 0x212   : > { %1320 = vst [vmem:[#allocation4 + $0x88] sm:$0xf0] %v1312_v51 }
 0x213   : > { %1796 = vrot.lane.b32.xlu1 %v5103_v14, %s6755_s28 }
 0x216   : > { %1798 = vrot.lane.b32.xlu2 %v5092_v60, %s6755_s28 }
 0x219   : > { %1729 = vrot.lane.b32.xlu0 %v5081_v19, %s4192_s25  ;;  %v1978_v19 = vld.sshfl [vmem:[#allocation1] sm:$0xff pattern:$0x75316420] }
 0x21b   : > { %1923 = vrot.lane.b32.xlu1 %v1916_v2, %s6751_s9 }
 0x21e   : > { %1602 = vrot.lane.b32.xlu2 %v5039_v17, %s4190_s13 }
 0x221   : > { %1538 = vrot.lane.b32.xlu0 %v5020_v63, %s4189_s12 }
 0x223   : > { %1667 = vrot.lane.b32.xlu1 %v5063_v44, %s4191_s18 }
 0x226   : > { %1669 = vrot.lane.b32.xlu2 %v5050_v36, %s4191_s18 }
 0x229   : > { %1665 = vrot.lane.b32.xlu0 %v5057_v16, %s4191_s18 }
 0x22b   : > { %1794 = vrot.lane.b32.xlu1 %v5101_v1, %s6755_s28 }
 0x22e   : > { %1985 = vrot.lane.b32.xlu2 %v1979_v11, %s6749_s15 }
 0x231   : > { %1983 = vrot.lane.b32.xlu0 %v1978_v19, %s6749_s15 }
 0x233   : > { %1540 = vrot.lane.b32.xlu1 %v5007_v5, %s4189_s12 }
 0x236   : > { %1600 = vrot.lane.b32.xlu2 %v5037_v15, %s4190_s13 }
 0x239   : > { %1438 = vrot.lane.b32.xlu0 %v4986_v58, %s6736_s14 }
 0x23b   : > { %1856 = vrot.lane.b32.xlu1 %v5109_v61, %s6753_s29 }
 0x23e   : > { %1921 = vrot.lane.b32.xlu2 %v5123_v22, %s6751_s9 }
 0x241   : > { %1727 = vrot.lane.b32.xlu0 %v5070_v6, %s4192_s25 }
 0x243   : > { %1371 = vrot.lane.b32.xlu1 %v4971_v0, %s6738_s7 }
 0x246   : > { %1373 = vrot.lane.b32.xlu2 %v4964_v40, %s6738_s7 }
 0x249   : > { %1919 = vrot.lane.b32.xlu0 %v5121_v59, %s6751_s9  ;;  %s6824_s9 = smov 65  }
 0x24b   : > { %1440 = vrot.lane.b32.xlu1 %v4981_v25, %s6736_s14 }
 0x24e   : > { %1536 = vrot.lane.b32.xlu2 %v5016_v27, %s4189_s12 }
 0x251   : > { %1598 = vrot.lane.b32.xlu0 %v5028_v50, %s4190_s13 }
 0x253   : > { %1792 = vrot.lane.b32.xlu1 %v5090_v13, %s6755_s28 }
 0x256   : > { %1854 = vrot.lane.b32.xlu2 %v5107_v35, %s6753_s29  ;;  %s6825_s29 = smov 80  }
 0x258   : > { %v1992_v0 = vpop.permute.xlu2 %1991 }
 0x259   : > { %1790 = vrot.lane.b32.xlu0 %v5088_v28, %s6755_s28  ;;  %s6826_s28 = smov 81  }
 0x25b   : > { %1369 = vrot.lane.b32.xlu1 %v4969_v34, %s6738_s7 }
 0x25e   : > { %1436 = vrot.lane.b32.xlu2 %v4984_v48, %s6736_s14 }
 0x260   : > { %v1926_v40 = vpop.permute.xlu2 %1925  ;;  %v1863_v25 = vpop.permute.xlu1 %1862 }
 0x261   : > { %1661 = vrot.lane.b32.xlu0 %v5046_v41, %s4191_s18 }
 0x263   : > { %1663 = vrot.lane.b32.xlu1 %v5048_v7, %s4191_s18  ;;  %v1861_v58 = vpop.permute.xlu0 %1860 }
 0x264   : > { %v1867_v5 = vsel %vm712_vm6, %v1861_v58, %v1863_v25 }
 0x265   : > { %1875 = vst [vmem:[#allocation4 + $0x40] sm:$0xf] %v1867_v5 }
 0x266   : > { %1725 = vrot.lane.b32.xlu2 %v5068_v54, %s4192_s25 }
 0x268   : > { %v1732_v27 = vpop.permute.xlu2 %1731 }
 0x269   : > { %1532 = vrot.lane.b32.xlu0 %v5011_v57, %s4189_s12 }
 0x26b   : > { %1534 = vrot.lane.b32.xlu1 %v5013_v21, %s4189_s12  ;;  %v1928_v34 = vpop.permute.xlu0 %1927 }
 0x26c   : > { %v1932_v48 = vsel %vm6740_vm3, %v1926_v40, %v1928_v34 }
 0x26d   : > { %1940 = vst [vmem:[#allocation4 + $0x40] sm:$0xf0] %v1932_v48 }
 0x26e   : > { %1596 = vrot.lane.b32.xlu2 %v5026_v37, %s4190_s13 }
 0x270   : > { %v1799_v63 = vpop.permute.xlu2 %1798 }
 0x273   : > { %1367 = vrot.lane.b32.xlu1 %v4957_v39, %s6738_s7  ;;  %v1734_v50 = vpop.permute.xlu0 %1733 }
 0x274   : > { %v1738_v17 = vsel %vm579_vm1, %v1732_v27, %v1734_v50  ;;  %v2057_v16 = vld [vmem:[#allocation4 + $0x40] sm:$0xff] }
 0x275   : > { %v1990_v15 = vpop.permute.xlu1 %1989  ;;  %1746 = vst [vmem:[#allocation4 + $0x160] sm:$0xf] %v1738_v17 }
 0x276   : > { %1434 = vrot.lane.b32.xlu2 %v4976_v29, %s6736_s14  ;;  %v1996_v57 = vsel %vm6799_vm5, %v1990_v15, %v1992_v0  ;;  %vm6801_vm5 = vcmask 1031168  }
 0x277   : > { %2004 = vst [vmem:[#allocation4 + $0x1b8] sm:$0xf] %v1996_v57 }
 0x278   : > { %v1603_v21 = vpop.permute.xlu2 %1602 }
 0x27b   : > { %1365 = vrot.lane.b32.xlu1 %v4952_v4, %s6738_s7  ;;  %v5227_v37 = vpop.permute.xlu0 %1858  ;;  %s6903_s7 = smov 56  }
 0x27c   : > { %v1866_v39 = vsel %vm712_vm6, %v5227_v37, %v1861_v58 }
 0x27d   : > { %v1988_v41 = vpop.permute.xlu1 %1987  ;;  %1874 = vst [vmem:[#allocation4 + $0x1f8] sm:$0xf] %v1866_v39 }
 0x27e   : > { %1432 = vrot.lane.b32.xlu2 %v4974_v12, %s6736_s14  ;;  %v1995_v7 = vsel %vm6800_vm11, %v1988_v41, %v1990_v15  ;;  %v2061_v29 = vld [vmem:[#allocation4 + $0x1b8] sm:$0xff]  ;;  %vm6804_vm11 = vmmov %vm6801_vm5  ;;  %s6823_s14 = smov 74  }
 0x27f   : > { %2003 = vst [vmem:[#allocation4 + $0x78] sm:$0xf] %v1995_v7  ;;  %2138 = vmatpush.msra.mxu3 %v2061_v29 }
 0x280   : > { %v1670_v36 = vpop.permute.xlu2 %1669 }
 0x281   : > { %2139 = vmatpush.msra.mxu3 %v2057_v16 }
 0x283   : > { %v1605_v44 = vpop.permute.xlu0 %1604 }
 0x284   : > { %v1609_v54 = vsel %vm6801_vm5, %v1603_v21, %v1605_v44  ;;  %vm6807_vm5 = vcmask 965632  }
 0x285   : > { %v1797_v4 = vpop.permute.xlu1 %1796  ;;  %1617 = vst [vmem:[#allocation4 + $0x130] sm:$0xf] %v1609_v54 }
 0x286   : > { %v1803_v6 = vsel %vm6802_vm4, %v1797_v4, %v1799_v63  ;;  %v2060_v3 = vld [vmem:[#allocation4 + $0x78] sm:$0xff] }
 0x287   : > { %1811 = vst [vmem:[#allocation4 + $0x160] sm:$0xf0] %v1803_v6  ;;  %2118 = vmatpush.msra.mxu2 %v2060_v3  ;;  %v2037_v3 = vld [vmem:[#allocation4 + $0x18] sm:$0xff] }
 0x288   : > { %v1986_v12 = vpop.permute.xlu2 %1985 }
 0x289   : > { %v1994_v28 = vsel %vm6803_vm10, %v1986_v12, %v1988_v41  ;;  %vm6805_vm10 = vcmask 982016   ;;  %v5271_v41 = vld [vmem:[%s6686_s1 + $0x1] ss:$8 sm:$0xf] }
 0x28a   : > { %2002 = vst [vmem:[#allocation4 + $0x150] sm:$0xf] %v1994_v28  ;;  %vm6806_vm4 = vmmov %vm6805_vm10  ;;  %v2225_v54 = vperm.slane %v5271_v41, 2 }
 0x28b   : > { %v1730_v13 = vpop.permute.xlu0 %1729 }
 0x28c   : > { %v1737_v1 = vsel %vm579_vm1, %v1730_v13, %v1732_v27 }
 0x28d   : > { %v1924_v60 = vpop.permute.xlu1 %1923  ;;  %1745 = vst [vmem:[#allocation4 + $0x60] sm:$0xf] %v1737_v1 }
 0x28e   : > { %v1931_v14 = vsel %vm6740_vm3, %v1924_v60, %v1926_v40  ;;  %v2053_v35 = vld [vmem:[#allocation4 + $0x160] sm:$0xff] }
 0x28f   : > { %1939 = vst [vmem:[#allocation4 + $0x1f8] sm:$0xf0] %v1931_v14  ;;  %2140 = vmatpush.msra.mxu3 %v2053_v35  ;;  %v5285_v14 = vld [vmem:[%s6686_s1 + $0x2] ss:$8 sm:$0xf] }
 0x290   : > { %v5239_v61 = vpop.permute.xlu2 %1600 }
 0x291   : > { %v1608_v10 = vsel %vm6804_vm11, %v5239_v61, %v1603_v21  ;;  %v2059_v59 = vld [vmem:[#allocation4 + $0x150] sm:$0xff]  ;;  %vm6808_vm11 = vcmask 900096  }
 0x292   : > { %1616 = vst [vmem:[#allocation4 + $0x8] sm:$0xf] %v1608_v10  ;;  %2098 = vmatpush.msra.mxu1 %v2059_v59  ;;  %v2288_v10 = vperm.slane %v5285_v14, 1 }
 0x293   : > { %v1539_v22 = vpop.permute.xlu0 %1538 }
 0x295   : > { %v1668_v45 = vpop.permute.xlu1 %1667 }
 0x296   : > { %v1674_v30 = vsel %vm6805_vm10, %v1668_v45, %v1670_v36  ;;  %v2056_v53 = vld [vmem:[#allocation4 + $0x1f8] sm:$0xff]  ;;  %vm6809_vm10 = vcmask 1039360   ;;  %v2226_v36 = vperm.slane %v5271_v41, 3 }
 0x297   : > { %1682 = vst [vmem:[#allocation4 + $0x130] sm:$0xf0] %v1674_v30  ;;  %2119 = vmatpush.msra.mxu2 %v2056_v53  ;;  %v2287_v53 = vperm.slane %v5285_v14, 0 }
 0x298   : > { %v1922_v56 = vpop.permute.xlu2 %1921  ;;  %v2228_v6 = vrot.slane %v2226_v36, 4  ;;  %v2223_v36 = vperm.slane %v5271_v41, 0 }
 0x299   : > { %v1930_v42 = vsel %vm6740_vm3, %v1922_v56, %v1924_v60  ;;  %v2029_v60 = vld [vmem:[#allocation4 + $0x68] sm:$0xff] }
 0x29a   : > { %1938 = vst [vmem:[#allocation4 + $0x1b0] sm:$0xf0] %v1930_v42  ;;  %v2230_v28 = vsel %vm282_vm0, %v2225_v54, %v2228_v6  ;;  %v2021_v42 = vld [vmem:[#allocation4 + $0x1d0] sm:$0xff]  ;;  %v2020_v6 = vld [vmem:[#allocation4 + $0x100] sm:$0xff] }
 0x29b   : > { %v5245_v2 = vpop.permute.xlu0 %1665  ;;  %2233 = vrot.lane.b32.xlu2 %v2230_v28, %s4173_s10 }
 0x29c   : > { %v1673_v20 = vsel %vm6806_vm4, %v5245_v2, %v1668_v45  ;;  %vm6810_vm4 = vmmov %vm6809_vm10  ;;  %v2025_v45 = vld [vmem:[#allocation4 + $0x1a8] sm:$0xff] }
 0x29d   : > { %v5247_v43 = vpop.permute.xlu1 %1794  ;;  %1681 = vst [vmem:[#allocation4 + $0x8] sm:$0xf0] %v1673_v20  ;;  %v4206_v20 = vmov 0  }
 0x29e   : > { %v1802_v46 = vsel %vm6807_vm5, %v5247_v43, %v1797_v4  ;;  %v2049_v49 = vld [vmem:[#allocation4 + $0x130] sm:$0xff]  ;;  %vm1375_vm5 = vcmask 384000   ;;  %4161 = vset.pattern.permute.xlu0 %v4206_v20  ;;  %4162 = vset.pattern.permute.xlu2 %v4206_v20 }
 0x29f   : > { %1810 = vst [vmem:[#allocation4 + $0x60] sm:$0xf0] %v1802_v46  ;;  %2141 = vmatpush.msra.mxu3 %v2049_v49  ;;  %v2070_v49 = vld [vmem:[%s6688_s3] sm:$0xf] }
 0x2a0   : > { %v1374_v33 = vpop.permute.xlu2 %1373  ;;  %2073 = vperm.xlu0 %4161, %v2070_v49  }
 0x2a3   : > { %v1984_v55 = vpop.permute.xlu0 %1983 }
 0x2a4   : > { %v1993_v32 = vsel %vm6808_vm11, %v1984_v55, %v1986_v12  ;;  %v2048_v47 = vld [vmem:[#allocation4 + $0x8] sm:$0xff]  ;;  %vm1442_vm11 = vcmask 375808   ;;  %v2013_v55 = vld [vmem:[#allocation4 + $0xe0] sm:$0xff] }
 0x2a5   : > { %v1541_v9 = vpop.permute.xlu1 %1540  ;;  %2001 = vst [vmem:[#allocation4 + $0x50] sm:$0xf] %v1993_v32  ;;  %v5303_v32 = vld [vmem:[%s6686_s1 + $0x4] ss:$8 sm:$0xf] }
 0x2a6   : > { %v1545_v31 = vsel %vm6809_vm10, %v1539_v22, %v1541_v9  ;;  %v2052_v38 = vld [vmem:[#allocation4 + $0x60] sm:$0xff]  ;;  %vm6811_vm10 = vcmask 1031168  }
 0x2a7   : > { %1553 = vst [vmem:[#allocation4 + $0x168] sm:$0xf0] %v1545_v31  ;;  %2120 = vmatpush.msra.mxu2 %v2052_v38 }
 0x2a8   : > { %v5255_v26 = vpop.permute.xlu2 %1536 }
 0x2a9   : > { %v1544_v62 = vsel %vm6810_vm4, %v5255_v26, %v1539_v22  ;;  %2121 = vmatpush.msra.mxu2 %v2048_v47  ;;  %vm6812_vm4 = vcmask 965632   ;;  %v5308_v47 = vld [vmem:[%s6687_s2] sm:$0xf] }
 0x2aa   : > { %1552 = vst [vmem:[#allocation4 + $0x48] sm:$0xf0] %v1544_v62  ;;  %v2417_v62 = vperm.slane %v5303_v32, 3 }
 0x2ab   : > { %v1439_v52 = vpop.permute.xlu0 %1438 }
 0x2ac   : > { %v2058_v23 = vld [vmem:[#allocation4 + $0x50] sm:$0xff] }
 0x2ad   : > { %v1857_v8 = vpop.permute.xlu1 %1856  ;;  %2078 = vmatpush.msra.mxu0 %v2058_v23 }
 0x2ae   : > { %v1865_v24 = vsel %vm712_vm6, %v1857_v8, %v5227_v37  ;;  %v2045_v51 = vld [vmem:[#allocation4 + $0x168] sm:$0xff] }
 0x2af   : > { %1873 = vst [vmem:[#allocation4 + $0x1b0] sm:$0xf] %v1865_v24  ;;  %2142 = vmatpush.msra.mxu3 %v2045_v51  ;;  %v2009_v24 = vld [vmem:[#allocation4] sm:$0xff] }
 0x2b0   : > { %v1855_v11 = vpop.permute.xlu2 %1854 }
 0x2b1   : > { %v1864_v19 = vsel %vm712_vm6, %v1855_v11, %v1857_v8  ;;  %v2044_v0 = vld [vmem:[#allocation4 + $0x48] sm:$0xff]  ;;  %v2416_v11 = vperm.slane %v5303_v32, 2 }
 0x2b2   : > { %1872 = vst [vmem:[#allocation4 + $0xf8] sm:$0xf] %v1864_v19  ;;  %2122 = vmatpush.msra.mxu2 %v2044_v0  ;;  %v2419_v19 = vrot.slane %v2417_v62, 4  ;;  %v2036_v0 = vld [vmem:[#allocation4 + $0x88] sm:$0xff] }
 0x2b3   : > { %v1728_v40 = vpop.permute.xlu0 %1727  ;;  %v4093_v62 = vld [vmem:[%s6686_s1 + $0x6] ss:$8 sm:$0xf] }
 0x2b4   : > { %v1736_v58 = vsel %vm579_vm1, %v1728_v40, %v1730_v13  ;;  %v2033_v13 = vld [vmem:[#allocation4 + $0xc8] sm:$0xff] }
 0x2b5   : > { %v1372_v25 = vpop.permute.xlu1 %1371  ;;  %1744 = vst [vmem:[#allocation4 + $0x1d8] sm:$0xf] %v1736_v58  ;;  %v2289_v58 = vperm.slane %v5285_v14, 2 }
 0x2b6   : > { %v1379_v5 = vsel %vm1375_vm5, %v1372_v25, %v1374_v33  ;;  %v2055_v27 = vld [vmem:[#allocation4 + $0x1b0] sm:$0xff]  ;;  %v2017_v33 = vld [vmem:[#allocation4 + $0x1c8] sm:$0xff] }
 0x2b7   : > { %1387 = vst [vmem:[#allocation4 + $0x70] sm:$0xf] %v1379_v5  ;;  %2099 = vmatpush.msra.mxu1 %v2055_v27  ;;  %v5320_v5 = vld [vmem:[#allocation4 + $0x1f0] sm:$0xff]  ;;  %v2032_v27 = vld [vmem:[#allocation4 + $0x1c0] sm:$0xff] }
 0x2b8   : > { %v1437_v34 = vpop.permute.xlu2 %1436 }
 0x2b9   : > { %v1445_v48 = vsel %vm1442_vm11, %v1437_v34, %v1439_v52 }
 0x2ba   : > { %1453 = vst [vmem:[#allocation4 + $0x178] sm:$0xf0] %v1445_v48  ;;  %v2028_v48 = vld [vmem:[#allocation4 + $0xa0] sm:$0xff] }
 0x2bb   : > { %v1920_v63 = vpop.permute.xlu0 %1919 }
 0x2bc   : > { %v1929_v15 = vsel %vm6740_vm3, %v1920_v63, %v1922_v56  ;;  %vm6813_vm3 = vmmov %vm6811_vm10  ;;  %v2291_v56 = vrot.slane %v2288_v10, 4 }
 0x2bd   : > { %v1441_v50 = vpop.permute.xlu1 %1440  ;;  %1937 = vst [vmem:[#allocation4 + $0xf8] sm:$0xf0] %v1929_v15  ;;  %v2224_v15 = vperm.slane %v5271_v41, 1 }
 0x2be   : > { %v1446_v17 = vsel %vm1442_vm11, %v1439_v52, %v1441_v50  ;;  %v2293_v46 = vsel %vm282_vm0, %v2287_v53, %v2291_v56  ;;  %v2008_v53 = vld [vmem:[#allocation4 + $0xa8] sm:$0xff] }
 0x2bf   : > { %1454 = vst [vmem:[#allocation4 + $0x70] sm:$0xf0] %v1446_v17  ;;  %2295 = vrot.lane.b32.xlu2 %v2293_v46, %s4177_s20  ;;  %v5330_v17 = vld [vmem:[%s6686_s1 + $0x5] ss:$8 sm:$0xf] }
 0x2c0   : > { %v1726_v57 = vpop.permute.xlu2 %1725 }
 0x2c1   : > { %v1735_v21 = vsel %vm579_vm1, %v1726_v57, %v1728_v40 }
 0x2c2   : > { %1743 = vst [vmem:[#allocation4 + $0x138] sm:$0xf] %v1735_v21  ;;  %v2478_v21 = vperm.slane %v5330_v17, 1 }
 0x2c3   : > { %v1599_v37 = vpop.permute.xlu0 %1598 }
 0x2c4   : > { %v1607_v7 = vsel %vm6811_vm10, %v1599_v37, %v5239_v61  ;;  %v2054_v29 = vld [vmem:[#allocation4 + $0xf8] sm:$0xff]  ;;  %vm6814_vm10 = vmmov %vm6812_vm4  ;;  %v2481_v54 = vrot.slane %v2478_v21, 4 }
 0x2c5   : > { %v1793_v39 = vpop.permute.xlu1 %1792  ;;  %1615 = vst [vmem:[#allocation4 + $0x118] sm:$0xf] %v1607_v7  ;;  %2079 = vmatpush.msra.mxu0 %v2054_v29  ;;  %v2024_v29 = vld [vmem:[#allocation4 + $0x90] sm:$0xff] }
 0x2c6   : > { %v1801_v16 = vsel %vm6812_vm4, %v1793_v39, %v5247_v43  ;;  %v2041_v44 = vld [vmem:[#allocation4 + $0x70] sm:$0xff] }
 0x2c7   : > { %1809 = vst [vmem:[#allocation4 + $0x1d8] sm:$0xf0] %v1801_v16  ;;  %2143 = vmatpush.msra.mxu3 %v2041_v44  ;;  %v2227_v16 = vrot.slane %v2224_v15, 4  ;;  %v5392_v15 = vld [vmem:[%s6686_s1 + $0x20] ss:$8 sm:$0xf] }
 0x2c8   : > { %v1597_v4 = vpop.permute.xlu2 %1596 }
 0x2c9   : > { %v1606_v12 = vsel %vm6813_vm3, %v1597_v4, %v1599_v37  ;;  %2144 = vmatpush.msra.mxu3 %v2037_v3  ;;  %vm6815_vm3 = vcmask 982016   ;;  %v2477_v4 = vperm.slane %v5330_v17, 0  ;;  %v2229_v3 = vsel %vm282_vm0, %v2223_v36, %v2227_v16  ;;  %v2027_v36 = vld [vmem:[#allocation4 + $0x170] sm:$0xff] }
 0x2ca   : > { %1614 = vst [vmem:[#allocation4 + $0x110] sm:$0xf] %v1606_v12  ;;  %vm6816_vm4 = vmmov %vm6815_vm3  ;;  %2231 = vrot.lane.b32.xlu1 %v2229_v3, %s4173_s10  ;;  %v5402_v16 = vld [vmem:[%s6686_s1 + $0x25] ss:$8 sm:$0xf] }
 0x2cb   : > { %2145 = vmatpush.msra.mxu3 %v2033_v13  ;;  %v1791_v1 = vpop.permute.xlu0 %1790  ;;  %v2483_v41 = vsel %vm282_vm0, %v2477_v4, %v2481_v54  ;;  %v2016_v13 = vld [vmem:[#allocation4 + $0x158] sm:$0xff]  ;;  %v2023_v4 = vld [vmem:[#allocation4 + $0x1a0] sm:$0xff] }
 0x2cc   : > { %v1800_v61 = vsel %vm6814_vm10, %v1791_v1, %v1793_v39  ;;  %vm6817_vm10 = vcmask 1039360   ;;  %v2012_v1 = vld [vmem:[#allocation4 + $0xd8] sm:$0xff] }
 0x2cd   : > { %v5287_v35 = vpop.permute.xlu1 %1369  ;;  %2146 = vmatpush.msra.mxu3 %v2029_v60  ;;  %1808 = vst [vmem:[#allocation4 + $0x138] sm:$0xf0] %v1800_v61  ;;  %v5349_v61 = vld [vmem:[%s6686_s1 + $0x7] ss:$8 sm:$0xf] }
 0x2ce   : > { %v1378_v59 = vsel %vm1375_vm5, %v5287_v35, %v1372_v25  ;;  %v2051_v22 = vld [vmem:[#allocation4 + $0x1d8] sm:$0xff]  ;;  %v2421_v25 = vsel %vm282_vm0, %v2416_v11, %v2419_v19  ;;  %v2606_v20 = vperm.slane %v5349_v61, 2  ;;  %v2542_v11 = vperm.slane %v4093_v62, 1 }
 0x2cf   : > { %1386 = vst [vmem:[#allocation4 + $0x178] sm:$0xf] %v1378_v59  ;;  %2100 = vmatpush.msra.mxu1 %v2051_v22  ;;  %2147 = vmatpush.msra.mxu3 %v2025_v45  ;;  %v2607_v22 = vperm.slane %v5349_v61, 3 }
 0x2d0   : > { %v1435_v30 = vpop.permute.xlu2 %1434  ;;  %2424 = vrot.lane.b32.xlu2 %v2421_v25, %s4175_s16 }
 0x2d1   : > { %v1444_v43 = vsel %vm1442_vm11, %v1435_v30, %v1437_v34  ;;  %2148 = vmatpush.msra.mxu3 %v2021_v42  ;;  %v2609_v46 = vrot.slane %v2607_v22, 4 }
 0x2d2   : > { %1452 = vst [vmem:[#allocation4 + $0x30] sm:$0xf0] %v1444_v43 }
 0x2d3   : > { %2149 = vmatpush.msra.mxu3 %v2017_v33  ;;  %v1662_v9 = vpop.permute.xlu0 %1661  ;;  %v2480_v33 = vperm.slane %v5330_v17, 3 }
 0x2d4   : > { %v2050_v38 = vld [vmem:[#allocation4 + $0x138] sm:$0xff] }
 0x2d5   : > { %v1664_v31 = vpop.permute.xlu1 %1663  ;;  %2150 = vmatpush.msra.mxu3 %v2013_v55  ;;  %2080 = vmatpush.msra.mxu0 %v2050_v38  ;;  %v5364_v55 = vld [vmem:[%s6686_s1 + $0x23] ss:$8 sm:$0xf] }
 0x2d6   : > { %v1672_v52 = vsel %vm6815_vm3, %v1664_v31, %v5245_v2  ;;  %v1671_v8 = vsel %vm6816_vm4, %v1662_v9, %v1664_v31  ;;  %v2040_v23 = vld [vmem:[#allocation4 + $0x178] sm:$0xff]  ;;  %v2290_v2 = vperm.slane %v5285_v14, 3  ;;  %vm6818_vm3 = vmmov %vm6817_vm10  ;;  %v2611_v9 = vsel %vm282_vm0, %v2606_v20, %v2609_v46  ;;  %v2007_v20 = vld [vmem:[#allocation4 + $0xf0] sm:$0xff] }
 0x2d7   : > { %1680 = vst [vmem:[#allocation4 + $0x118] sm:$0xf0] %v1672_v52  ;;  %2123 = vmatpush.msra.mxu2 %v2040_v23  ;;  %2151 = vmatpush.msra.mxu3 %v2009_v24  ;;  %v2415_v31 = vperm.slane %v5303_v32, 1  ;;  %v2859_v38 = vperm.slane %v5364_v55, 1  ;;  %v2482_v52 = vrot.slane %v2480_v33, 4  ;;  %v2858_v24 = vperm.slane %v5364_v55, 0 }
 0x2d8   : > { %v1433_v51 = vpop.permute.xlu2 %1432  ;;  %1679 = vst [vmem:[#allocation4 + $0x110] sm:$0xf0] %v1671_v8  ;;  %2152 = vmatmul.f32.vlgmr.msra.gmra.mxu3 %v5308_v47  ;;  %v2292_v34 = vrot.slane %v2290_v2, 4  ;;  %2485 = vrot.lane.b32.xlu2 %v2483_v41, %s4180_s8  ;;  %v2414_v8 = vperm.slane %v5303_v32, 0  ;;  %v2605_v41 = vperm.slane %v5349_v61, 1  ;;  %vm6836_vm4 = vcmask 592896  }
 0x2d9   : > { %v1443_v40 = vsel %vm1442_vm11, %v1433_v51, %v1435_v30  ;;  %2124 = vmatpush.msra.mxu2 %v2036_v0  ;;  %3970 = vmatpush.msrb.mxu3 %v5320_v5  ;;  %v2418_v23 = vrot.slane %v2415_v31, 4  ;;  %v2862_v51 = vrot.slane %v2859_v38, 4  ;;  %v5382_v0 = vld [vmem:[%s6686_s1 + $0x24] ss:$8 sm:$0xf] }
 0x2da   : > { %1451 = vst [vmem:[#allocation4 + $0x10] sm:$0xf0] %v1443_v40  ;;  %v2294_v50 = vsel %vm282_vm0, %v2289_v58, %v2292_v34  ;;  %v2544_v58 = vperm.slane %v4093_v62, 3  ;;  %v2541_v34 = vperm.slane %v4093_v62, 0  ;;  %v2018_v38 = vld [vmem:[#allocation4 + $0x188] sm:$0xff] }
 0x2db   : > { %2125 = vmatpush.msra.mxu2 %v2032_v27  ;;  %3971 = vmatpush.msrb.mxu3 %v5320_v5  ;;  %v1533_v63 = vpop.permute.xlu0 %1532  ;;  %v2420_v32 = vsel %vm282_vm0, %v2414_v8, %v2418_v23  ;;  %v2864_v27 = vsel %vm282_vm0, %v2858_v24, %v2862_v51  ;;  %v2670_v8 = vperm.slane %v5392_v15, 2 }
 0x2dc   : > { %2297 = vrot.lane.b32.xlu0 %v2294_v50, %s4177_s20  ;;  %v2035_v50 = vld [vmem:[#allocation4 + $0x190] sm:$0xff]  ;;  %v2546_v21 = vrot.slane %v2544_v58, 4 }
 0x2dd   : > { %v1535_v57 = vpop.permute.xlu1 %1534  ;;  %2126 = vmatpush.msra.mxu2 %v2028_v48  ;;  %v2545_v48 = vrot.slane %v2542_v11, 4 }
 0x2de   : > { %v1543_v37 = vsel %vm6817_vm10, %v1535_v57, %v5255_v26  ;;  %v1542_v39 = vsel %vm6818_vm3, %v1533_v63, %v1535_v57  ;;  %v2047_v7 = vld [vmem:[#allocation4 + $0x118] sm:$0xff]  ;;  %v2923_v63 = vperm.slane %v5382_v0, 1  ;;  %v2543_v57 = vperm.slane %v4093_v62, 2 }
 0x2df   : > { %1551 = vst [vmem:[#allocation4 + $0x28] sm:$0xf0] %v1543_v37  ;;  %v2046_v44 = vld [vmem:[#allocation4 + $0x110] sm:$0xff]  ;;  %2101 = vmatpush.msra.mxu1 %v2047_v7  ;;  %2127 = vmatpush.msra.mxu2 %v2024_v29  ;;  %v2547_v37 = vsel %vm282_vm0, %v2541_v34, %v2545_v48  ;;  %v2669_v29 = vperm.slane %v5392_v15, 1  ;;  %vm6838_vm10 = vcmask 596992  }
 0x2e0   : > { %1550 = vst [vmem:[#allocation4 + $0x58] sm:$0xf0] %v1542_v39  ;;  %2081 = vmatpush.msra.mxu0 %v2046_v44  ;;  %v4090_v26 = vld [vmem:[%s6686_s1 + $0x3] ss:$8 sm:$0xf]  ;;  %2614 = vrot.lane.b32.xlu2 %v2611_v9, %s4178_s27  ;;  %v2922_v39 = vperm.slane %v5382_v0, 0  ;;  %v2548_v54 = vsel %vm282_vm0, %v2543_v57, %v2546_v21  ;;  %vm6839_vm3 = vmmov %vm6838_vm10 }
 0x2e1   : > { %2128 = vmatpush.msra.mxu2 %v2020_v6  ;;  %v2350_v12 = vperm.slane %v4090_v26, 0  ;;  %v2351_v28 = vperm.slane %v4090_v26, 1  ;;  %v2353_v14 = vperm.slane %v4090_v26, 3  ;;  %v2352_v56 = vperm.slane %v4090_v26, 2 }
 0x2e2   : > { %v2926_v7 = vrot.slane %v2923_v63, 4  ;;  %v2668_v6 = vperm.slane %v5392_v15, 0  ;;  %v2672_v26 = vrot.slane %v2669_v29, 4  ;;  %v4097_v62 = vld [vmem:[%s6686_s1 + $0x22] ss:$8 sm:$0xf] }
 0x2e3   : > { %2129 = vmatpush.msra.mxu2 %v2016_v13  ;;  %v2354_v60 = vrot.slane %v2351_v28, 4  ;;  %v2355_v42 = vrot.slane %v2353_v14, 4  ;;  %v2034_v28 = vld [vmem:[#allocation4 + $0x140] sm:$0xff]  ;;  %v2019_v13 = vld [vmem:[#allocation4 + $0x98] sm:$0xff]  ;;  %v2015_v14 = vld [vmem:[#allocation4 + $0x148] sm:$0xff]  ;;  %v2795_v58 = vperm.slane %v4097_v62, 0 }
 0x2e4   : > { %v2928_v3 = vsel %vm282_vm0, %v2922_v39, %v2926_v7  ;;  %v2674_v22 = vsel %vm282_vm0, %v2668_v6, %v2672_v26  ;;  %v2860_v39 = vperm.slane %v5364_v55, 2  ;;  %v2798_v7 = vperm.slane %v4097_v62, 3 }
 0x2e5   : > { %v1368_v10 = vpop.permute.xlu1 %1367  ;;  %2130 = vmatpush.msra.mxu2 %v2012_v1  ;;  %v2356_v59 = vsel %vm282_vm0, %v2350_v12, %v2354_v60  ;;  %v2357_v49 = vsel %vm282_vm0, %v2352_v56, %v2355_v42  ;;  %v2986_v12 = vperm.slane %v5402_v16, 1  ;;  %v5413_v60 = vld [vmem:[%s6686_s1 + $0x21] ss:$8 sm:$0xf] }
 0x2e6   : > { %v1377_v45 = vsel %vm1375_vm5, %v1368_v10, %v5287_v35  ;;  %v2043_v30 = vld [vmem:[#allocation4 + $0x28] sm:$0xff]  ;;  %2358 = vrot.lane.b32.xlu0 %v2356_v59, %s4172_s30  ;;  %v2479_v35 = vperm.slane %v5330_v17, 2  ;;  %2360 = vrot.lane.b32.xlu1 %v2357_v49, %s4172_s30  ;;  %v2031_v17 = vld [vmem:[#allocation4 + $0x198] sm:$0xff]  ;;  %v2030_v1 = vld [vmem:[#allocation4 + $0x1e0] sm:$0xff]  ;;  %v2985_v59 = vperm.slane %v5402_v16, 0  ;;  %v2731_v46 = vperm.slane %v5413_v60, 0 }
 0x2e7   : > { %1385 = vst [vmem:[#allocation4 + $0x30] sm:$0xf] %v1377_v45  ;;  %v2042_v43 = vld [vmem:[#allocation4 + $0x58] sm:$0xff]  ;;  %2102 = vmatpush.msra.mxu1 %v2043_v30  ;;  %2131 = vmatpush.msra.mxu2 %v2008_v53  ;;  %v2608_v45 = vrot.slane %v2605_v41, 4  ;;  %v2989_v30 = vrot.slane %v2986_v12, 4  ;;  %v2732_v53 = vperm.slane %v5413_v60, 1 }
 0x2e8   : > { %2082 = vmatpush.msra.mxu0 %v2042_v43  ;;  %2132 = vmatmul.f32.vlgmr.msra.gmra.mxu2 %v5308_v47  ;;  %v2484_v19 = vsel %vm282_vm0, %v2479_v35, %v2482_v52  ;;  %v2026_v56 = vld [vmem:[#allocation4 + $0xe8] sm:$0xff]  ;;  %v2671_v49 = vperm.slane %v5392_v15, 3  ;;  %v2014_v52 = vld [vmem:[#allocation4 + $0x20] sm:$0xff]  ;;  %v2734_v48 = vperm.slane %v5413_v60, 3  ;;  %v2924_v12 = vperm.slane %v5382_v0, 2 }
 0x2e9   : > { %3950 = vmatpush.msrb.mxu2 %v5320_v5  ;;  %2866 = vrot.lane.b32.xlu2 %v2864_v27, %s6819_s17  ;;  %v2011_v42 = vld [vmem:[#allocation4 + $0x128] sm:$0xff]  ;;  %v2991_v33 = vsel %vm282_vm0, %v2985_v59, %v2989_v30  ;;  %v2735_v9 = vrot.slane %v2732_v53, 4  ;;  %v2988_v30 = vperm.slane %v5402_v16, 3 }
 0x2ea   : > { %v5424_v43 = vld [vmem:[%s6686_s1 + $0x26] ss:$8 sm:$0xf]  ;;  %v2673_v23 = vrot.slane %v2671_v49, 4  ;;  %v2736_v57 = vrot.slane %v2734_v48, 4 }
 0x2eb   : > { %3951 = vmatpush.msrb.mxu2 %v5320_v5  ;;  %v3052_v31 = vperm.slane %v5424_v43, 3  ;;  %v2737_v24 = vsel %vm282_vm0, %v2731_v46, %v2735_v9  ;;  %v3051_v51 = vperm.slane %v5424_v43, 2  ;;  %v5480_v41 = vld [vmem:[%s6686_s1 + $0x44] ss:$8 sm:$0xf] }
 0x2ec   : > { %v5497_v53 = vld [vmem:[%s6686_s1 + $0x45] ss:$8 sm:$0xf]  ;;  %v4104_v49 = vld [vmem:[%s6686_s1 + $0x41] ss:$8 sm:$0xf] }
 0x2ed   : > { %v1366_v40 = vpop.permute.xlu1 %1365  ;;  %v3054_v11 = vrot.slane %v3052_v31, 4  ;;  %v3464_v46 = vperm.slane %v5497_v53, 1  ;;  %v3463_v31 = vperm.slane %v5497_v53, 0 }
 0x2ee   : > { %v1376_v2 = vsel %vm1375_vm5, %v1366_v40, %v1368_v10  ;;  %v2039_v25 = vld [vmem:[#allocation4 + $0x30] sm:$0xff]  ;;  %2487 = vrot.lane.b32.xlu0 %v2484_v19, %s4180_s8  ;;  %2422 = vrot.lane.b32.xlu1 %v2420_v32, %s4175_s16  ;;  %v2604_v10 = vperm.slane %v5349_v61, 0  ;;  %v2022_v61 = vld [vmem:[#allocation4 + $0x180] sm:$0xff]  ;;  %v2796_v19 = vperm.slane %v4097_v62, 1  ;;  %v2675_v32 = vsel %vm282_vm0, %v2670_v8, %v2673_v23 }
 0x2ef   : > { %1384 = vst [vmem:[#allocation4 + $0x10] sm:$0xf] %v1376_v2  ;;  %2103 = vmatpush.msra.mxu1 %v2039_v25  ;;  %v2010_v40 = vld [vmem:[#allocation4 + $0x80] sm:$0xff]  ;;  %v3056_v27 = vsel %vm282_vm0, %v3051_v51, %v3054_v11  ;;  %v3239_v11 = vperm.slane %v4104_v49, 0 }
 0x2f0   : > { %v2610_v35 = vsel %vm282_vm0, %v2604_v10, %v2608_v45  ;;  %v5446_v2 = vld [vmem:[%s6686_s1 + $0x27] ss:$8 sm:$0xf]  ;;  %v2799_v34 = vrot.slane %v2796_v19, 4  ;;  %v3049_v10 = vperm.slane %v5424_v43, 0 }
 0x2f1   : > { %2104 = vmatpush.msra.mxu1 %v2035_v50  ;;  %2930 = vrot.lane.b32.xlu2 %v2928_v3, %s6820_s26  ;;  %v2006_v25 = vld [vmem:[#allocation4 + $0xc0] sm:$0xff]  ;;  %v3115_v63 = vperm.slane %v5446_v2, 3  ;;  %v2733_v50 = vperm.slane %v5413_v60, 2  ;;  %v3114_v15 = vperm.slane %v5446_v2, 2 }
 0x2f3   : > { %2105 = vmatpush.msra.mxu1 %v2031_v17  ;;  %v2801_v17 = vsel %vm282_vm0, %v2795_v58, %v2799_v34  ;;  %v3117_v21 = vrot.slane %v3115_v63, 4  ;;  %v2738_v29 = vsel %vm282_vm0, %v2733_v50, %v2736_v57  ;;  %v4110_v34 = vld [vmem:[%s6686_s1 + $0x47] ss:$8 sm:$0xf]  ;;  %v3242_v50 = vperm.slane %v4104_v49, 3 }
 0x2f5   : > { %2106 = vmatpush.msra.mxu1 %v2027_v36  ;;  %v3119_v36 = vsel %vm282_vm0, %v3114_v15, %v3117_v21  ;;  %v3593_v15 = vperm.slane %v4110_v34, 3 }
 0x2f6   : > { %v2038_v44 = vld [vmem:[#allocation4 + $0x10] sm:$0xff]  ;;  %2549 = vrot.lane.b32.xlu0 %v2547_v37, %s4176_s19  ;;  %2551 = vrot.lane.b32.xlu1 %v2548_v54, %s4176_s19  ;;  %v2861_v37 = vperm.slane %v5364_v55, 3  ;;  %v2800_v54 = vrot.slane %v2798_v7, 4  ;;  %v2925_v55 = vperm.slane %v5382_v0, 3  ;;  %v3400_v0 = vperm.slane %v5480_v41, 0 }
 0x2f7   : > { %2083 = vmatpush.msra.mxu0 %v2038_v44  ;;  %2107 = vmatpush.msra.mxu1 %v2023_v4  ;;  %v3592_v7 = vperm.slane %v4110_v34, 2 }
 0x2f8   : > { %v2863_v44 = vrot.slane %v2861_v37, 4 }
 0x2f9   : > { %2084 = vmatpush.msra.mxu0 %v2034_v28  ;;  %2108 = vmatpush.msra.mxu1 %v2019_v13  ;;  %v3050_v28 = vperm.slane %v5424_v43, 1 }
 0x2fa   : > { %2993 = vrot.lane.b32.xlu2 %v2991_v33, %s6821_s11  ;;  %v2865_v6 = vsel %vm282_vm0, %v2860_v39, %v2863_v44  ;;  %v3244_v39 = vrot.slane %v3242_v50, 4  ;;  %v3403_v44 = vperm.slane %v5480_v41, 3 }
 0x2fb   : > { %2085 = vmatpush.msra.mxu0 %v2030_v1  ;;  %2109 = vmatpush.msra.mxu1 %v2015_v14  ;;  %v2927_v1 = vrot.slane %v2925_v55, 4  ;;  %v3401_v14 = vperm.slane %v5480_v41, 1  ;;  %v3053_v59 = vrot.slane %v3050_v28, 4  ;;  %v3402_v55 = vperm.slane %v5480_v41, 2 }
 0x2fd   : > { %2086 = vmatpush.msra.mxu0 %v2026_v56  ;;  %2110 = vmatpush.msra.mxu1 %v2011_v42  ;;  %v3404_v45 = vrot.slane %v3401_v14, 4  ;;  %v3055_v56 = vsel %vm282_vm0, %v3049_v10, %v3053_v59  ;;  %v3113_v42 = vperm.slane %v5446_v2, 1  ;;  %v4112_v10 = vld [vmem:[%s6686_s1 + $0x61] ss:$8 sm:$0xf] }
 0x2fe   : > { %2676 = vrot.lane.b32.xlu0 %v2674_v22, %s4183_s24  ;;  %2612 = vrot.lane.b32.xlu1 %v2610_v35, %s4178_s27  ;;  %v2929_v22 = vsel %vm282_vm0, %v2924_v12, %v2927_v1  ;;  %v3112_v35 = vperm.slane %v5446_v2, 0  ;;  %v3405_v12 = vrot.slane %v3403_v44, 4 }
 0x2ff   : > { %2087 = vmatpush.msra.mxu0 %v2022_v61  ;;  %2111 = vmatpush.msra.mxu1 %v2007_v20  ;;  %v3406_v43 = vsel %vm282_vm0, %v3400_v0, %v3404_v45  ;;  %v2987_v61 = vperm.slane %v5402_v16, 2  ;;  %v2990_v20 = vrot.slane %v2988_v30, 4  ;;  %v3116_v33 = vrot.slane %v3113_v42, 4 }
 0x300   : > { %2112 = vmatmul.f32.vlgmr.msra.gmra.mxu1 %v5308_v47  ;;  %v3240_v16 = vperm.slane %v4104_v49, 1  ;;  %v3407_v14 = vsel %vm282_vm0, %v3402_v55, %v3405_v12  ;;  %v3591_v0 = vperm.slane %v4110_v34, 1  ;;  %v3720_v45 = vperm.slane %v4112_v10, 3 }
 0x301   : > { %2088 = vmatpush.msra.mxu0 %v2018_v38  ;;  %3930 = vmatpush.msrb.mxu1 %v5320_v5  ;;  %v2992_v9 = vsel %vm282_vm0, %v2987_v61, %v2990_v20  ;;  %v3467_v38 = vrot.slane %v3464_v46, 4  ;;  %v3118_v8 = vsel %vm282_vm0, %v3112_v35, %v3116_v33  ;;  %v3465_v30 = vperm.slane %v5497_v53, 2 }
 0x302   : > { %3059 = vrot.lane.b32.xlu2 %v3056_v27, %s6823_s14  ;;  %v3243_v19 = vrot.slane %v3240_v16, 4  ;;  %v3594_v61 = vrot.slane %v3591_v0, 4  ;;  %v3719_v20 = vperm.slane %v4112_v10, 2  ;;  %v3722_v46 = vrot.slane %v3720_v45, 4 }
 0x303   : > { %2089 = vmatpush.msra.mxu0 %v2014_v52  ;;  %3931 = vmatpush.msrb.mxu1 %v5320_v5  ;;  %v5518_v52 = vld [vmem:[%s6686_s1 + $0x46] ss:$8 sm:$0xf] }
 0x304   : > { %v3528_v51 = vperm.slane %v5518_v52, 1  ;;  %v3245_v27 = vsel %vm282_vm0, %v3239_v11, %v3243_v19  ;;  %v3724_v33 = vsel %vm282_vm0, %v3719_v20, %v3722_v46 }
 0x305   : > { %2090 = vmatpush.msra.mxu0 %v2010_v40  ;;  %v4106_v40 = vld [vmem:[%s6686_s1 + $0x43] ss:$8 sm:$0xf] }
 0x306   : > { %2739 = vrot.lane.b32.xlu0 %v2737_v24, %s6822_s23  ;;  %2678 = vrot.lane.b32.xlu1 %v2675_v32, %s4183_s24  ;;  %v3469_v24 = vsel %vm282_vm0, %v3463_v31, %v3467_v38  ;;  %v3527_v32 = vperm.slane %v5518_v52, 0  ;;  %v3531_v58 = vrot.slane %v3528_v51, 4  ;;  %v3337_v48 = vperm.slane %v4106_v40, 1  ;;  %v4113_v51 = vld [vmem:[%s6686_s1 + $0x62] ss:$8 sm:$0xf] }
 0x307   : > { %2091 = vmatpush.msra.mxu0 %v2006_v25  ;;  %v3336_v21 = vperm.slane %v4106_v40, 0  ;;  %v3338_v28 = vperm.slane %v4106_v40, 2  ;;  %v3782_v19 = vperm.slane %v4113_v51, 1 }
 0x308   : > { %2092 = vmatmul.f32.vlgmr.msra.gmra.mxu0 %v5308_v47  ;;  %v5465_v47 = vld [vmem:[%s6686_s1 + $0x40] ss:$8 sm:$0xf]  ;;  %v3533_v57 = vsel %vm282_vm0, %v3527_v32, %v3531_v58  ;;  %v3340_v37 = vrot.slane %v3337_v48, 4  ;;  %v3784_v48 = vperm.slane %v4113_v51, 3 }
 0x309   : > { %3910 = vmatpush.msrb.mxu0 %v5320_v5  ;;  %v3179_v4 = vperm.slane %v5465_v47, 3  ;;  %v3178_v3 = vperm.slane %v5465_v47, 2  ;;  %v3177_v23 = vperm.slane %v5465_v47, 1  ;;  %v3176_v2 = vperm.slane %v5465_v47, 0 }
 0x30a   : > { %3122 = vrot.lane.b32.xlu2 %v3119_v36, %s6825_s29  ;;  %v3241_v47 = vperm.slane %v4104_v49, 2  ;;  %v3342_v36 = vsel %vm282_vm0, %v3336_v21, %v3340_v37 }
 0x30b   : > { %3911 = vmatpush.msrb.mxu0 %v5320_v5  ;;  %v2797_v5 = vperm.slane %v4097_v62, 2  ;;  %v3181_v26 = vrot.slane %v3179_v4, 4  ;;  %v5513_v62 = vpop.permute.xlu2 %2233  ;;  %v3180_v25 = vrot.slane %v3177_v23, 4  ;;  %v4111_v4 = vld [vmem:[%s6686_s1 + $0x60] ss:$8 sm:$0xf] }
 0x30c   : > { %v3654_v31 = vperm.slane %v4111_v4, 0  ;;  %v3529_v23 = vperm.slane %v5518_v52, 2 }
 0x30d   : > { %v2802_v13 = vsel %vm282_vm0, %v2797_v5, %v2800_v54  ;;  %v3183_v60 = vsel %vm282_vm0, %v3178_v3, %v3181_v26  ;;  %v3246_v54 = vsel %vm282_vm0, %v3241_v47, %v3244_v39  ;;  %v3339_v3 = vperm.slane %v4106_v40, 3 }
 0x30e   : > { %2803 = vrot.lane.b32.xlu0 %v2801_v17, %s6824_s9  ;;  %2741 = vrot.lane.b32.xlu1 %v2738_v29, %s6822_s23  ;;  %v3182_v17 = vsel %vm282_vm0, %v3176_v2, %v3180_v25  ;;  %v3595_v29 = vrot.slane %v3593_v15, 4  ;;  %v3657_v26 = vperm.slane %v4111_v4, 3  ;;  %v3717_v25 = vperm.slane %v4112_v10, 0 }
 0x310   : > { %v3659_v1 = vrot.slane %v3657_v26, 4 }
 0x312   : > { %3186 = vrot.lane.b32.xlu2 %v3183_v60, %s6826_s28  ;;  %v3656_v60 = vperm.slane %v4111_v4, 2  ;;  %v2074_v39 = vpop.permute.xlu0 %2073 }
 0x316   : > { %2868 = vrot.lane.b32.xlu0 %v2865_v6, %s6819_s17  ;;  %2805 = vrot.lane.b32.xlu1 %v2802_v13, %s6824_s9  ;;  %v3597_v6 = vsel %vm282_vm0, %v3592_v7, %v3595_v29  ;;  %v3341_v13 = vrot.slane %v3339_v3, 4  ;;  %s6927_s17 = smov 48  }
 0x318   : > { %v3343_v41 = vsel %vm282_vm0, %v3338_v28, %v3341_v13 }
 0x319   : > { %v5536_v63 = vpop.permute.xlu2 %2295 }
 0x31a   : > { %3408 = vrot.lane.b32.xlu2 %v3406_v43, %s4177_s20  ;;  %v3590_v43 = vperm.slane %v4110_v34, 0 }
 0x31c   : > { %v3596_v35 = vsel %vm282_vm0, %v3590_v43, %v3594_v61 }
 0x31e   : > { %2932 = vrot.lane.b32.xlu0 %v2929_v22, %s6820_s26  ;;  %3057 = vrot.lane.b32.xlu1 %v3055_v56, %s6823_s14  ;;  %s6827_s26 = smov 82   ;;  %v3661_v22 = vsel %vm282_vm0, %v3656_v60, %v3659_v1  ;;  %v3466_v56 = vperm.slane %v5497_v53, 3  ;;  %v3655_v53 = vperm.slane %v4111_v4, 1  ;;  %s6940_s14 = smov 46  }
 0x320   : > { %v3468_v42 = vrot.slane %v3466_v56, 4  ;;  %v3658_v38 = vrot.slane %v3655_v53, 4 }
 0x322   : > { %3471 = vrot.lane.b32.xlu2 %v3469_v24, %s4172_s30  ;;  %v3470_v49 = vsel %vm282_vm0, %v3465_v30, %v3468_v42  ;;  %v3660_v16 = vsel %vm282_vm0, %v3654_v31, %v3658_v38  ;;  %v3718_v24 = vperm.slane %v4112_v10, 1 }
 0x324   : > { %v3721_v32 = vrot.slane %v3718_v24, 4 }
 0x326   : > { %2995 = vrot.lane.b32.xlu0 %v2992_v9, %s6821_s11  ;;  %3120 = vrot.lane.b32.xlu1 %v3118_v8, %s6825_s29  ;;  %v3530_v8 = vperm.slane %v5518_v52, 3  ;;  %v3781_v52 = vperm.slane %v4113_v51, 0  ;;  %v3723_v34 = vsel %vm282_vm0, %v3717_v25, %v3721_v32  ;;  %s6922_s29 = smov 54  }
 0x328   : > { %v3532_v11 = vrot.slane %v3530_v8, 4 }
 0x32a   : > { %3535 = vrot.lane.b32.xlu2 %v3533_v57, %s4175_s16  ;;  %v5548_v5 = vpop.permute.xlu2 %2424  ;;  %v3534_v58 = vsel %vm282_vm0, %v3529_v23, %v3532_v11  ;;  %v3786_v57 = vrot.slane %v3784_v48, 4 }
 0x32e   : > { %3247 = vrot.lane.b32.xlu0 %v3245_v27, %s6827_s26  ;;  %3184 = vrot.lane.b32.xlu1 %v3182_v17, %s6826_s28  ;;  %v3785_v27 = vrot.slane %v3782_v19, 4  ;;  %v3783_v17 = vperm.slane %v4113_v51, 2  ;;  %s6928_s28 = smov 47  }
 0x330   : > { %v3787_v50 = vsel %vm282_vm0, %v3781_v52, %v3785_v27  ;;  %v3788_v37 = vsel %vm282_vm0, %v3783_v17, %v3786_v57 }
 0x332   : > { %3600 = vrot.lane.b32.xlu2 %v3597_v6, %s4180_s8  ;;  %v5561_v59 = vpop.permute.xlu2 %2485 }
 0x336   : > { %3344 = vrot.lane.b32.xlu0 %v3342_v36, %s4173_s10  ;;  %3249 = vrot.lane.b32.xlu1 %v3246_v54, %s6827_s26  ;;  %s6918_s26 = smov 55  }
 0x33a   : > { %3664 = vrot.lane.b32.xlu2 %v3661_v22, %s4176_s19  ;;  %v5573_v9 = vpop.permute.xlu2 %2614 }
 0x33c   : > { %v5586_v2 = vpop.permute.xlu1 %2231 }
 0x33e   : > { %3410 = vrot.lane.b32.xlu0 %v3407_v14, %s4177_s20  ;;  %3346 = vrot.lane.b32.xlu1 %v3343_v41, %s4173_s10  ;;  %s6854_s20 = smov 118  }
 0x342   : > { %3727 = vrot.lane.b32.xlu2 %v3724_v33, %s4178_s27 }
 0x343   : > { %v5584_v40 = vpop.permute.xlu2 %2866 }
 0x346   : > { %3473 = vrot.lane.b32.xlu0 %v3470_v49, %s4172_s30  ;;  %3598 = vrot.lane.b32.xlu1 %v3596_v35, %s4180_s8  ;;  %s6868_s8 = smov 111   ;;  %s4117_s30 = sshll.u32 %s7009_s22, 5 }
 0x34b   : > { %v5595_v21 = vpop.permute.xlu2 %2930 }
 0x34e   : > { %3662 = vrot.lane.b32.xlu1 %v3660_v16, %s4176_s19  ;;  %3537 = vrot.lane.b32.xlu0 %v3534_v58, %s4175_s16  ;;  %v5610_v28 = vpop.permute.xlu0 %2297  ;;  %s251_s19 = scalar_lea.vmem %s6691_s6, %s4117_s30 }
 0x354   : > { %v5602_v36 = vpop.permute.xlu2 %2993 }
 0x356   : > { %3725 = vrot.lane.b32.xlu1 %v3723_v34, %s4178_s27  ;;  %3789 = vrot.lane.b32.xlu0 %v3787_v50, %s4183_s24  ;;  %s6861_s27 = smov 112  }
 0x358   : > { %v5593_v15 = vpop.permute.xlu1 %2360  ;;  %v5618_v10 = vpop.permute.xlu0 %2358 }
 0x35b   : > { %v2153_v47 = vpop.f32.mrf.mxu3 }
 0x35c   : > { %v2154_v29 = vadd.f32 %v2153_v47, %v2074_v39  ;;  %v5608_v12 = vpop.permute.xlu2 %3059 }
 0x35e   : > { %3791 = vrot.lane.b32.xlu1 %v3788_v37, %s4183_s24  ;;  %v2159_v44 = vmax.f32 %v2154_v29, 0.0  ;;  %s6872_s24 = smov 110  }
 0x360   : > { %v5600_v7 = vpop.permute.xlu1 %2422  ;;  %v2167_v54 = vrot.slane %v2159_v44, 4  ;;  %v5624_v43 = vpop.permute.xlu0 %2487 }
 0x364   : > { %v5614_v60 = vpop.permute.xlu2 %3122 }
 0x368   : > { %v5604_v3 = vpop.permute.xlu1 %2551  ;;  %v5632_v35 = vpop.permute.xlu0 %2549 }
 0x36b   : > { %v2133_v4 = vpop.f32.mrf.mxu2 }
 0x36c   : > { %v2134_v6 = vadd.f32 %v2133_v4, %v2074_v39  ;;  %v5622_v30 = vpop.permute.xlu2 %3186 }
 0x36e   : > { %v2158_v26 = vmax.f32 %v2134_v6, 0.0 }
 0x370   : > { %v2169_v55 = vsel %vm282_vm0, %v2158_v26, %v2167_v54  ;;  %v5612_v13 = vpop.permute.xlu1 %2612  ;;  %v5638_v31 = vpop.permute.xlu0 %2676 }
 0x371   : > { %2172 = vrot.lane.b32.xlu2 %v2169_v55, %s6821_s11 }
 0x374   : > { %v5630_v49 = vpop.permute.xlu2 %3408 }
 0x375   : > { %6828 = vst [vmem:[#allocation5_spill] sm:$0xff] %v5630_v49  ;;  %v6779_v49 = vrot.slane %v5604_v3, 4 }
 0x378   : > { %v5616_v1 = vpop.permute.xlu1 %2678  ;;  %v5646_v23 = vpop.permute.xlu0 %2739 }
 0x37c   : > { %v5636_v53 = vpop.permute.xlu2 %3471 }
 0x37d   : > { %v2113_v14 = vpop.f32.mrf.mxu1  ;;  %6829 = vst [vmem:[#allocation6_spill] sm:$0xff] %v5636_v53 }
 0x37e   : > { %v2114_v41 = vadd.f32 %v2113_v14, %v2074_v39 }
 0x380   : > { %v2157_v22 = vmax.f32 %v2114_v41, 0.0  ;;  %v5620_v0 = vpop.permute.xlu1 %2741  ;;  %v5652_v11 = vpop.permute.xlu0 %2803 }
 0x382   : > { %v2166_v56 = vrot.slane %v2157_v22, 4  ;;  %v6765_v22 = vrot.slane %v5513_v62, 4 }
 0x384   : > { %v5642_v16 = vpop.permute.xlu2 %3535 }
 0x385   : > { %v2093_v45 = vpop.f32.mrf.mxu0  ;;  %6830 = vst [vmem:[#allocation7_spill] sm:$0xff] %v5642_v16 }
 0x386   : > { %v2094_v42 = vadd.f32 %v2093_v45, %v2074_v39 }
 0x388   : > { %v2156_v61 = vmax.f32 %v2094_v42, 0.0  ;;  %v5628_v46 = vpop.permute.xlu1 %2805  ;;  %v5658_v32 = vpop.permute.xlu0 %2868 }
 0x38a   : > { %v2168_v20 = vsel %vm282_vm0, %v2156_v61, %v2166_v56 }
 0x38b   : > { %2170 = vrot.lane.b32.xlu1 %v2168_v20, %s6821_s11  ;;  %v6764_v20 = vrot.slane %v5610_v28, 4  ;;  %s6886_s11 = smov 63  }
 0x38c   : > { %v5648_v24 = vpop.permute.xlu2 %3600 }
 0x38d   : > { %v6762_v58 = vrot.slane %v5648_v24, 4 }
 0x390   : > { %v5634_v33 = vpop.permute.xlu1 %3057  ;;  %v5675_v17 = vpop.permute.xlu0 %2932 }
 0x394   : > { %v5654_v19 = vpop.permute.xlu2 %3664 }
 0x395   : > { %v6761_v57 = vrot.slane %v5654_v19, 4 }
 0x398   : > { %v5640_v38 = vpop.permute.xlu1 %3120  ;;  %v5690_v54 = vpop.permute.xlu0 %2995 }
 0x39c   : > { %v5664_v34 = vpop.permute.xlu2 %3727 }
 0x39d   : > { %6832 = vst [vmem:[#allocation9_spill] sm:$0xff] %v5664_v34  ;;  %v6760_v6 = vrot.slane %v5664_v34, 4 }
 0x3a0   : > { %v5644_v8 = vpop.permute.xlu1 %3184  ;;  %v5707_v56 = vpop.permute.xlu0 %3247 }
 0x3a8   : > { %v5650_v51 = vpop.permute.xlu1 %3249 }
 0x3b0   : > { %v5656_v25 = vpop.permute.xlu1 %3346 }
 0x3b8   : > { %v5661_v52 = vpop.permute.xlu1 %3598 }
 0x3b9   : > { %6831 = vst [vmem:[#allocation8_spill] sm:$0xff] %v5661_v52  ;;  %v6759_v27 = vrot.slane %v5661_v52, 4 }
 0x3bb   : > { %v3605_v48 = vsel %vm282_vm0, %v6759_v27, %v6762_v58 }
 0x3bc   : > { %v5673_v50 = vsel %vm612_vm12, %v3605_v48, %v5648_v24 }
 0x3bd   : > { %6833 = vst [vmem:[#allocation10_spill] sm:$0xff] %v5673_v50 }
 0x3c0   : > { %v5678_v37 = vpop.permute.xlu1 %3662 }
 0x3c1   : > { %6834 = vst [vmem:[#allocation11_spill] sm:$0xff] %v5678_v37  ;;  %v6758_v47 = vrot.slane %v5678_v37, 4 }
 0x3c3   : > { %v3669_v39 = vsel %vm282_vm0, %v6758_v47, %v6761_v57  ;;  %v6763_v47 = vrot.slane %v5593_v15, 4 }
 0x3c4   : > { %v5688_v44 = vsel %vm679_vm13, %v3669_v39, %v5654_v19  ;;  %v5714_v39 = vpop.permute.xlu0 %3344 }
 0x3c5   : > { %6835 = vst [vmem:[#allocation12_spill] sm:$0xff] %v5688_v44  ;;  %v6778_v44 = vrot.slane %v5650_v51, 4 }
 0x3c8   : > { %v5694_v26 = vpop.permute.xlu1 %3725 }
 0x3c9   : > { %6837 = vst [vmem:[#allocation13_spill] sm:$0xff] %v5694_v26  ;;  %v6757_v55 = vrot.slane %v5694_v26, 4 }
 0x3cb   : > { %v2173_v29 = vpop.permute.xlu2 %2172  ;;  %v3732_v14 = vsel %vm282_vm0, %v6757_v55, %v6760_v6 }
 0x3cc   : > { %v2175_v4 = vrot.slane %v2173_v29, 4  ;;  %v5704_v41 = vsel %vm745_vm14, %v3732_v14, %v5664_v34 }
 0x3ce   : > { %2184 = vst.msk [vmem:[#allocation3 + $0x10] sm:$0xf] %vm6836_vm4, %v2175_v4 }
 0x3d5   : > { %v2220_v45 = vld [vmem:[#allocation3 + $0x10] sm:$0xf] }
 0x3d6   : > { %v2245_v42 = vmul.f32 %v6765_v22, %v2220_v45  ;;  %v2284_v61 = vld [vmem:[#allocation3 + $0x10] sm:$0xf] }
 0x3d7   : > { %v2309_v48 = vmul.f32 %v6764_v20, %v2284_v61  ;;  %v2347_v14 = vld [vmem:[#allocation3 + $0x10] sm:$0xf]  ;;  %v6766_v61 = vrot.slane %v5548_v5, 4 }
 0x3d8   : > { %2254 = vst [vmem:[#allocation1 + $0x21] ss:$2 sm:$0xff] %v2245_v42  ;;  %v2372_v27 = vmul.f32 %v6763_v47, %v2347_v14  ;;  %v5720_v42 = vpop.permute.xlu0 %3410  ;;  %v2411_v6 = vld [vmem:[#allocation3 + $0x10] sm:$0xf]  ;;  %v5733_v47 = vpop.permute.xlu1 %3791 }
 0x3d9   : > { %v2436_v57 = vmul.f32 %v6766_v61, %v2411_v6  ;;  %v2474_v58 = vld [vmem:[#allocation3 + $0x10] sm:$0xf] }
 0x3da   : > { %v2538_v37 = vld [vmem:[#allocation3 + $0x10] sm:$0xf] }
 0x3df   : > { %v2259_v55 = vld.sshfl [vmem:[#allocation1 + $0x20] sm:$0xff pattern:$0x75316420] }
 0x3e0   : > { %2268 = vrot.lane.b32.xlu1 %v2259_v55, %s4189_s12  ;;  %2317 = vst [vmem:[#allocation1 + $0x20] ss:$2 sm:$0xff] %v2309_v48  ;;  %v2187_v48 = vld [vmem:[%s6686_s1] ss:$8 sm:$0xf]  ;;  %v5731_v14 = vpop.permute.xlu0 %3473 }
 0x3e1   : > { %v2191_v6 = vperm.slane %v2187_v48, 2  ;;  %v2190_v52 = vperm.slane %v2187_v48, 1 }
 0x3e3   : > { %v2193_v34 = vrot.slane %v2190_v52, 4  ;;  %v6842_v52 = vrot.slane %v5513_v62, 4 }
 0x3e7   : > { %v2322_v45 = vld.sshfl [vmem:[#allocation1 + $0x20] sm:$0xff pattern:$0x75316420] }
 0x3e8   : > { %2331 = vrot.lane.b32.xlu2 %v2322_v45, %s4190_s13  ;;  %2381 = vst [vmem:[#allocation1 + $0x21] ss:$2 sm:$0xff] %v2372_v27  ;;  %v6776_v27 = vrot.slane %v5624_v43, 4  ;;  %v2192_v45 = vperm.slane %v2187_v48, 3  ;;  %v5742_v50 = vpop.permute.xlu0 %3537 }
 0x3ea   : > { %v2499_v20 = vmul.f32 %v6776_v27, %v2474_v58 }
 0x3ef   : > { %v5726_v55 = vld.sshfl [vmem:[#allocation1 + $0x20] sm:$0xff pattern:$0x75316420] }
 0x3f0   : > { %2444 = vst [vmem:[#allocation1 + $0x20] ss:$2 sm:$0xff] %v2436_v57  ;;  %v2194_v57 = vrot.slane %v2192_v45, 4  ;;  %v2563_v45 = vmul.f32 %v6779_v49, %v2538_v37  ;;  %v2235_v37 = vrot.slane %v5586_v2, 4 }
 0x3f2   : > { %v2196_v53 = vsel %vm282_vm0, %v2191_v6, %v2194_v57  ;;  %v6840_v6 = vrot.slane %v5707_v56, 4 }
 0x3f4   : > { %v3254_v57 = vsel %vm282_vm0, %v6840_v6, %v6778_v44 }
 0x3f5   : > { %v3255_v18 = vsel %vm1408_vm2, %v3254_v57, %v5650_v51 }
 0x3f7   : > { %v5738_v22 = vld.sshfl [vmem:[#allocation1 + $0x20] sm:$0xff pattern:$0x75316420] }
 0x3f8   : > { %2508 = vst [vmem:[#allocation1 + $0x21] ss:$2 sm:$0xff] %v2499_v20 }
 0x3fd   : > { %v2171_v61 = vpop.permute.xlu1 %2170 }
 0x3fe   : > { %v2174_v16 = vrot.slane %v2171_v61, 4 }
 0x3ff   : > { %v5755_v26 = vld.sshfl [vmem:[#allocation1 + $0x20] sm:$0xff pattern:$0x75316420] }
 0x400   : > { %v2176_v58 = vsel %vm6838_vm10, %v2174_v16, %v2171_v61  ;;  %v2177_v20 = vsel %vm282_vm0, %v2174_v16, %v2175_v4  ;;  %v2189_v61 = vperm.slane %v2187_v48, 0  ;;  %2571 = vst [vmem:[#allocation1 + $0x20] ss:$2 sm:$0xff] %v2563_v45  ;;  %v2238_v48 = vsel %vm282_vm0, %v2235_v37, %v6842_v52 }
 0x401   : > { %v5751_v27 = vsel %vm6839_vm3, %v2177_v20, %v2173_v29  ;;  %2182 = vst.msk [vmem:[#allocation3] sm:$0xff] %vm4425_vm7, %v2176_v58  ;;  %v5767_v29 = vpop.permute.xlu0 %3789  ;;  %v2239_v57 = vsel %vm346_vm8, %v2238_v48, %v5513_v62  ;;  %vm6846_vm7 = vcmask 64512   ;;  %vm6849_vm10 = vcmask 72704  }
 0x402   : > { %2183 = vst [vmem:[#allocation3 + $0x8] sm:$0xff] %v5751_v27  ;;  %v2200_v16 = vmul.f32 %v2196_v53, %v5751_v27  ;;  %v2195_v4 = vsel %vm282_vm0, %v2189_v61, %v2193_v34  ;;  %v5771_v58 = vmul.f32 %v3255_v18, %v5751_v27  ;;  %v6782_v53 = vrot.slane %v5733_v47, 4  ;;  %vm6847_vm4 = vmmov %vm6846_vm7 }
 0x403   : > { %6841 = vst [vmem:[#allocation14_spill] sm:$0xff] %v5767_v29  ;;  %v6781_v45 = vrot.slane %v5767_v29, 4  ;;  %v6780_v61 = vrot.slane %v5573_v9, 4  ;;  %v2244_v18 = vmul.f32 %v2239_v57, %v5751_v27  ;;  %vm6851_vm3 = vmmov %vm6849_vm10 }
 0x404   : > { %2205 = vst [vmem:[#allocation1 + $0x10] ss:$2 sm:$0xff] %v2200_v16  ;;  %v2601_v16 = vld [vmem:[#allocation3 + $0x10] sm:$0xf] }
 0x405   : > { %v2626_v49 = vmul.f32 %v6780_v61, %v2601_v16  ;;  %v3796_v62 = vsel %vm282_vm0, %v6781_v45, %v6782_v53  ;;  %v2237_v16 = vsel %vm346_vm8, %v2235_v37, %v5586_v2  ;;  %v2665_v61 = vld [vmem:[#allocation3 + $0x10] sm:$0xf]  ;;  %v6787_v2 = vrot.slane %v5616_v1, 4 }
 0x406   : > { %v2362_v37 = vrot.slane %v5618_v10, 4 }
 0x407   : > { %v5783_v34 = vld.sshfl [vmem:[#allocation1 + $0x20] sm:$0xff pattern:$0x75316420] }
 0x408   : > { %v5776_v20 = vld [vmem:[#allocation3] sm:$0xff]  ;;  %2635 = vst [vmem:[#allocation1 + $0x21] ss:$2 sm:$0xff] %v2626_v49 }
 0x409   : > { %v2199_v6 = vmul.f32 %v2195_v4, %v5776_v20  ;;  %v2299_v4 = vrot.slane %v5536_v63, 4  ;;  %v5795_v48 = vld [vmem:[#allocation3 + $0xc] sm:$0xff]  ;;  %v2243_v45 = vmul.f32 %v2237_v16, %v5776_v20 }
 0x40b   : > { %2203 = vst [vmem:[#allocation1] ss:$2 sm:$0xff] %v2199_v6  ;;  %v2208_v52 = vld.sshfl [vmem:[#allocation1 + $0x10] sm:$0xff pattern:$0x75316420]  ;;  %v6843_v6 = vrot.slane %v5610_v28, 4 }
 0x40c   : > { %v2209_v44 = vld.sshfl [vmem:[#allocation1 + $0x18] sm:$0xff pattern:$0x75316420]  ;;  %2216 = vst [vmem:[#allocation4 + $0xa8] sm:$0xf] %v2208_v52  ;;  %v3797_v52 = vsel %vm812_vm15, %v3796_v62, %v5733_v47 }
 0x40d   : > { %2252 = vst [vmem:[#allocation1 + $0x11] ss:$2 sm:$0xff] %v2244_v18  ;;  %v2302_v57 = vsel %vm282_vm0, %v2299_v4, %v6843_v6  ;;  %v5807_v18 = vmul.f32 %v5704_v41, %v5795_v48  ;;  %v2690_v41 = vmul.f32 %v6787_v2, %v2665_v61 }
 0x40e   : > { %2217 = vst [vmem:[#allocation4] sm:$0xf] %v2209_v44  ;;  %v5810_v44 = vmul.f32 %v3797_v52, %v5795_v48  ;;  %v2303_v6 = vsel %vm413_vm9, %v2302_v57, %v5610_v28  ;;  %v2301_v28 = vsel %vm413_vm9, %v2299_v4, %v5536_v63 }
 0x40f   : > { %v2308_v62 = vmul.f32 %v2303_v6, %v5751_v27  ;;  %v2307_v6 = vmul.f32 %v2301_v28, %v5776_v20  ;;  %v2364_v28 = vsel %vm6847_vm4, %v2362_v37, %v5618_v10  ;;  %v6786_v10 = vrot.slane %v5628_v46, 4 }
 0x410   : > { %6844 = vst [vmem:[#allocation15_spill] sm:$0xff] %v5810_v44  ;;  %v5820_v44 = vld.sshfl [vmem:[#allocation1 + $0x20] sm:$0xff pattern:$0x75316420] }
 0x411   : > { %2698 = vst [vmem:[#allocation1 + $0x20] ss:$2 sm:$0xff] %v2690_v41 }
 0x412   : > { %v2206_v49 = vld.sshfl [vmem:[#allocation1] sm:$0xff pattern:$0x75316420]  ;;  %v2207_v53 = vld.sshfl [vmem:[#allocation1 + $0x8] sm:$0xff pattern:$0x75316420] }
 0x413   : > { %2250 = vst [vmem:[#allocation1 + $0x1] ss:$2 sm:$0xff] %v2243_v45  ;;  %v6845_v45 = vrot.slane %v5593_v15, 4 }
 0x414   : > { %2214 = vst [vmem:[#allocation4 + $0xc0] sm:$0xf] %v2206_v49  ;;  %v2257_v16 = vld.sshfl [vmem:[#allocation1 + $0x10] sm:$0xff pattern:$0x75316420] }
 0x415   : > { %2215 = vst [vmem:[#allocation4 + $0xf0] sm:$0xf] %v2207_v53  ;;  %2264 = vrot.lane.b32.xlu2 %v2257_v16, %s4189_s12  ;;  %v2258_v52 = vld.sshfl [vmem:[#allocation1 + $0x18] sm:$0xff pattern:$0x75316420]  ;;  %v2365_v57 = vsel %vm282_vm0, %v2362_v37, %v6845_v45  ;;  %v2426_v45 = vrot.slane %v5600_v7, 4 }
 0x416   : > { %2315 = vst [vmem:[#allocation1 + $0x10] ss:$2 sm:$0xff] %v2308_v62  ;;  %v2728_v49 = vld [vmem:[#allocation3 + $0x10] sm:$0xf]  ;;  %v2366_v53 = vsel %vm6846_vm7, %v2365_v57, %v5593_v15  ;;  %v6785_v62 = vrot.slane %v5620_v0, 4  ;;  %vm6857_vm7 = vcmask 523264  }
 0x417   : > { %v2371_v63 = vmul.f32 %v2366_v53, %v5751_v27  ;;  %vm6858_vm4 = vmmov %vm6857_vm7 }
 0x418   : > { %v2753_v4 = vmul.f32 %v6785_v62, %v2728_v49  ;;  %v5839_v15 = vld.sshfl [vmem:[#allocation1 + $0x20] sm:$0xff pattern:$0x75316420] }
 0x41a   : > { %v2256_v29 = vld.sshfl [vmem:[#allocation1 + $0x8] sm:$0xff pattern:$0x75316420]  ;;  %v2255_v61 = vld.sshfl [vmem:[#allocation1] sm:$0xff pattern:$0x75316420] }
 0x41b   : > { %2262 = vrot.lane.b32.xlu1 %v2256_v29, %s4189_s12  ;;  %2260 = vrot.lane.b32.xlu0 %v2255_v61, %s4189_s12  ;;  %2313 = vst [vmem:[#allocation1] ss:$2 sm:$0xff] %v2307_v6  ;;  %v6848_v29 = vrot.slane %v5548_v5, 4  ;;  %v2792_v6 = vld [vmem:[#allocation3 + $0x10] sm:$0xf]  ;;  %v2370_v61 = vmul.f32 %v2364_v28, %v5776_v20 }
 0x41c   : > { %2762 = vst [vmem:[#allocation1 + $0x21] ss:$2 sm:$0xff] %v2753_v4 }
 0x41d   : > { %v2321_v16 = vld.sshfl [vmem:[#allocation1 + $0x18] sm:$0xff pattern:$0x75316420]  ;;  %v2320_v41 = vld.sshfl [vmem:[#allocation1 + $0x10] sm:$0xff pattern:$0x75316420]  ;;  %v2429_v57 = vsel %vm282_vm0, %v2426_v45, %v6848_v29 }
 0x41e   : > { %2379 = vst [vmem:[#allocation1 + $0x11] ss:$2 sm:$0xff] %v2371_v63  ;;  %v2430_v62 = vsel %vm6849_vm10, %v2429_v57, %v5548_v5  ;;  %v2817_v63 = vmul.f32 %v6786_v10, %v2792_v6  ;;  %v2489_v29 = vrot.slane %v5561_v59, 4  ;;  %vm6860_vm10 = vcmask 531456  }
 0x41f   : > { %v2435_v37 = vmul.f32 %v2430_v62, %v5751_v27  ;;  %v2428_v62 = vsel %vm6851_vm3, %v2426_v45, %v5600_v7  ;;  %vm6862_vm3 = vmmov %vm6860_vm10 }
 0x422   : > { %v2318_v53 = vld.sshfl [vmem:[#allocation1] sm:$0xff pattern:$0x75316420]  ;;  %v2319_v49 = vld.sshfl [vmem:[#allocation1 + $0x8] sm:$0xff pattern:$0x75316420] }
 0x423   : > { %2266 = vrot.lane.b32.xlu0 %v2258_v52, %s4189_s12  ;;  %2323 = vrot.lane.b32.xlu1 %v2318_v53, %s4190_s13  ;;  %2377 = vst [vmem:[#allocation1 + $0x1] ss:$2 sm:$0xff] %v2370_v61  ;;  %v5855_v5 = vld.sshfl [vmem:[#allocation1 + $0x20] sm:$0xff pattern:$0x75316420]  ;;  %v6850_v52 = vrot.slane %v5624_v43, 4  ;;  %v2434_v53 = vmul.f32 %v2428_v62, %v5776_v20 }
 0x424   : > { %2325 = vrot.lane.b32.xlu2 %v2319_v49, %s4190_s13  ;;  %2825 = vst [vmem:[#allocation1 + $0x20] ss:$2 sm:$0xff] %v2817_v63  ;;  %v2855_v61 = vld [vmem:[#allocation3 + $0x10] sm:$0xf]  ;;  %v2553_v63 = vrot.slane %v5632_v35, 4 }
 0x425   : > { %v2385_v4 = vld.sshfl [vmem:[#allocation1 + $0x18] sm:$0xff pattern:$0x75316420]  ;;  %v2384_v28 = vld.sshfl [vmem:[#allocation1 + $0x10] sm:$0xff pattern:$0x75316420]  ;;  %v2492_v57 = vsel %vm282_vm0, %v2489_v29, %v6850_v52 }
 0x426   : > { %2442 = vst [vmem:[#allocation1 + $0x10] ss:$2 sm:$0xff] %v2435_v37  ;;  %v2493_v10 = vsel %vm612_vm12, %v2492_v57, %v5624_v43  ;;  %v2871_v37 = vrot.slane %v5658_v32, 4 }
 0x427   : > { %v2498_v7 = vmul.f32 %v2493_v10, %v5751_v27  ;;  %v2919_v10 = vld [vmem:[#allocation3 + $0x10] sm:$0xf] }
 0x428   : > { %v2880_v45 = vmul.f32 %v2871_v37, %v2855_v61 }
 0x42a   : > { %v2382_v49 = vld.sshfl [vmem:[#allocation1] sm:$0xff pattern:$0x75316420]  ;;  %v2383_v6 = vld.sshfl [vmem:[#allocation1 + $0x8] sm:$0xff pattern:$0x75316420] }
 0x42b   : > { %2395 = vrot.lane.b32.xlu0 %v5726_v55, %s4191_s18  ;;  %2329 = vrot.lane.b32.xlu1 %v2321_v16, %s4190_s13  ;;  %2440 = vst [vmem:[#allocation1] ss:$2 sm:$0xff] %v2434_v53  ;;  %v5876_v43 = vld.sshfl [vmem:[#allocation1 + $0x20] sm:$0xff pattern:$0x75316420]  ;;  %v2491_v55 = vsel %vm612_vm12, %v2489_v29, %v5561_v59  ;;  %v6852_v16 = vrot.slane %v5604_v3, 4 }
 0x42c   : > { %2387 = vrot.lane.b32.xlu2 %v2382_v49, %s4191_s18  ;;  %2889 = vst [vmem:[#allocation1 + $0x21] ss:$2 sm:$0xff] %v2880_v45  ;;  %v2497_v53 = vmul.f32 %v2491_v55, %v5776_v20 }
 0x42d   : > { %v2447_v52 = vld.sshfl [vmem:[#allocation1 + $0x10] sm:$0xff pattern:$0x75316420]  ;;  %v5874_v62 = vld.sshfl [vmem:[#allocation1 + $0x18] sm:$0xff pattern:$0x75316420]  ;;  %v2556_v57 = vsel %vm282_vm0, %v2553_v63, %v6852_v16 }
 0x42e   : > { %2506 = vst [vmem:[#allocation1 + $0x11] ss:$2 sm:$0xff] %v2498_v7  ;;  %v2557_v61 = vsel %vm679_vm13, %v2556_v57, %v5604_v3  ;;  %v6788_v7 = vrot.slane %v5675_v17, 4  ;;  %v2555_v3 = vsel %vm679_vm13, %v2553_v63, %v5632_v35  ;;  %v2616_v16 = vrot.slane %v5612_v13, 4  ;;  %v2982_v57 = vld [vmem:[#allocation3 + $0x10] sm:$0xf] }
 0x42f   : > { %v2562_v59 = vmul.f32 %v2557_v61, %v5751_v27  ;;  %v6789_v35 = vrot.slane %v5690_v54, 4  ;;  %v2680_v63 = vrot.slane %v5638_v31, 4 }
 0x430   : > { %v2944_v29 = vmul.f32 %v6788_v7, %v2919_v10  ;;  %v2561_v10 = vmul.f32 %v2555_v3, %v5776_v20 }
 0x432   : > { %v2446_v49 = vld.sshfl [vmem:[#allocation1 + $0x8] sm:$0xff pattern:$0x75316420]  ;;  %v2445_v2 = vld.sshfl [vmem:[#allocation1] sm:$0xff pattern:$0x75316420] }
 0x433   : > { %2458 = vrot.lane.b32.xlu1 %v5738_v22, %s4192_s25  ;;  %2327 = vrot.lane.b32.xlu0 %v2320_v41, %s4190_s13  ;;  %2504 = vst [vmem:[#allocation1 + $0x1] ss:$2 sm:$0xff] %v2497_v53  ;;  %v5901_v22 = vld.sshfl [vmem:[#allocation1 + $0x20] sm:$0xff pattern:$0x75316420]  ;;  %v6853_v41 = vrot.slane %v5573_v9, 4 }
 0x434   : > { %2393 = vrot.lane.b32.xlu2 %v2385_v4, %s4191_s18  ;;  %2952 = vst [vmem:[#allocation1 + $0x20] ss:$2 sm:$0xff] %v2944_v29  ;;  %v3007_v29 = vmul.f32 %v6789_v35, %v2982_v57  ;;  %v6790_v35 = vrot.slane %v5608_v12, 4 }
 0x435   : > { %v5894_v45 = vld.sshfl [vmem:[#allocation1 + $0x10] sm:$0xff pattern:$0x75316420]  ;;  %v5896_v55 = vld.sshfl [vmem:[#allocation1 + $0x18] sm:$0xff pattern:$0x75316420]  ;;  %v2619_v4 = vsel %vm282_vm0, %v2616_v16, %v6853_v41 }
 0x436   : > { %2569 = vst [vmem:[#allocation1 + $0x10] ss:$2 sm:$0xff] %v2562_v59  ;;  %v2620_v7 = vsel %vm745_vm14, %v2619_v4, %v5573_v9  ;;  %v3046_v4 = vld [vmem:[#allocation3 + $0x10] sm:$0xf] }
 0x437   : > { %v2625_v59 = vmul.f32 %v2620_v7, %v5751_v27 }
 0x43a   : > { %v2509_v53 = vld.sshfl [vmem:[#allocation1] sm:$0xff pattern:$0x75316420]  ;;  %v2510_v61 = vld.sshfl [vmem:[#allocation1 + $0x8] sm:$0xff pattern:$0x75316420] }
 0x43b   : > { %2391 = vrot.lane.b32.xlu1 %v2384_v28, %s4191_s18  ;;  %2389 = vrot.lane.b32.xlu0 %v2383_v6, %s4191_s18  ;;  %2567 = vst [vmem:[#allocation1] ss:$2 sm:$0xff] %v2561_v10  ;;  %v5922_v41 = vld.sshfl [vmem:[#allocation1 + $0x20] sm:$0xff pattern:$0x75316420]  ;;  %v2618_v28 = vsel %vm745_vm14, %v2616_v16, %v5612_v13  ;;  %v6855_v6 = vrot.slane %v5616_v1, 4 }
 0x43c   : > { %2522 = vrot.lane.b32.xlu2 %v5755_v26, %s6854_s20  ;;  %3016 = vst [vmem:[#allocation1 + $0x21] ss:$2 sm:$0xff] %v3007_v29  ;;  %v2624_v26 = vmul.f32 %v2618_v28, %v5776_v20  ;;  %v2743_v13 = vrot.slane %v5646_v23, 4  ;;  %v3071_v29 = vmul.f32 %v6790_v35, %v3046_v4  ;;  %v6791_v35 = vrot.slane %v5614_v60, 4 }
 0x43d   : > { %v5918_v3 = vld.sshfl [vmem:[#allocation1 + $0x10] sm:$0xff pattern:$0x75316420]  ;;  %v5920_v9 = vld.sshfl [vmem:[#allocation1 + $0x18] sm:$0xff pattern:$0x75316420]  ;;  %v2683_v7 = vsel %vm282_vm0, %v2680_v63, %v6855_v6 }
 0x43e   : > { %2633 = vst [vmem:[#allocation1 + $0x11] ss:$2 sm:$0xff] %v2625_v59  ;;  %v2684_v59 = vsel %vm812_vm15, %v2683_v7, %v5616_v1  ;;  %v2682_v1 = vsel %vm812_vm15, %v2680_v63, %v5638_v31  ;;  %v2807_v63 = vrot.slane %v5652_v11, 4 }
 0x43f   : > { %v2689_v16 = vmul.f32 %v2684_v59, %v5751_v27 }
 0x442   : > { %v2572_v10 = vld.sshfl [vmem:[#allocation1] sm:$0xff pattern:$0x75316420]  ;;  %v5930_v57 = vld.sshfl [vmem:[#allocation1 + $0x8] sm:$0xff pattern:$0x75316420] }
 0x443   : > { %2452 = vrot.lane.b32.xlu1 %v2446_v49, %s4192_s25  ;;  %2450 = vrot.lane.b32.xlu0 %v2445_v2, %s4192_s25  ;;  %2631 = vst [vmem:[#allocation1 + $0x1] ss:$2 sm:$0xff] %v2624_v26  ;;  %v5948_v49 = vld.sshfl [vmem:[#allocation1 + $0x20] sm:$0xff pattern:$0x75316420]  ;;  %v6856_v2 = vrot.slane %v5620_v0, 4 }
 0x444   : > { %2454 = vrot.lane.b32.xlu2 %v2447_v52, %s4192_s25  ;;  %3079 = vst [vmem:[#allocation1 + $0x20] ss:$2 sm:$0xff] %v3071_v29  ;;  %v3109_v26 = vld [vmem:[#allocation3 + $0x10] sm:$0xf]  ;;  %v2688_v52 = vmul.f32 %v2682_v1, %v5776_v20 }
 0x445   : > { %v5942_v28 = vld.sshfl [vmem:[#allocation1 + $0x10] sm:$0xff pattern:$0x75316420]  ;;  %v5944_v6 = vld.sshfl [vmem:[#allocation1 + $0x18] sm:$0xff pattern:$0x75316420]  ;;  %v2746_v7 = vsel %vm282_vm0, %v2743_v13, %v6856_v2  ;;  %v3134_v29 = vmul.f32 %v6791_v35, %v3109_v26 }
 0x446   : > { %2696 = vst [vmem:[#allocation1 + $0x10] ss:$2 sm:$0xff] %v2689_v16  ;;  %v2747_v31 = vsel %vm6857_vm7, %v2746_v7, %v5620_v0  ;;  %v2745_v0 = vsel %vm6858_vm4, %v2743_v13, %v5646_v23  ;;  %v6795_v35 = vrot.slane %v5622_v30, 4  ;;  %vm6863_vm7 = vcmask 539648  }
 0x447   : > { %v2752_v16 = vmul.f32 %v2747_v31, %v5751_v27  ;;  %vm6865_vm4 = vmmov %vm6863_vm7 }
 0x44a   : > { %v5954_v59 = vld.sshfl [vmem:[#allocation1] sm:$0xff pattern:$0x75316420]  ;;  %v5956_v4 = vld.sshfl [vmem:[#allocation1 + $0x8] sm:$0xff pattern:$0x75316420] }
 0x44b   : > { %2456 = vrot.lane.b32.xlu0 %v5874_v62, %s4192_s25  ;;  %2514 = vrot.lane.b32.xlu1 %v2509_v53, %s6854_s20  ;;  %2694 = vst [vmem:[#allocation1] ss:$2 sm:$0xff] %v2688_v52  ;;  %v5975_v62 = vld.sshfl [vmem:[#allocation1 + $0x20] sm:$0xff pattern:$0x75316420]  ;;  %v6859_v53 = vrot.slane %v5628_v46, 4 }
 0x44c   : > { %2516 = vrot.lane.b32.xlu2 %v2510_v61, %s6854_s20  ;;  %3143 = vst [vmem:[#allocation1 + $0x21] ss:$2 sm:$0xff] %v3134_v29  ;;  %v3173_v52 = vld [vmem:[#allocation3 + $0x10] sm:$0xf]  ;;  %v2751_v61 = vmul.f32 %v2745_v0, %v5776_v20 }
 0x44d   : > { %v5969_v1 = vld.sshfl [vmem:[#allocation1 + $0x10] sm:$0xff pattern:$0x75316420]  ;;  %v5971_v2 = vld.sshfl [vmem:[#allocation1 + $0x18] sm:$0xff pattern:$0x75316420]  ;;  %v2810_v7 = vsel %vm282_vm0, %v2807_v63, %v6859_v53 }
 0x44e   : > { %2760 = vst [vmem:[#allocation1 + $0x11] ss:$2 sm:$0xff] %v2752_v16  ;;  %v2811_v23 = vsel %vm6860_vm10, %v2810_v7, %v5628_v46  ;;  %v3198_v16 = vmul.f32 %v6795_v35, %v3173_v52  ;;  %v2870_v46 = vrot.slane %v5584_v40, 4  ;;  %vm6867_vm10 = vcmask 588800  }
 0x44f   : > { %v2816_v13 = vmul.f32 %v2811_v23, %v5751_v27 }
 0x452   : > { %v5981_v31 = vld.sshfl [vmem:[#allocation1] sm:$0xff pattern:$0x75316420]  ;;  %v5983_v26 = vld.sshfl [vmem:[#allocation1 + $0x8] sm:$0xff pattern:$0x75316420] }
 0x453   : > { %2585 = vrot.lane.b32.xlu1 %v5783_v34, %s6861_s27  ;;  %2518 = vrot.lane.b32.xlu0 %v5894_v45, %s6854_s20  ;;  %2758 = vst [vmem:[#allocation1 + $0x1] ss:$2 sm:$0xff] %v2751_v61  ;;  %v2809_v34 = vsel %vm6862_vm3, %v2807_v63, %v5652_v11  ;;  %v6003_v53 = vld.sshfl [vmem:[#allocation1 + $0x20] sm:$0xff pattern:$0x75316420]  ;;  %v2873_v45 = vsel %vm282_vm0, %v2870_v46, %v2871_v37  ;;  %v6864_v37 = vrot.slane %v5650_v51, 4  ;;  %vm6869_vm3 = vmmov %vm6867_vm10 }
 0x454   : > { %2577 = vrot.lane.b32.xlu2 %v2572_v10, %s6861_s27  ;;  %3206 = vst [vmem:[#allocation1 + $0x20] ss:$2 sm:$0xff] %v3198_v16  ;;  %v3236_v10 = vld [vmem:[#allocation3 + $0x10] sm:$0xf]  ;;  %v2815_v7 = vmul.f32 %v2809_v34, %v5776_v20  ;;  %v2874_v23 = vsel %vm6863_vm7, %v2873_v45, %v5658_v32  ;;  %v2934_v32 = vrot.slane %v5595_v21, 4  ;;  %v6866_v34 = vrot.slane %v5675_v17, 4 }
 0x455   : > { %v5996_v29 = vld.sshfl [vmem:[#allocation1 + $0x18] sm:$0xff pattern:$0x75316420]  ;;  %v5998_v0 = vld.sshfl [vmem:[#allocation1 + $0x10] sm:$0xff pattern:$0x75316420]  ;;  %v2879_v11 = vmul.f32 %v2874_v23, %v5751_v27  ;;  %v3261_v63 = vmul.f32 %v6864_v37, %v3236_v10 }
 0x456   : > { %2823 = vst [vmem:[#allocation1 + $0x10] ss:$2 sm:$0xff] %v2816_v13  ;;  %v3333_v45 = vld [vmem:[#allocation3 + $0x14] sm:$0xf]  ;;  %vm6871_vm7 = vcmask 596992  }
 0x45a   : > { %v6009_v52 = vld.sshfl [vmem:[#allocation1] sm:$0xff pattern:$0x75316420]  ;;  %v6011_v61 = vld.sshfl [vmem:[#allocation1 + $0x8] sm:$0xff pattern:$0x75316420] }
 0x45b   : > { %2520 = vrot.lane.b32.xlu1 %v5896_v55, %s6854_s20  ;;  %2579 = vrot.lane.b32.xlu0 %v5930_v57, %s6861_s27  ;;  %2821 = vst [vmem:[#allocation1] ss:$2 sm:$0xff] %v2815_v7  ;;  %v6029_v55 = vld.sshfl [vmem:[#allocation1 + $0x20] sm:$0xff pattern:$0x75316420]  ;;  %v2872_v57 = vsel %vm6865_vm4, %v2870_v46, %v5584_v40  ;;  %vm6873_vm4 = vmmov %vm6871_vm7 }
 0x45c   : > { %2581 = vrot.lane.b32.xlu2 %v5918_v3, %s6861_s27  ;;  %3270 = vst [vmem:[#allocation1 + $0x21] ss:$2 sm:$0xff] %v3261_v63  ;;  %v2937_v3 = vsel %vm282_vm0, %v2934_v32, %v6866_v34  ;;  %v2878_v51 = vmul.f32 %v2872_v57, %v5776_v20  ;;  %v2997_v63 = vrot.slane %v5602_v36, 4  ;;  %v6870_v57 = vrot.slane %v5690_v54, 4  ;;  %v3397_v34 = vld [vmem:[#allocation3 + $0x14] sm:$0xf] }
 0x45d   : > { %v6024_v13 = vld.sshfl [vmem:[#allocation1 + $0x10] sm:$0xff pattern:$0x75316420]  ;;  %v6026_v16 = vld.sshfl [vmem:[#allocation1 + $0x18] sm:$0xff pattern:$0x75316420]  ;;  %v2938_v23 = vsel %vm6867_vm10, %v2937_v3, %v5675_v17 }
 0x45e   : > { %2887 = vst [vmem:[#allocation1 + $0x11] ss:$2 sm:$0xff] %v2879_v11  ;;  %v6793_v11 = vrot.slane %v5656_v25, 4  ;;  %v2943_v40 = vmul.f32 %v2938_v23, %v5751_v27  ;;  %v6792_v3 = vrot.slane %v5720_v42, 4  ;;  %vm6875_vm10 = vcmask 605184  }
 0x460   : > { %v3358_v46 = vmul.f32 %v6793_v11, %v3333_v45 }
 0x462   : > { %v6037_v10 = vld.sshfl [vmem:[#allocation1 + $0x8] sm:$0xff pattern:$0x75316420]  ;;  %v6039_v7 = vld.sshfl [vmem:[#allocation1] sm:$0xff pattern:$0x75316420] }
 0x463   : > { %2649 = vrot.lane.b32.xlu0 %v5820_v44, %s6868_s8  ;;  %2641 = vrot.lane.b32.xlu1 %v5954_v59, %s6868_s8  ;;  %2885 = vst [vmem:[#allocation1 + $0x1] ss:$2 sm:$0xff] %v2878_v51  ;;  %v6058_v44 = vld.sshfl [vmem:[#allocation1 + $0x20] sm:$0xff pattern:$0x75316420]  ;;  %v2936_v59 = vsel %vm6869_vm3, %v2934_v32, %v5595_v21  ;;  %vm6876_vm3 = vmmov %vm6875_vm10 }
 0x464   : > { %2583 = vrot.lane.b32.xlu2 %v5920_v9, %s6861_s27  ;;  %3367 = vst [vmem:[#allocation1 + $0x21] ss:$2 sm:$0xff] %v3358_v46  ;;  %v3000_v9 = vsel %vm282_vm0, %v2997_v63, %v6870_v57  ;;  %v2942_v45 = vmul.f32 %v2936_v59, %v5776_v20  ;;  %v3422_v46 = vmul.f32 %v6792_v3, %v3397_v34  ;;  %v6087_v57 = vpop.permute.xlu2 %2331 }
 0x465   : > { %v6053_v37 = vld.sshfl [vmem:[#allocation1 + $0x18] sm:$0xff pattern:$0x75316420]  ;;  %v6055_v17 = vld.sshfl [vmem:[#allocation1 + $0x10] sm:$0xff pattern:$0x75316420] }
 0x466   : > { %2950 = vst [vmem:[#allocation1 + $0x10] ss:$2 sm:$0xff] %v2943_v40  ;;  %v3001_v40 = vsel %vm6871_vm7, %v3000_v9, %v5690_v54  ;;  %v3061_v54 = vrot.slane %v5634_v33, 4  ;;  %vm6880_vm7 = vcmask 654336  }
 0x467   : > { %v3006_v21 = vmul.f32 %v3001_v40, %v5751_v27 }
 0x46a   : > { %v6067_v51 = vld.sshfl [vmem:[#allocation1] sm:$0xff pattern:$0x75316420]  ;;  %v6069_v23 = vld.sshfl [vmem:[#allocation1 + $0x8] sm:$0xff pattern:$0x75316420] }
 0x46b   : > { %2643 = vrot.lane.b32.xlu0 %v5956_v4, %s6868_s8  ;;  %2704 = vrot.lane.b32.xlu1 %v5981_v31, %s6872_s24  ;;  %2948 = vst [vmem:[#allocation1] ss:$2 sm:$0xff] %v2942_v45  ;;  %v6089_v9 = vld.sshfl [vmem:[#allocation1 + $0x20] sm:$0xff pattern:$0x75316420]  ;;  %v2999_v4 = vsel %vm6873_vm4, %v2997_v63, %v5602_v36  ;;  %v6874_v31 = vrot.slane %v5608_v12, 4  ;;  %vm6881_vm4 = vmmov %vm6880_vm7 }
 0x46c   : > { %2647 = vrot.lane.b32.xlu2 %v5944_v6, %s6868_s8  ;;  %3430 = vst [vmem:[#allocation1 + $0x20] ss:$2 sm:$0xff] %v3422_v46  ;;  %v3460_v6 = vld [vmem:[#allocation3 + $0x14] sm:$0xf]  ;;  %v6794_v45 = vrot.slane %v5731_v14, 4  ;;  %v3005_v40 = vmul.f32 %v2999_v4, %v5776_v20 }
 0x46d   : > { %v6082_v32 = vld.sshfl [vmem:[#allocation1 + $0x10] sm:$0xff pattern:$0x75316420]  ;;  %v6084_v59 = vld.sshfl [vmem:[#allocation1 + $0x18] sm:$0xff pattern:$0x75316420]  ;;  %v3064_v34 = vsel %vm282_vm0, %v3061_v54, %v6874_v31 }
 0x46e   : > { %3014 = vst [vmem:[#allocation1 + $0x11] ss:$2 sm:$0xff] %v3006_v21  ;;  %v3065_v21 = vsel %vm6875_vm10, %v3064_v34, %v5608_v12  ;;  %v3485_v46 = vmul.f32 %v6794_v45, %v3460_v6  ;;  %v3124_v12 = vrot.slane %v5640_v38, 4  ;;  %vm6885_vm10 = vcmask 662528  }
 0x46f   : > { %v3070_v36 = vmul.f32 %v3065_v21, %v5751_v27  ;;  %v6118_v31 = vpop.permute.xlu2 %2264 }
 0x472   : > { %v6098_v3 = vld.sshfl [vmem:[#allocation1 + $0x8] sm:$0xff pattern:$0x75316420]  ;;  %v6100_v11 = vld.sshfl [vmem:[#allocation1] sm:$0xff pattern:$0x75316420] }
 0x473   : > { %2712 = vrot.lane.b32.xlu0 %v5839_v15, %s6872_s24  ;;  %2708 = vrot.lane.b32.xlu1 %v5969_v1, %s6872_s24  ;;  %3012 = vst [vmem:[#allocation1 + $0x1] ss:$2 sm:$0xff] %v3005_v40  ;;  %v6120_v34 = vld.sshfl [vmem:[#allocation1 + $0x20] sm:$0xff pattern:$0x75316420]  ;;  %v3063_v15 = vsel %vm6876_vm3, %v3061_v54, %v5634_v33  ;;  %v6877_v1 = vrot.slane %v5614_v60, 4  ;;  %vm6889_vm3 = vmmov %vm6885_vm10 }
 0x474   : > { %2706 = vrot.lane.b32.xlu2 %v5983_v26, %s6872_s24  ;;  %3494 = vst [vmem:[#allocation1 + $0x21] ss:$2 sm:$0xff] %v3485_v46  ;;  %v3524_v26 = vld [vmem:[#allocation3 + $0x14] sm:$0xf]  ;;  %v6796_v40 = vrot.slane %v5742_v50, 4  ;;  %v3069_v21 = vmul.f32 %v3063_v15, %v5776_v20 }
 0x475   : > { %v6113_v63 = vld.sshfl [vmem:[#allocation1 + $0x10] sm:$0xff pattern:$0x75316420]  ;;  %v6115_v4 = vld.sshfl [vmem:[#allocation1 + $0x18] sm:$0xff pattern:$0x75316420]  ;;  %v3127_v6 = vsel %vm282_vm0, %v3124_v12, %v6877_v1 }
 0x476   : > { %3077 = vst [vmem:[#allocation1 + $0x10] ss:$2 sm:$0xff] %v3070_v36  ;;  %v3128_v36 = vsel %vm6880_vm7, %v3127_v6, %v5614_v60  ;;  %v3549_v46 = vmul.f32 %v6796_v40, %v3524_v26  ;;  %v3188_v60 = vrot.slane %v5644_v8, 4  ;;  %vm6893_vm7 = vcmask 1039360  }
 0x477   : > { %v3133_v33 = vmul.f32 %v3128_v36, %v5751_v27 }
 0x47a   : > { %v6129_v45 = vld.sshfl [vmem:[#allocation1] sm:$0xff pattern:$0x75316420]  ;;  %v6131_v35 = vld.sshfl [vmem:[#allocation1 + $0x8] sm:$0xff pattern:$0x75316420] }
 0x47b   : > { %6878 = vst [vmem:[#allocation16_spill] sm:$0xff] %v6129_v45  ;;  %2645 = vrot.lane.b32.xlu0 %v5942_v28, %s6868_s8  ;;  %2710 = vrot.lane.b32.xlu1 %v5971_v2, %s6872_s24  ;;  %v6151_v6 = vld.sshfl [vmem:[#allocation1 + $0x20] sm:$0xff pattern:$0x75316420]  ;;  %v3126_v28 = vsel %vm6881_vm4, %v3124_v12, %v5640_v38  ;;  %v6882_v2 = vrot.slane %v5622_v30, 4  ;;  %vm6894_vm4 = vmmov %vm6893_vm7 }
 0x47c   : > { %6879 = vst [vmem:[#allocation17_spill] sm:$0xff] %v6131_v35  ;;  %2776 = vrot.lane.b32.xlu2 %v5855_v5, %s6822_s23  ;;  %v3587_v5 = vld [vmem:[#allocation3 + $0x14] sm:$0xf]  ;;  %v4105_v38 = vld [vmem:[%s6686_s1 + $0x42] ss:$8 sm:$0xf] }
 0x47d   : > { %3075 = vst [vmem:[#allocation1] ss:$2 sm:$0xff] %v3069_v21  ;;  %v6144_v54 = vld.sshfl [vmem:[#allocation1 + $0x10] sm:$0xff pattern:$0x75316420]  ;;  %v3191_v26 = vsel %vm282_vm0, %v3188_v60, %v6882_v2  ;;  %v3132_v21 = vmul.f32 %v3126_v28, %v5776_v20  ;;  %v6895_v35 = vrot.slane %v5654_v19, 4 }
 0x47e   : > { %v6146_v15 = vld.sshfl [vmem:[#allocation1 + $0x18] sm:$0xff pattern:$0x75316420]  ;;  %v6149_v1 = vpop.permute.xlu2 %2325  ;;  %3557 = vst [vmem:[#allocation1 + $0x20] ss:$2 sm:$0xff] %v3549_v46  ;;  %v6887_v46 = vrot.slane %v5648_v24, 4 }
 0x47f   : > { %3141 = vst [vmem:[#allocation1 + $0x11] ss:$2 sm:$0xff] %v3133_v33  ;;  %v3192_v33 = vsel %vm6885_vm10, %v3191_v26, %v5622_v30  ;;  %v2269_v30 = vpop.permute.xlu1 %2268  ;;  %v3348_v19 = vrot.slane %v5714_v39, 4  ;;  %vm6898_vm10 = vmmov %vm6894_vm4 }
 0x480   : > { %v3197_v12 = vmul.f32 %v3192_v33, %v5751_v27  ;;  %v3612_v28 = vmul.f32 %v6887_v46, %v3587_v5  ;;  %v3190_v27 = vsel %vm6889_vm3, %v3188_v60, %v5644_v8  ;;  %v3651_v5 = vld [vmem:[#allocation3 + $0x14] sm:$0xf]  ;;  %vm6899_vm3 = vmmov %vm6894_vm4 }
 0x483   : > { %2839 = vrot.lane.b32.xlu1 %v5876_v43, %s6886_s11  ;;  %2768 = vrot.lane.b32.xlu0 %v6009_v52, %s6822_s23 }
 0x484   : > { %v6159_v36 = vld.sshfl [vmem:[#allocation1] sm:$0xff pattern:$0x75316420]  ;;  %v6161_v40 = vld.sshfl [vmem:[#allocation1 + $0x8] sm:$0xff pattern:$0x75316420]  ;;  %2770 = vrot.lane.b32.xlu2 %v6011_v61, %s6822_s23  ;;  %v3196_v61 = vmul.f32 %v3190_v27, %v5776_v20 }
 0x485   : > { %6883 = vst [vmem:[#allocation18_spill] sm:$0xff] %v6159_v36  ;;  %v6183_v52 = vld.sshfl [vmem:[#allocation1 + $0x20] sm:$0xff pattern:$0x75316420]  ;;  %v3302_v36 = vperm.slane %v4105_v38, 0 }
 0x486   : > { %6884 = vst [vmem:[#allocation19_spill] sm:$0xff] %v6161_v40  ;;  %v6177_v2 = vld.sshfl [vmem:[#allocation1 + $0x10] sm:$0xff pattern:$0x75316420]  ;;  %v6181_v26 = vpop.permute.xlu2 %2387 }
 0x487   : > { %3139 = vst [vmem:[#allocation1 + $0x1] ss:$2 sm:$0xff] %v3132_v21  ;;  %v6179_v43 = vld.sshfl [vmem:[#allocation1 + $0x18] sm:$0xff pattern:$0x75316420]  ;;  %v3305_v21 = vperm.slane %v4105_v38, 3 }
 0x488   : > { %3204 = vst [vmem:[#allocation1 + $0x10] ss:$2 sm:$0xff] %v3197_v12  ;;  %v3304_v12 = vperm.slane %v4105_v38, 2 }
 0x489   : > { %6888 = vst [vmem:[#allocation20_spill] sm:$0xff] %v6183_v52  ;;  %v3307_v46 = vrot.slane %v3305_v21, 4 }
 0x48a   : > { %3621 = vst [vmem:[#allocation1 + $0x21] ss:$2 sm:$0xff] %v3612_v28  ;;  %v3303_v28 = vperm.slane %v4105_v38, 1 }
 0x48b   : > { %2774 = vrot.lane.b32.xlu1 %v5996_v29, %s6822_s23  ;;  %2772 = vrot.lane.b32.xlu0 %v5998_v0, %s6822_s23  ;;  %v6892_v29 = vrot.slane %v5707_v56, 4  ;;  %s6896_s23 = smov 62  }
 0x48c   : > { %2835 = vrot.lane.b32.xlu2 %v6024_v13, %s6886_s11 }
 0x48d   : > { %v2263_v8 = vpop.permute.xlu1 %2262  ;;  %v2261_v60 = vpop.permute.xlu0 %2260  ;;  %v3253_v40 = vsel %vm1408_vm2, %v6892_v29, %v5707_v56  ;;  %v3306_v56 = vrot.slane %v3303_v28, 4  ;;  %vm6897_vm2 = vcmask 1031168  }
 0x48e   : > { %v6188_v33 = vld.sshfl [vmem:[#allocation1] sm:$0xff pattern:$0x75316420]  ;;  %v6190_v24 = vld.sshfl [vmem:[#allocation1 + $0x8] sm:$0xff pattern:$0x75316420]  ;;  %v2271_v0 = vsel %vm6893_vm7, %v2263_v8, %v6118_v31  ;;  %v2270_v21 = vsel %vm6894_vm4, %v2261_v60, %v2263_v8  ;;  %v3259_v29 = vmul.f32 %v3253_v40, %v5776_v20  ;;  %vm6904_vm7 = vmmov %vm6897_vm2 }
 0x48f   : > { %6890 = vst [vmem:[#allocation21_spill] sm:$0xff] %v6188_v33  ;;  %v6198_v27 = vld.sshfl [vmem:[#allocation1 + $0x18] sm:$0xff pattern:$0x75316420]  ;;  %v3309_v33 = vsel %vm282_vm0, %v3304_v12, %v3307_v46  ;;  %v6900_v46 = vrot.slane %v5656_v25, 4  ;;  %vm6905_vm4 = vcmask 982016  }
 0x490   : > { %6891 = vst [vmem:[#allocation22_spill] sm:$0xff] %v6190_v24  ;;  %v6200_v45 = vld.sshfl [vmem:[#allocation1 + $0x10] sm:$0xff pattern:$0x75316420]  ;;  %v3676_v24 = vmul.f32 %v6895_v35, %v3651_v5 }
 0x491   : > { %3202 = vst [vmem:[#allocation1] ss:$2 sm:$0xff] %v3196_v61  ;;  %v6209_v61 = vpop.permute.xlu2 %2393  ;;  %v6212_v13 = vld.sshfl [vmem:[#allocation1 + $0x20] sm:$0xff pattern:$0x75316420]  ;;  %v3351_v28 = vsel %vm282_vm0, %v3348_v19, %v6900_v46 }
 0x492   : > { %3268 = vst [vmem:[#allocation1 + $0x11] ss:$2 sm:$0xff] %v5771_v58  ;;  %v3313_v58 = vmul.f32 %v3309_v33, %v5795_v48 }
 0x493   : > { %2279 = vst [vmem:[#allocation4 + $0xf0] sm:$0xf0] %v2271_v0  ;;  %2833 = vrot.lane.b32.xlu1 %v6037_v10, %s6886_s11  ;;  %2831 = vrot.lane.b32.xlu0 %v6039_v7, %s6886_s11  ;;  %v6235_v10 = vld [vmem:[#allocation3 + $0x4] sm:$0xff]  ;;  %v6901_v0 = vld [vmem:[#allocation9_spill] sm:$0xff] }
 0x494   : > { %2278 = vst [vmem:[#allocation4 + $0xc0] sm:$0xf0] %v2270_v21  ;;  %2895 = vrot.lane.b32.xlu2 %v6067_v51, %s6896_s23  ;;  %v3714_v51 = vld [vmem:[#allocation3 + $0x14] sm:$0xf]  ;;  %v6902_v21 = vrot.slane %v6901_v0, 4 }
 0x495   : > { %3684 = vst [vmem:[#allocation1 + $0x20] ss:$2 sm:$0xff] %v3676_v24  ;;  %v2324_v20 = vpop.permute.xlu1 %2323  ;;  %v2267_v35 = vpop.permute.xlu0 %2266  ;;  %v3308_v24 = vsel %vm282_vm0, %v3302_v36, %v3306_v56 }
 0x496   : > { %v2333_v7 = vsel %vm6897_vm2, %v2324_v20, %v6149_v1  ;;  %v2272_v5 = vsel %vm6898_vm10, %v6118_v31, %v2267_v35  ;;  %v2273_v33 = vsel %vm6899_vm3, %v2267_v35, %v2269_v30  ;;  %v3312_v36 = vmul.f32 %v3308_v24, %v6235_v10  ;;  %vm6913_vm10 = vmmov %vm6905_vm4 }
 0x497   : > { %2341 = vst [vmem:[#allocation4 + $0x80] sm:$0xf] %v2333_v7  ;;  %v3739_v31 = vmul.f32 %v6902_v21, %v3714_v51  ;;  %vm6914_vm3 = vmmov %vm6905_vm4 }
 0x498   : > { %v6218_v52 = vld.sshfl [vmem:[#allocation1] sm:$0xff pattern:$0x75316420]  ;;  %v6220_v8 = vld.sshfl [vmem:[#allocation1 + $0x8] sm:$0xff pattern:$0x75316420] }
 0x499   : > { %3266 = vst [vmem:[#allocation1 + $0x1] ss:$2 sm:$0xff] %v3259_v29  ;;  %v6230_v40 = vld.sshfl [vmem:[#allocation1 + $0x10] sm:$0xff pattern:$0x75316420]  ;;  %v6242_v12 = vpop.permute.xlu2 %2522  ;;  %v3352_v29 = vsel %vm346_vm8, %v3351_v28, %v5656_v25  ;;  %v3350_v25 = vsel %vm346_vm8, %v3348_v19, %v5714_v39  ;;  %v6907_v39 = vrot.slane %v5720_v42, 4  ;;  %vm6908_vm8 = vmmov %vm6897_vm2 }
 0x49a   : > { %v6232_v38 = vld.sshfl [vmem:[#allocation1 + $0x18] sm:$0xff pattern:$0x75316420]  ;;  %2280 = vst [vmem:[#allocation4 + $0xa8] sm:$0xf0] %v2272_v5  ;;  %v3356_v51 = vmul.f32 %v3350_v25, %v6235_v10 }
 0x49b   : > { %3318 = vst [vmem:[#allocation1 + $0x10] ss:$2 sm:$0xff] %v3313_v58  ;;  %2903 = vrot.lane.b32.xlu0 %v5901_v22, %s6896_s23  ;;  %2966 = vrot.lane.b32.xlu1 %v5922_v41, %s6903_s7  ;;  %v3357_v58 = vmul.f32 %v3352_v29, %v5795_v48 }
 0x49c   : > { %2281 = vst [vmem:[#allocation4] sm:$0xf0] %v2273_v33  ;;  %v6248_v60 = vld.sshfl [vmem:[#allocation1 + $0x20] sm:$0xff pattern:$0x75316420]  ;;  %2901 = vrot.lane.b32.xlu2 %v6053_v37, %s6896_s23  ;;  %v6906_v37 = vld [vmem:[#allocation5_spill] sm:$0xff] }
 0x49d   : > { %3748 = vst [vmem:[#allocation1 + $0x21] ss:$2 sm:$0xff] %v3739_v31  ;;  %v2330_v20 = vpop.permute.xlu1 %2329  ;;  %v2396_v35 = vpop.permute.xlu0 %2395  ;;  %v3412_v33 = vrot.slane %v6906_v37, 4 }
 0x49e   : > { %v2336_v22 = vsel %vm6904_vm7, %v2330_v20, %v6087_v57  ;;  %v2400_v41 = vsel %vm6905_vm4, %v6209_v61, %v2396_v35  ;;  %vm6915_vm7 = vcmask 64512  }
 0x49f   : > { %2344 = vst [vmem:[#allocation4 + $0xe0] sm:$0xf] %v2336_v22  ;;  %v3415_v19 = vsel %vm282_vm0, %v3412_v33, %v6907_v39  ;;  %v3414_v35 = vsel %vm413_vm9, %v3412_v33, %v6906_v37  ;;  %v6911_v37 = vrot.slane %v5731_v14, 4 }
 0x4a0   : > { %v6252_v56 = vld.sshfl [vmem:[#allocation1] sm:$0xff pattern:$0x75316420]  ;;  %v6254_v30 = vld.sshfl [vmem:[#allocation1 + $0x8] sm:$0xff pattern:$0x75316420]  ;;  %v3416_v21 = vsel %vm413_vm9, %v3415_v19, %v5720_v42  ;;  %v3420_v25 = vmul.f32 %v3414_v35, %v6235_v10  ;;  %vm6912_vm9 = vmmov %vm6905_vm4 }
 0x4a1   : > { %3316 = vst [vmem:[#allocation1] ss:$2 sm:$0xff] %v3312_v36  ;;  %v6271_v5 = vpop.permute.xlu2 %2454  ;;  %vm6916_vm4 = vmmov %vm6915_vm7 }
 0x4a2   : > { %v3321_v24 = vld.sshfl [vmem:[#allocation1 + $0x10] sm:$0xff pattern:$0x75316420]  ;;  %v3322_v7 = vld.sshfl [vmem:[#allocation1 + $0x18] sm:$0xff pattern:$0x75316420] }
 0x4a3   : > { %3365 = vst [vmem:[#allocation1 + $0x11] ss:$2 sm:$0xff] %v3357_v58  ;;  %2837 = vrot.lane.b32.xlu0 %v6026_v16, %s6886_s11  ;;  %2899 = vrot.lane.b32.xlu1 %v6055_v17, %s6896_s23  ;;  %v3421_v58 = vmul.f32 %v3416_v21, %v5795_v48 }
 0x4a4   : > { %2408 = vst [vmem:[#allocation4 + $0xe0] sm:$0xf0] %v2400_v41  ;;  %2960 = vrot.lane.b32.xlu2 %v6098_v3, %s6903_s7  ;;  %v3778_v3 = vld [vmem:[#allocation3 + $0x14] sm:$0xf] }
 0x4a5   : > { %3329 = vst [vmem:[#allocation4 + $0x48] sm:$0xf] %v3321_v24  ;;  %v6284_v57 = vpop.permute.xlu1 %2458  ;;  %v2328_v36 = vpop.permute.xlu0 %2327  ;;  %v6909_v24 = vld [vmem:[#allocation6_spill] sm:$0xff] }
 0x4a6   : > { %v2334_v16 = vsel %vm6908_vm8, %v6149_v1, %v2328_v36  ;;  %v2335_v31 = vsel %vm6897_vm2, %v2328_v36, %v2330_v20  ;;  %3330 = vst [vmem:[#allocation4 + $0x168] sm:$0xf] %v3322_v7  ;;  %v3475_v42 = vrot.slane %v6909_v24, 4  ;;  %v6302_v1 = vld.sshfl [vmem:[#allocation1 + $0x20] sm:$0xff pattern:$0x75316420] }
 0x4a7   : > { %2342 = vst [vmem:[#allocation4 + $0x128] sm:$0xf] %v2334_v16  ;;  %v6910_v20 = vrot.slane %v5733_v47, 4  ;;  %vm6920_vm8 = vcmask 72704   ;;  %vm6923_vm2 = vcmask 965632  }
 0x4a8   : > { %v3319_v46 = vld.sshfl [vmem:[#allocation1] sm:$0xff pattern:$0x75316420]  ;;  %v3320_v28 = vld.sshfl [vmem:[#allocation1 + $0x8] sm:$0xff pattern:$0x75316420]  ;;  %v3478_v33 = vsel %vm282_vm0, %v3475_v42, %v6911_v37  ;;  %v3477_v36 = vsel %vm6916_vm4, %v3475_v42, %v6909_v24 }
 0x4a9   : > { %3363 = vst [vmem:[#allocation1 + $0x1] ss:$2 sm:$0xff] %v3356_v51  ;;  %v6293_v17 = vpop.permute.xlu2 %2516  ;;  %v3803_v7 = vmul.f32 %v6910_v20, %v3778_v3  ;;  %v3479_v39 = vsel %vm6915_vm7, %v3478_v33, %v5731_v14  ;;  %v3483_v16 = vmul.f32 %v3477_v36, %v6235_v10  ;;  %v6919_v3 = vrot.slane %v5742_v50, 4 }
 0x4aa   : > { %3327 = vst [vmem:[#allocation4 + $0x58] sm:$0xf] %v3319_v46  ;;  %v6286_v0 = vld.sshfl [vmem:[#allocation1 + $0x18] sm:$0xff pattern:$0x75316420]  ;;  %v3484_v19 = vmul.f32 %v3479_v39, %v5795_v48 }
 0x4ab   : > { %3328 = vst [vmem:[#allocation4 + $0x28] sm:$0xf] %v3320_v28  ;;  %v6295_v29 = vld.sshfl [vmem:[#allocation1 + $0x10] sm:$0xff pattern:$0x75316420]  ;;  %2897 = vrot.lane.b32.xlu0 %v6069_v23, %s6896_s23  ;;  %2958 = vrot.lane.b32.xlu1 %v6100_v11, %s6903_s7 }
 0x4ac   : > { %2343 = vst [vmem:[#allocation4 + $0xd8] sm:$0xf] %v2335_v31  ;;  %2962 = vrot.lane.b32.xlu2 %v6082_v32, %s6903_s7 }
 0x4ad   : > { %3428 = vst [vmem:[#allocation1 + $0x10] ss:$2 sm:$0xff] %v3421_v58  ;;  %v2392_v47 = vpop.permute.xlu1 %2391  ;;  %v2390_v51 = vpop.permute.xlu0 %2389 }
 0x4ae   : > { %3811 = vst [vmem:[#allocation1 + $0x20] ss:$2 sm:$0xff] %v3803_v7  ;;  %v2399_v46 = vsel %vm6912_vm9, %v2392_v47, %v6209_v61  ;;  %v2397_v23 = vsel %vm6913_vm10, %v6181_v26, %v2390_v51  ;;  %v2398_v28 = vsel %vm6914_vm3, %v2390_v51, %v2392_v47  ;;  %v6917_v26 = vld [vmem:[#allocation7_spill] sm:$0xff]  ;;  %vm6934_vm9 = vmmov %vm6923_vm2  ;;  %vm6941_vm10 = vcmask 900096  }
 0x4af   : > { %2407 = vst [vmem:[#allocation4 + $0xd8] sm:$0xf0] %v2399_v46  ;;  %v3539_v21 = vrot.slane %v6917_v26, 4  ;;  %vm6944_vm3 = vmmov %vm6941_vm10 }
 0x4b0   : > { %v6306_v22 = vld.sshfl [vmem:[#allocation1 + $0x8] sm:$0xff pattern:$0x75316420]  ;;  %v6308_v41 = vld.sshfl [vmem:[#allocation1] sm:$0xff pattern:$0x75316420]  ;;  %vm6945_vm7 = vmmov %vm6944_vm3 }
 0x4b1   : > { %3426 = vst [vmem:[#allocation1] ss:$2 sm:$0xff] %v3420_v25  ;;  %v6324_v11 = vpop.permute.xlu2 %2577  ;;  %v3542_v58 = vsel %vm282_vm0, %v3539_v21, %v6919_v3  ;;  %vm6921_vm0 = vmmov %vm6920_vm8 }
 0x4b2   : > { %2405 = vst [vmem:[#allocation4 + $0x80] sm:$0xf0] %v2397_v23  ;;  %vm6946_vm4 = vmmov %vm6944_vm3 }
 0x4b3   : > { %2406 = vst [vmem:[#allocation4 + $0x128] sm:$0xf0] %v2398_v28  ;;  %2964 = vrot.lane.b32.xlu0 %v6084_v59, %s6903_s7  ;;  %3030 = vrot.lane.b32.xlu1 %v5948_v49, %s6918_s26  ;;  %v3543_v49 = vsel %vm6920_vm8, %v3542_v58, %v5742_v50 }
 0x4b4   : > { %v6329_v32 = vld.sshfl [vmem:[#allocation1 + $0x18] sm:$0xff pattern:$0x75316420]  ;;  %v6333_v61 = vld.sshfl [vmem:[#allocation1 + $0x10] sm:$0xff pattern:$0x75316420]  ;;  %3026 = vrot.lane.b32.xlu2 %v6113_v63, %s6918_s26  ;;  %v3548_v20 = vmul.f32 %v3543_v49, %v5795_v48  ;;  %v3541_v63 = vsel %vm6921_vm0, %v3539_v21, %v6917_v26 }
 0x4b5   : > { %3492 = vst [vmem:[#allocation1 + $0x11] ss:$2 sm:$0xff] %v3484_v19  ;;  %v2453_v35 = vpop.permute.xlu1 %2452  ;;  %v2451_v24 = vpop.permute.xlu0 %2450  ;;  %v3547_v33 = vmul.f32 %v3541_v63, %v6235_v10  ;;  %v6924_v19 = vld [vmem:[#allocation8_spill] sm:$0xff] }
 0x4b6   : > { %v2461_v42 = vsel %vm579_vm1, %v2453_v35, %v6271_v5  ;;  %v2460_v59 = vsel %vm579_vm1, %v2451_v24, %v2453_v35 }
 0x4b7   : > { %2469 = vst [vmem:[#allocation4 + $0x148] sm:$0xf] %v2461_v42 }
 0x4b8   : > { %v6337_v31 = vld.sshfl [vmem:[#allocation1] sm:$0xff pattern:$0x75316420]  ;;  %v6343_v14 = vld.sshfl [vmem:[#allocation1 + $0x8] sm:$0xff pattern:$0x75316420] }
 0x4b9   : > { %3490 = vst [vmem:[#allocation1 + $0x1] ss:$2 sm:$0xff] %v3483_v16  ;;  %v6353_v25 = vpop.permute.xlu2 %2581 }
 0x4ba   : > { %2468 = vst [vmem:[#allocation4 + $0x20] sm:$0xf] %v2460_v59 }
 0x4bb   : > { %3093 = vrot.lane.b32.xlu0 %v5975_v62, %s6922_s29  ;;  %3089 = vrot.lane.b32.xlu1 %v6144_v54, %s6922_s29 }
 0x4bc   : > { %v6360_v7 = vld.sshfl [vmem:[#allocation1 + $0x18] sm:$0xff pattern:$0x75316420]  ;;  %v6362_v37 = vld.sshfl [vmem:[#allocation1 + $0x10] sm:$0xff pattern:$0x75316420]  ;;  %3091 = vrot.lane.b32.xlu2 %v6146_v15, %s6922_s29 }
 0x4bd   : > { %3555 = vst [vmem:[#allocation1 + $0x10] ss:$2 sm:$0xff] %v3548_v20  ;;  %v2515_v51 = vpop.permute.xlu1 %2514  ;;  %v2457_v46 = vpop.permute.xlu0 %2456  ;;  %v6925_v15 = vrot.slane %v6924_v19, 4 }
 0x4be   : > { %v2524_v23 = vsel %vm6923_vm2, %v2515_v51, %v6293_v17  ;;  %v2462_v28 = vsel %vm579_vm1, %v6271_v5, %v2457_v46  ;;  %v2463_v62 = vsel %vm579_vm1, %v2457_v46, %v6284_v57  ;;  %v6926_v57 = vld [vmem:[#allocation10_spill] sm:$0xff] }
 0x4bf   : > { %2532 = vst [vmem:[#allocation4 + $0x20] sm:$0xf0] %v2524_v23  ;;  %v3604_v36 = vsel %vm612_vm12, %v6925_v15, %v6924_v19  ;;  %v3611_v16 = vmul.f32 %v6926_v57, %v5795_v48  ;;  %vm6929_vm12 = vmmov %vm6923_vm2 }
 0x4c0   : > { %v6369_v50 = vld.sshfl [vmem:[#allocation1 + $0x8] sm:$0xff pattern:$0x75316420]  ;;  %v6371_v47 = vld.sshfl [vmem:[#allocation1] sm:$0xff pattern:$0x75316420]  ;;  %v3610_v21 = vmul.f32 %v3604_v36, %v6235_v10 }
 0x4c1   : > { %3553 = vst [vmem:[#allocation1] ss:$2 sm:$0xff] %v3547_v33  ;;  %v2584_v54 = vpop.permute.xlu2 %2583 }
 0x4c2   : > { %v2589_v39 = vsel %vm712_vm6, %v6353_v25, %v2584_v54  ;;  %2470 = vst [vmem:[#allocation4 + $0x158] sm:$0xf] %v2462_v28 }
 0x4c3   : > { %2471 = vst [vmem:[#allocation4 + $0x1c8] sm:$0xf] %v2463_v62  ;;  %3028 = vrot.lane.b32.xlu0 %v6115_v4, %s6918_s26  ;;  %3153 = vrot.lane.b32.xlu1 %v6177_v2, %s6927_s17  ;;  %v6930_v2 = vld [vmem:[#allocation11_spill] sm:$0xff] }
 0x4c4   : > { %v6387_v26 = vld.sshfl [vmem:[#allocation1 + $0x18] sm:$0xff pattern:$0x75316420]  ;;  %2597 = vst [vmem:[#allocation4 + $0x100] sm:$0xf] %v2589_v39  ;;  %3220 = vrot.lane.b32.xlu2 %v6029_v55, %s6928_s28  ;;  %v6931_v49 = vrot.slane %v6930_v2, 4 }
 0x4c5   : > { %v6390_v5 = vld.sshfl [vmem:[#allocation1 + $0x10] sm:$0xff pattern:$0x75316420]  ;;  %v2586_v35 = vpop.permute.xlu1 %2585  ;;  %v2519_v24 = vpop.permute.xlu0 %2518  ;;  %v6935_v39 = vld [vmem:[#allocation13_spill] sm:$0xff] }
 0x4c6   : > { %3619 = vst [vmem:[#allocation1 + $0x11] ss:$2 sm:$0xff] %v3611_v16  ;;  %v2590_v42 = vsel %vm712_vm6, %v2584_v54, %v2586_v35  ;;  %v2525_v59 = vsel %vm6929_vm12, %v6293_v17, %v2519_v24  ;;  %v3668_v20 = vsel %vm679_vm13, %v6931_v49, %v6930_v2  ;;  %v6932_v55 = vld [vmem:[#allocation12_spill] sm:$0xff]  ;;  %vm6933_vm13 = vmmov %vm6923_vm2  ;;  %v6936_v19 = vrot.slane %v6935_v39, 4 }
 0x4c7   : > { %2598 = vst [vmem:[#allocation4 + $0x1d0] sm:$0xf] %v2590_v42  ;;  %v3675_v63 = vmul.f32 %v6932_v55, %v5795_v48  ;;  %v3674_v51 = vmul.f32 %v3668_v20, %v6235_v10  ;;  %vm6949_vm2 = vcmask 523264  }
 0x4c8   : > { %v6398_v3 = vld.sshfl [vmem:[#allocation1 + $0x8] sm:$0xff pattern:$0x75316420]  ;;  %v6400_v58 = vld.sshfl [vmem:[#allocation1] sm:$0xff pattern:$0x75316420]  ;;  %v3731_v15 = vsel %vm745_vm14, %v6936_v19, %v6935_v39  ;;  %vm6950_vm12 = vmmov %vm6949_vm2 }
 0x4c9   : > { %3617 = vst [vmem:[#allocation1 + $0x1] ss:$2 sm:$0xff] %v3610_v21  ;;  %v6407_v4 = vpop.permute.xlu2 %2647  ;;  %vm6937_vm14 = vcmask 908288  }
 0x4ca   : > { %2533 = vst [vmem:[#allocation4 + $0x148] sm:$0xf0] %v2525_v59  ;;  %vm6947_vm8 = vmmov %vm6937_vm14 }
 0x4cb   : > { %3157 = vrot.lane.b32.xlu0 %v6003_v53, %s6927_s17  ;;  %3212 = vrot.lane.b32.xlu1 %v6218_v52, %s6928_s28  ;;  %vm6948_vm0 = vmmov %vm6947_vm8 }
 0x4cc   : > { %3155 = vrot.lane.b32.xlu2 %v6179_v43, %s6927_s17 }
 0x4cd   : > { %v6426_v46 = vld.sshfl [vmem:[#allocation1 + $0x18] sm:$0xff pattern:$0x75316420]  ;;  %v6428_v23 = vld.sshfl [vmem:[#allocation1 + $0x10] sm:$0xff pattern:$0x75316420]  ;;  %v2521_v48 = vpop.permute.xlu1 %2520  ;;  %v2580_v28 = vpop.permute.xlu0 %2579 }
 0x4ce   : > { %3682 = vst [vmem:[#allocation1 + $0x10] ss:$2 sm:$0xff] %v3675_v63  ;;  %v2526_v53 = vsel %vm6933_vm13, %v2519_v24, %v2521_v48  ;;  %v2527_v52 = vsel %vm6934_vm9, %v2521_v48, %v6242_v12  ;;  %v2587_v62 = vsel %vm712_vm6, %v6324_v11, %v2580_v28  ;;  %v2588_v43 = vsel %vm712_vm6, %v2580_v28, %v6353_v25  ;;  %vm6951_vm13 = vmmov %vm6949_vm2 }
 0x4cf   : > { %2534 = vst [vmem:[#allocation4 + $0x158] sm:$0xf0] %v2526_v53  ;;  %v3737_v12 = vmul.f32 %v3731_v15, %v6235_v10  ;;  %vm6952_vm9 = vmmov %vm6949_vm2 }
 0x4d0   : > { %v6419_v33 = vld.sshfl [vmem:[#allocation1 + $0x8] sm:$0xff pattern:$0x75316420]  ;;  %v6421_v17 = vld.sshfl [vmem:[#allocation1] sm:$0xff pattern:$0x75316420] }
 0x4d1   : > { %v2707_v54 = vpop.permute.xlu2 %2706  ;;  %3680 = vst [vmem:[#allocation1] ss:$2 sm:$0xff] %v3674_v51 }
 0x4d2   : > { %2535 = vst [vmem:[#allocation4 + $0x1c8] sm:$0xf0] %v2527_v52 }
 0x4d3   : > { %2595 = vst [vmem:[#allocation4 + $0x188] sm:$0xf] %v2587_v62  ;;  %3218 = vrot.lane.b32.xlu1 %v6198_v27, %s6928_s28  ;;  %3216 = vrot.lane.b32.xlu0 %v6200_v45, %s6928_s28  ;;  %v6938_v45 = vld [vmem:[#allocation14_spill] sm:$0xff] }
 0x4d4   : > { %2596 = vst [vmem:[#allocation4 + $0x98] sm:$0xf] %v2588_v43  ;;  %3214 = vrot.lane.b32.xlu2 %v6220_v8, %s6928_s28  ;;  %v6939_v8 = vrot.slane %v6938_v45, 4 }
 0x4d5   : > { %v6448_v11 = vld.sshfl [vmem:[#allocation1 + $0x18] sm:$0xff pattern:$0x75316420]  ;;  %v6450_v25 = vld.sshfl [vmem:[#allocation1 + $0x10] sm:$0xff pattern:$0x75316420]  ;;  %v2642_v36 = vpop.permute.xlu1 %2641  ;;  %v2650_v21 = vpop.permute.xlu0 %2649 }
 0x4d6   : > { %v2654_v27 = vsel %vm6937_vm14, %v6407_v4, %v2650_v21  ;;  %3746 = vst [vmem:[#allocation1 + $0x11] ss:$2 sm:$0xff] %v5807_v18  ;;  %v3795_v24 = vsel %vm812_vm15, %v6939_v8, %v6938_v45  ;;  %vm6942_vm15 = vmmov %vm6937_vm14  ;;  %vm6953_vm14 = vcmask 515072  }
 0x4d7   : > { %2662 = vst [vmem:[#allocation4 + $0x1d0] sm:$0xf0] %v2654_v27  ;;  %v3801_v42 = vmul.f32 %v3795_v24, %v6235_v10  ;;  %v6943_v10 = vld [vmem:[#allocation15_spill] sm:$0xff] }
 0x4d8   : > { %v6452_v57 = vld.sshfl [vmem:[#allocation1 + $0x8] sm:$0xff pattern:$0x75316420]  ;;  %v6454_v16 = vld.sshfl [vmem:[#allocation1] sm:$0xff pattern:$0x75316420] }
 0x4d9   : > { %v2777_v35 = vpop.permute.xlu2 %2776  ;;  %3744 = vst [vmem:[#allocation1 + $0x1] ss:$2 sm:$0xff] %v3737_v12 }
 0x4db   : > { %3381 = vrot.lane.b32.xlu1 %v6089_v9, %s4189_s12  ;;  %3280 = vrot.lane.b32.xlu0 %v6230_v40, %s6940_s14 }
 0x4dc   : > { %3284 = vrot.lane.b32.xlu2 %v6058_v44, %s6940_s14 }
 0x4dd   : > { %v2705_v59 = vpop.permute.xlu1 %2704  ;;  %v2644_v2 = vpop.permute.xlu0 %2643  ;;  %v6476_v9 = vld.sshfl [vmem:[#allocation1 + $0x18] sm:$0xff pattern:$0x75316420]  ;;  %v6478_v40 = vld.sshfl [vmem:[#allocation1 + $0x10] sm:$0xff pattern:$0x75316420] }
 0x4de   : > { %v2714_v20 = vsel %vm6941_vm10, %v2705_v59, %v2707_v54  ;;  %v2651_v55 = vsel %vm6942_vm15, %v2642_v36, %v2644_v2  ;;  %3809 = vst [vmem:[#allocation1 + $0x10] ss:$2 sm:$0xff] %v6943_v10  ;;  %vm6954_vm10 = vmmov %vm6953_vm14  ;;  %vm6955_vm15 = vcmask 457728  }
 0x4df   : > { %2722 = vst [vmem:[#allocation4 + $0x180] sm:$0xf] %v2714_v20 }
 0x4e0   : > { %v6470_v49 = vld.sshfl [vmem:[#allocation1] sm:$0xff pattern:$0x75316420]  ;;  %v6472_v18 = vld.sshfl [vmem:[#allocation1 + $0x8] sm:$0xff pattern:$0x75316420] }
 0x4e1   : > { %v2771_v63 = vpop.permute.xlu2 %2770  ;;  %3807 = vst [vmem:[#allocation1] ss:$2 sm:$0xff] %v3801_v42 }
 0x4e2   : > { %2659 = vst [vmem:[#allocation4 + $0x188] sm:$0xf0] %v2651_v55 }
 0x4e3   : > { %3282 = vrot.lane.b32.xlu1 %v6232_v38, %s6940_s14  ;;  %3375 = vrot.lane.b32.xlu0 %v6306_v22, %s4189_s12 }
 0x4e4   : > { %3444 = vrot.lane.b32.xlu2 %v6120_v34, %s4190_s13 }
 0x4e5   : > { %v2709_v44 = vpop.permute.xlu1 %2708  ;;  %v2713_v51 = vpop.permute.xlu0 %2712 }
 0x4e6   : > { %v2715_v48 = vsel %vm6944_vm3, %v2707_v54, %v2709_v44  ;;  %vm6957_vm3 = vcmask 506880  }
 0x4e7   : > { %2723 = vst [vmem:[#allocation4 + $0x1a0] sm:$0xf] %v2715_v48 }
 0x4e9   : > { %v6488_v28 = vpop.permute.xlu2 %2835 }
 0x4eb   : > { %3379 = vrot.lane.b32.xlu0 %v6286_v0, %s4189_s12  ;;  %3436 = vrot.lane.b32.xlu1 %v6337_v31, %s4190_s13 }
 0x4ec   : > { %3373 = vrot.lane.b32.xlu2 %v6308_v41, %s4189_s12 }
 0x4ed   : > { %v2711_v38 = vpop.permute.xlu1 %2710  ;;  %v2646_v22 = vpop.permute.xlu0 %2645 }
 0x4ee   : > { %v2716_v34 = vsel %vm6945_vm7, %v2709_v44, %v2711_v38  ;;  %v2717_v53 = vsel %vm6946_vm4, %v2711_v38, %v2713_v51  ;;  %v2652_v52 = vsel %vm6947_vm8, %v2644_v2, %v2646_v22  ;;  %v2653_v0 = vsel %vm6948_vm0, %v2646_v22, %v6407_v4  ;;  %vm6958_vm7 = vmmov %vm6957_vm3 }
 0x4ef   : > { %2724 = vst [vmem:[#allocation4 + $0x90] sm:$0xf] %v2716_v34  ;;  %vm6959_vm4 = vmmov %vm6954_vm10 }
 0x4f0   : > { %2725 = vst [vmem:[#allocation4 + $0x1a8] sm:$0xf] %v2717_v53  ;;  %vm6960_vm8 = vmmov %vm6959_vm4  ;;  %v3815_v53 = vld.sshfl [vmem:[#allocation1 + $0x18] sm:$0xff pattern:$0x75316420] }
 0x4f1   : > { %v6499_v62 = vpop.permute.xlu2 %2895  ;;  %2660 = vst [vmem:[#allocation4 + $0x98] sm:$0xf0] %v2652_v52  ;;  %vm6961_vm0 = vmmov %vm6955_vm15  ;;  %v3812_v52 = vld.sshfl [vmem:[#allocation1] sm:$0xff pattern:$0x75316420] }
 0x4f2   : > { %2661 = vst [vmem:[#allocation4 + $0x100] sm:$0xf0] %v2653_v0 }
 0x4f3   : > { %3442 = vrot.lane.b32.xlu1 %v6329_v32, %s4190_s13  ;;  %3440 = vrot.lane.b32.xlu0 %v6333_v61, %s4190_s13 }
 0x4f4   : > { %3508 = vrot.lane.b32.xlu2 %v6151_v6, %s4191_s18 }
 0x4f5   : > { %v2840_v41 = vpop.permute.xlu1 %2839  ;;  %v2769_v31 = vpop.permute.xlu0 %2768 }
 0x4f6   : > { %v2778_v54 = vsel %vm6949_vm2, %v2769_v31, %v2771_v63  ;;  %vm6962_vm2 = vmmov %vm6957_vm3 }
 0x4f7   : > { %2786 = vst [vmem:[#allocation4 + $0x180] sm:$0xf0] %v2778_v54 }
 0x4f9   : > { %v2902_v43 = vpop.permute.xlu2 %2901 }
 0x4fb   : > { %3502 = vrot.lane.b32.xlu1 %v6369_v50, %s4191_s18  ;;  %3500 = vrot.lane.b32.xlu0 %v6371_v47, %s4191_s18 }
 0x4fc   : > { %3377 = vrot.lane.b32.xlu2 %v6295_v29, %s4189_s12 }
 0x4fd   : > { %v2775_v32 = vpop.permute.xlu1 %2774  ;;  %v2773_v61 = vpop.permute.xlu0 %2772 }
 0x4fe   : > { %v2781_v4 = vsel %vm6950_vm12, %v2775_v32, %v2777_v35  ;;  %v2779_v6 = vsel %vm6951_vm13, %v2771_v63, %v2773_v61  ;;  %v2780_v39 = vsel %vm6952_vm9, %v2773_v61, %v2775_v32  ;;  %vm6963_vm12 = vmmov %vm6962_vm2 }
 0x4ff   : > { %2789 = vst [vmem:[#allocation4 + $0x1a8] sm:$0xf0] %v2781_v4  ;;  %vm6964_vm13 = vmmov %vm6961_vm0 }
 0x500   : > { %2787 = vst [vmem:[#allocation4 + $0x1a0] sm:$0xf0] %v2779_v6  ;;  %vm6965_vm9 = vmmov %vm6961_vm0  ;;  %v6973_v6 = vld [vmem:[#allocation21_spill] sm:$0xff] }
 0x501   : > { %v2961_v19 = vpop.permute.xlu2 %2960  ;;  %2788 = vst [vmem:[#allocation4 + $0x90] sm:$0xf0] %v2780_v39  ;;  %v6974_v39 = vld [vmem:[#allocation22_spill] sm:$0xff] }
 0x503   : > { %3506 = vrot.lane.b32.xlu1 %v6360_v7, %s4191_s18  ;;  %3504 = vrot.lane.b32.xlu0 %v6362_v37, %s4191_s18 }
 0x504   : > { %3438 = vrot.lane.b32.xlu2 %v6343_v14, %s4190_s13  ;;  %v6956_v14 = vld [vmem:[#allocation20_spill] sm:$0xff] }
 0x505   : > { %v2834_v29 = vpop.permute.xlu1 %2833  ;;  %v2832_v50 = vpop.permute.xlu0 %2831 }
 0x506   : > { %v2842_v47 = vsel %vm6953_vm14, %v2834_v29, %v6488_v28  ;;  %v2841_v15 = vsel %vm6954_vm10, %v2832_v50, %v2834_v29  ;;  %vm6966_vm14 = vcmask 441344  }
 0x507   : > { %2850 = vst [vmem:[#allocation4 + $0x170] sm:$0xf] %v2842_v47  ;;  %vm6967_vm10 = vmmov %vm6966_vm14 }
 0x508   : > { %2849 = vst [vmem:[#allocation4 + $0xe8] sm:$0xf] %v2841_v15 }
 0x509   : > { %v2963_v12 = vpop.permute.xlu2 %2962 }
 0x50a   : > { %v2969_v36 = vsel %vm6955_vm15, %v2961_v19, %v2963_v12  ;;  %vm6968_vm15 = vcmask 392192  }
 0x50b   : > { %2977 = vst [vmem:[#allocation4 + $0x198] sm:$0xf] %v2969_v36  ;;  %3565 = vrot.lane.b32.xlu1 %v6398_v3, %s4192_s25  ;;  %3563 = vrot.lane.b32.xlu0 %v6400_v58, %s4192_s25  ;;  %v6978_v36 = vld [vmem:[#allocation19_spill] sm:$0xff] }
 0x50c   : > { %3571 = vrot.lane.b32.xlu2 %v6956_v14, %s4192_s25 }
 0x50d   : > { %v2967_v7 = vpop.permute.xlu1 %2966  ;;  %v2904_v37 = vpop.permute.xlu0 %2903 }
 0x50e   : > { %v2908_v21 = vsel %vm6957_vm3, %v2902_v43, %v2904_v37  ;;  %vm6969_vm3 = vcmask 449536  }
 0x50f   : > { %2916 = vst [vmem:[#allocation4 + $0x68] sm:$0xf0] %v2908_v21 }
 0x511   : > { %v6536_v27 = vpop.permute.xlu2 %3026 }
 0x513   : > { %3569 = vrot.lane.b32.xlu1 %v6387_v26, %s4192_s25  ;;  %3567 = vrot.lane.b32.xlu0 %v6390_v5, %s4192_s25 }
 0x514   : > { %3635 = vrot.lane.b32.xlu2 %v6212_v13, %s6854_s20 }
 0x515   : > { %v2900_v3 = vpop.permute.xlu1 %2899  ;;  %v2838_v58 = vpop.permute.xlu0 %2837 }
 0x516   : > { %v2907_v35 = vsel %vm6958_vm7, %v2900_v3, %v2902_v43  ;;  %v2843_v45 = vsel %vm6959_vm4, %v6488_v28, %v2838_v58  ;;  %v2844_v8 = vsel %vm6960_vm8, %v2838_v58, %v2840_v41  ;;  %vm6970_vm7 = vmmov %vm6969_vm3  ;;  %v3814_v43 = vld.sshfl [vmem:[#allocation1 + $0x10] sm:$0xff pattern:$0x75316420] }
 0x517   : > { %2915 = vst [vmem:[#allocation4 + $0xa0] sm:$0xf0] %v2907_v35  ;;  %vm6971_vm4 = vmmov %vm6968_vm15  ;;  %v6982_v35 = vld [vmem:[#allocation16_spill] sm:$0xff] }
 0x518   : > { %2851 = vst [vmem:[#allocation4 + $0xa0] sm:$0xf] %v2843_v45 }
 0x519   : > { %v3092_v24 = vpop.permute.xlu2 %3091  ;;  %2852 = vst [vmem:[#allocation4 + $0x68] sm:$0xf] %v2844_v8 }
 0x51b   : > { %3629 = vrot.lane.b32.xlu0 %v6419_v33, %s6854_s20  ;;  %3633 = vrot.lane.b32.xlu1 %v6426_v46, %s6854_s20 }
 0x51c   : > { %3698 = vrot.lane.b32.xlu2 %v6248_v60, %s6861_s27 }
 0x51d   : > { %v2959_v13 = vpop.permute.xlu1 %2958  ;;  %v2898_v26 = vpop.permute.xlu0 %2897 }
 0x51e   : > { %v2968_v5 = vsel %vm6961_vm0, %v2959_v13, %v2961_v19  ;;  %v2905_v42 = vsel %vm6962_vm2, %v6499_v62, %v2898_v26  ;;  %v2906_v59 = vsel %vm6963_vm12, %v2898_v26, %v2900_v3  ;;  %vm6981_vm12 = vcmask 1031168  }
 0x51f   : > { %2976 = vst [vmem:[#allocation4 + $0x1e0] sm:$0xf] %v2968_v5 }
 0x520   : > { %2913 = vst [vmem:[#allocation4 + $0xe8] sm:$0xf0] %v2905_v42 }
 0x521   : > { %v3221_v2 = vpop.permute.xlu2 %3220  ;;  %2914 = vst [vmem:[#allocation4 + $0x170] sm:$0xf0] %v2906_v59 }
 0x523   : > { %3631 = vrot.lane.b32.xlu0 %v6428_v23, %s6854_s20  ;;  %3696 = vrot.lane.b32.xlu1 %v6448_v11, %s6861_s27 }
 0x524   : > { %3627 = vrot.lane.b32.xlu2 %v6421_v17, %s6854_s20 }
 0x525   : > { %v3031_v60 = vpop.permute.xlu1 %3030  ;;  %v2965_v33 = vpop.permute.xlu0 %2964 }
 0x526   : > { %v2970_v46 = vsel %vm6964_vm13, %v2963_v12, %v2965_v33  ;;  %v2971_v20 = vsel %vm6965_vm9, %v2965_v33, %v2967_v7  ;;  %vm6983_vm13 = vmmov %vm6981_vm12 }
 0x527   : > { %2978 = vst [vmem:[#allocation4 + $0x1c0] sm:$0xf] %v2970_v46  ;;  %vm6984_vm9 = vmmov %vm6981_vm12 }
 0x528   : > { %2979 = vst [vmem:[#allocation4 + $0xc8] sm:$0xf] %v2971_v20 }
 0x529   : > { %v3156_v55 = vpop.permute.xlu2 %3155 }
 0x52b   : > { %3692 = vrot.lane.b32.xlu0 %v6452_v57, %s6861_s27  ;;  %3754 = vrot.lane.b32.xlu1 %v6470_v49, %s6868_s8 }
 0x52c   : > { %3762 = vrot.lane.b32.xlu2 %v6302_v1, %s6868_s8 }
 0x52d   : > { %v6572_v23 = vpop.permute.xlu1 %3089  ;;  %v3094_v17 = vpop.permute.xlu0 %3093 }
 0x52e   : > { %v3097_v11 = vsel %vm6966_vm14, %v6572_v23, %v3092_v24  ;;  %v3098_v63 = vsel %vm6967_vm10, %v3092_v24, %v3094_v17  ;;  %vm6985_vm14 = vmmov %vm6984_vm9  ;;  %vm6986_vm10 = vcmask 982016  }
 0x52f   : > { %3105 = vst [vmem:[#allocation4 + $0x88] sm:$0xf] %v3097_v11 }
 0x530   : > { %3106 = vst [vmem:[#allocation4 + $0x18] sm:$0xf] %v3098_v63 }
 0x531   : > { %v3215_v10 = vpop.permute.xlu2 %3214 }
 0x533   : > { %3694 = vrot.lane.b32.xlu0 %v6450_v25, %s6861_s27  ;;  %3760 = vrot.lane.b32.xlu1 %v6476_v9, %s6868_s8  ;;  %v3813_v25 = vld.sshfl [vmem:[#allocation1 + $0x8] sm:$0xff pattern:$0x75316420] }
 0x534   : > { %3690 = vrot.lane.b32.xlu2 %v6454_v16, %s6861_s27  ;;  %v3816_v16 = vld.sshfl [vmem:[#allocation1 + $0x20] sm:$0xff pattern:$0x75316420] }
 0x535   : > { %v6583_v1 = vpop.permute.xlu1 %3153  ;;  %v3029_v57 = vpop.permute.xlu0 %3028 }
 0x536   : > { %v3161_v49 = vsel %vm6968_vm15, %v6583_v1, %v3156_v55  ;;  %v3034_v44 = vsel %vm6969_vm3, %v6536_v27, %v3029_v57  ;;  %v3035_v51 = vsel %vm6970_vm7, %v3029_v57, %v3031_v60  ;;  %vm6987_vm15 = vmmov %vm6986_vm10 }
 0x537   : > { %3169 = vst [vmem:[#allocation4 + $0x88] sm:$0xf0] %v3161_v49  ;;  %vm6988_vm3 = vmmov %vm6986_vm10 }
 0x538   : > { %3042 = vst [vmem:[#allocation4 + $0x1c0] sm:$0xf0] %v3034_v44  ;;  %vm6989_vm7 = vmmov %vm6988_vm3 }
 0x539   : > { %v3285_v48 = vpop.permute.xlu2 %3284  ;;  %3043 = vst [vmem:[#allocation4 + $0xc8] sm:$0xf0] %v3035_v51 }
 0x53b   : > { %3758 = vrot.lane.b32.xlu0 %v6478_v40, %s6868_s8  ;;  %3819 = vrot.lane.b32.xlu1 %v3813_v25, %s6872_s24 }
 0x53c   : > { %3825 = vrot.lane.b32.xlu2 %v3816_v16, %s6872_s24 }
 0x53d   : > { %v3213_v9 = vpop.permute.xlu1 %3212  ;;  %v3158_v28 = vpop.permute.xlu0 %3157 }
 0x53e   : > { %v3222_v38 = vsel %vm1375_vm5, %v3213_v9, %v3215_v10  ;;  %v3162_v22 = vsel %vm6971_vm4, %v3156_v55, %v3158_v28  ;;  %vm6990_vm4 = vcmask 965632  }
 0x53f   : > { %3230 = vst [vmem:[#allocation4 + $0x10] sm:$0xf] %v3222_v38 }
 0x540   : > { %3170 = vst [vmem:[#allocation4 + $0x18] sm:$0xf0] %v3162_v22 }
 0x541   : > { %v3445_v34 = vpop.permute.xlu2 %3444 }
 0x543   : > { %3823 = vrot.lane.b32.xlu1 %v3815_v53, %s6872_s24  ;;  %3817 = vrot.lane.b32.xlu0 %v3812_v52, %s6872_s24 }
 0x544   : > { %3756 = vrot.lane.b32.xlu2 %v6472_v18, %s6868_s8  ;;  %v6972_v18 = vld [vmem:[#allocation18_spill] sm:$0xff] }
 0x545   : > { %v3219_v40 = vpop.permute.xlu1 %3218  ;;  %v3217_v62 = vpop.permute.xlu0 %3216 }
 0x546   : > { %v3225_v0 = vsel %vm1375_vm5, %v3219_v40, %v3221_v2  ;;  %v3223_v41 = vsel %vm1375_vm5, %v3215_v10, %v3217_v62  ;;  %v3224_v31 = vsel %vm1375_vm5, %v3217_v62, %v3219_v40  ;;  %vm6975_vm5 = vcmask 1039360  }
 0x547   : > { %3233 = vst [vmem:[#allocation4 + $0x70] sm:$0xf] %v3225_v0  ;;  %vm6976_vm8 = vmmov %vm6975_vm5 }
 0x548   : > { %3231 = vst [vmem:[#allocation4 + $0x30] sm:$0xf] %v3223_v41  ;;  %vm6979_vm0 = vmmov %vm6975_vm5 }
 0x549   : > { %v3374_v54 = vpop.permute.xlu2 %3373  ;;  %3232 = vst [vmem:[#allocation4 + $0x178] sm:$0xf] %v3224_v31  ;;  %vm6980_vm2 = vmmov %vm6979_vm0 }
 0x54b   : > { %3278 = vrot.lane.b32.xlu1 %v6254_v30, %s6940_s14  ;;  %3821 = vrot.lane.b32.xlu0 %v3814_v43, %s6872_s24 }
 0x54c   : > { %3085 = vrot.lane.b32.xlu2 %v6972_v18, %s6922_s29 }
 0x54d   : > { %v3382_v32 = vpop.permute.xlu1 %3381  ;;  %v6608_v61 = vpop.permute.xlu0 %3280 }
 0x551   : > { %v3509_v4 = vpop.permute.xlu2 %3508 }
 0x553   : > { %3149 = vrot.lane.b32.xlu1 %v6973_v6, %s6927_s17  ;;  %3276 = vrot.lane.b32.xlu0 %v6252_v56, %s6940_s14  ;;  %v6977_v56 = vld [vmem:[#allocation17_spill] sm:$0xff] }
 0x554   : > { %3151 = vrot.lane.b32.xlu2 %v6974_v39, %s6927_s17 }
 0x555   : > { %v3283_v19 = vpop.permute.xlu1 %3282  ;;  %v3376_v30 = vpop.permute.xlu0 %3375 }
 0x556   : > { %v3288_v29 = vsel %vm1442_vm11, %v6608_v61, %v3283_v19  ;;  %v3289_v50 = vsel %vm1442_vm11, %v3283_v19, %v3285_v48  ;;  %v3383_v47 = vsel %vm6975_vm5, %v3374_v54, %v3376_v30  ;;  %vm6991_vm5 = vmmov %vm6990_vm4 }
 0x557   : > { %3296 = vst [vmem:[#allocation4 + $0x178] sm:$0xf0] %v3288_v29 }
 0x558   : > { %3297 = vst [vmem:[#allocation4 + $0x70] sm:$0xf0] %v3289_v50 }
 0x559   : > { %v3378_v15 = vpop.permute.xlu2 %3377  ;;  %3391 = vst [vmem:[#allocation4 + $0x58] sm:$0xf0] %v3383_v47 }
 0x55a   : > { %v3384_v12 = vsel %vm6976_vm8, %v3376_v30, %v3378_v15  ;;  %vm6992_vm8 = vmmov %vm6990_vm4 }
 0x55b   : > { %3392 = vst [vmem:[#allocation4 + $0x28] sm:$0xf0] %v3384_v12  ;;  %3024 = vrot.lane.b32.xlu1 %v6977_v56, %s6918_s26  ;;  %3087 = vrot.lane.b32.xlu0 %v6978_v36, %s6922_s29 }
 0x55d   : > { %v3437_v14 = vpop.permute.xlu1 %3436  ;;  %v3380_v7 = vpop.permute.xlu0 %3379 }
 0x55e   : > { %v3385_v37 = vsel %vm6979_vm0, %v3378_v15, %v3380_v7  ;;  %v3386_v21 = vsel %vm6980_vm2, %v3380_v7, %v3382_v32  ;;  %vm6994_vm0 = vcmask 908288  }
 0x55f   : > { %3393 = vst [vmem:[#allocation4 + $0x48] sm:$0xf0] %v3385_v37  ;;  %vm6995_vm2 = vmmov %vm6994_vm0 }
 0x560   : > { %3394 = vst [vmem:[#allocation4 + $0x168] sm:$0xf0] %v3386_v21 }
 0x561   : > { %v3439_v3 = vpop.permute.xlu2 %3438 }
 0x562   : > { %v3446_v58 = vsel %vm6981_vm12, %v3437_v14, %v3439_v3  ;;  %vm6996_vm12 = vmmov %vm6994_vm0 }
 0x563   : > { %3454 = vst [vmem:[#allocation4 + $0x110] sm:$0xf] %v3446_v58  ;;  %3022 = vrot.lane.b32.xlu0 %v6982_v35, %s6918_s26 }
 0x565   : > { %v3443_v45 = vpop.permute.xlu1 %3442  ;;  %v3441_v8 = vpop.permute.xlu0 %3440 }
 0x566   : > { %v3449_v24 = vsel %vm6983_vm13, %v3443_v45, %v3445_v34  ;;  %v3447_v13 = vsel %vm6984_vm9, %v3439_v3, %v3441_v8  ;;  %v3448_v26 = vsel %vm6985_vm14, %v3441_v8, %v3443_v45  ;;  %vm6997_vm13 = vmmov %vm6994_vm0  ;;  %vm6998_vm9 = vcmask 392192  }
 0x567   : > { %3457 = vst [vmem:[#allocation4 + $0x130] sm:$0xf] %v3449_v24 }
 0x568   : > { %3455 = vst [vmem:[#allocation4 + $0x118] sm:$0xf] %v3447_v13 }
 0x569   : > { %v3572_v5 = vpop.permute.xlu2 %3571  ;;  %3456 = vst [vmem:[#allocation4 + $0x8] sm:$0xf] %v3448_v26 }
 0x56d   : > { %v3503_v42 = vpop.permute.xlu1 %3502  ;;  %v3501_v59 = vpop.permute.xlu0 %3500 }
 0x56e   : > { %v3510_v2 = vsel %vm6986_vm10, %v3501_v59, %v3503_v42 }
 0x56f   : > { %3518 = vst [vmem:[#allocation4 + $0x110] sm:$0xf0] %v3510_v2 }
 0x571   : > { %v3636_v60 = vpop.permute.xlu2 %3635 }
 0x575   : > { %v3507_v33 = vpop.permute.xlu1 %3506  ;;  %v3505_v46 = vpop.permute.xlu0 %3504 }
 0x576   : > { %v3513_v20 = vsel %vm6987_vm15, %v3507_v33, %v3509_v4  ;;  %v3511_v55 = vsel %vm6988_vm3, %v3503_v42, %v3505_v46  ;;  %v3512_v17 = vsel %vm6989_vm7, %v3505_v46, %v3507_v33  ;;  %vm7003_vm3 = vmmov %vm6998_vm9  ;;  %vm7005_vm7 = vcmask 441344  }
 0x577   : > { %3521 = vst [vmem:[#allocation4 + $0x130] sm:$0xf0] %v3513_v20 }
 0x578   : > { %3519 = vst [vmem:[#allocation4 + $0x118] sm:$0xf0] %v3511_v55  ;;  %v3879_v55 = vld [vmem:[#allocation4 + $0x168] sm:$0xff] }
 0x579   : > { %v3699_v11 = vpop.permute.xlu2 %3698  ;;  %3520 = vst [vmem:[#allocation4 + $0x8] sm:$0xf0] %v3512_v17  ;;  %v3876_v17 = vld [vmem:[#allocation4 + $0x58] sm:$0xff] }
 0x57d   : > { %v3566_v63 = vpop.permute.xlu1 %3565  ;;  %v3564_v10 = vpop.permute.xlu0 %3563 }
 0x57e   : > { %v3573_v57 = vsel %vm579_vm1, %v3564_v10, %v3566_v63  ;;  %v3875_v10 = vld [vmem:[#allocation4 + $0x70] sm:$0xff] }
 0x57f   : > { %3581 = vst [vmem:[#allocation4 + $0x138] sm:$0xf] %v3573_v57 }
 0x581   : > { %v3628_v49 = vpop.permute.xlu2 %3627 }
 0x585   : > { %v3570_v44 = vpop.permute.xlu1 %3569  ;;  %v3568_v51 = vpop.permute.xlu0 %3567 }
 0x586   : > { %v3576_v48 = vsel %vm579_vm1, %v3570_v44, %v3572_v5  ;;  %v3574_v25 = vsel %vm579_vm1, %v3566_v63, %v3568_v51  ;;  %v3575_v16 = vsel %vm579_vm1, %v3568_v51, %v3570_v44  ;;  %vm6993_vm1 = vmmov %vm6990_vm4  ;;  %v3871_v44 = vld [vmem:[#allocation4 + $0x18] sm:$0xff] }
 0x587   : > { %3584 = vst [vmem:[#allocation4 + $0x160] sm:$0xf] %v3576_v48 }
 0x588   : > { %3582 = vst [vmem:[#allocation4 + $0x1d8] sm:$0xf] %v3574_v25  ;;  %v3867_v25 = vld [vmem:[#allocation4 + $0xc8] sm:$0xff] }
 0x589   : > { %v3763_v9 = vpop.permute.xlu2 %3762  ;;  %3583 = vst [vmem:[#allocation4 + $0x60] sm:$0xf] %v3575_v16 }
 0x58d   : > { %v3634_v28 = vpop.permute.xlu1 %3633  ;;  %v3630_v38 = vpop.permute.xlu0 %3629 }
 0x58e   : > { %v3640_v22 = vsel %vm6990_vm4, %v3634_v28, %v3636_v60  ;;  %v3637_v34 = vsel %vm6991_vm5, %v3628_v49, %v3630_v38  ;;  %v3880_v60 = vld [vmem:[#allocation4 + $0x110] sm:$0xff]  ;;  %vm7006_vm4 = vmmov %vm7005_vm7 }
 0x58f   : > { %3648 = vst [vmem:[#allocation4 + $0x160] sm:$0xf0] %v3640_v22 }
 0x590   : > { %3645 = vst [vmem:[#allocation4 + $0x138] sm:$0xf0] %v3637_v34  ;;  %v3882_v34 = vld [vmem:[#allocation4 + $0x8] sm:$0xff] }
 0x591   : > { %v3691_v53 = vpop.permute.xlu2 %3690 }
 0x595   : > { %v3697_v52 = vpop.permute.xlu1 %3696  ;;  %v3632_v40 = vpop.permute.xlu0 %3631 }
 0x596   : > { %v3703_v62 = vsel %vm712_vm6, %v3697_v52, %v3699_v11  ;;  %v3638_v0 = vsel %vm6992_vm8, %v3630_v38, %v3632_v40  ;;  %v3639_v41 = vsel %vm6993_vm1, %v3632_v40, %v3634_v28  ;;  %v3887_v42 = vld [vmem:[#allocation4 + $0x160] sm:$0xff]  ;;  %v3904_v38 = vld [vmem:[%s6690_s5] sm:$0xff] }
 0x597   : > { %3711 = vst [vmem:[#allocation4 + $0x40] sm:$0xf] %v3703_v62  ;;  %v3884_v59 = vld [vmem:[#allocation4 + $0x138] sm:$0xff]  ;;  %v3863_v40 = vld [vmem:[#allocation4 + $0x68] sm:$0xff]  ;;  %3907 = vperm.xlu2 %4162, %v3904_v38  }
 0x598   : > { %3646 = vst [vmem:[#allocation4 + $0x1d8] sm:$0xf0] %v3638_v0  ;;  %v3877_v0 = vld [vmem:[#allocation4 + $0x28] sm:$0xff] }
 0x599   : > { %v3826_v31 = vpop.permute.xlu2 %3825  ;;  %3647 = vst [vmem:[#allocation4 + $0x60] sm:$0xf0] %v3639_v41  ;;  %v3878_v41 = vld [vmem:[#allocation4 + $0x48] sm:$0xff] }
 0x59d   : > { %v3755_v54 = vpop.permute.xlu1 %3754  ;;  %v3693_v43 = vpop.permute.xlu0 %3692 }
 0x59e   : > { %v3700_v18 = vsel %vm712_vm6, %v3691_v53, %v3693_v43 }
 0x59f   : > { %3708 = vst [vmem:[#allocation4 + $0xf8] sm:$0xf] %v3700_v18  ;;  %v3885_v51 = vld [vmem:[#allocation4 + $0x1d8] sm:$0xff]  ;;  %v3851_v18 = vld [vmem:[#allocation4 + $0x1c8] sm:$0xff] }
 0x5a0   : > { %v3886_v48 = vld [vmem:[#allocation4 + $0x60] sm:$0xff] }
 0x5a1   : > { %v3757_v32 = vpop.permute.xlu2 %3756 }
 0x5a2   : > { %v3764_v4 = vsel %vm6994_vm0, %v3755_v54, %v3757_v32  ;;  %v3874_v54 = vld [vmem:[#allocation4 + $0x178] sm:$0xff] }
 0x5a3   : > { %3772 = vst [vmem:[#allocation4 + $0xf8] sm:$0xf0] %v3764_v4  ;;  %v3866_v4 = vld [vmem:[#allocation4 + $0x1c0] sm:$0xff] }
 0x5a5   : > { %v3761_v6 = vpop.permute.xlu1 %3760  ;;  %v3695_v39 = vpop.permute.xlu0 %3694 }
 0x5a6   : > { %v3767_v19 = vsel %vm6995_vm2, %v3761_v6, %v3763_v9  ;;  %v3701_v30 = vsel %vm712_vm6, %v3693_v43, %v3695_v39  ;;  %v3702_v29 = vsel %vm712_vm6, %v3695_v39, %v3697_v52  ;;  %vm6999_vm6 = vcmask 900096   ;;  %v3881_v9 = vld [vmem:[#allocation4 + $0x118] sm:$0xff]  ;;  %v3855_v43 = vld [vmem:[#allocation4 + $0x1d0] sm:$0xff]  ;;  %v3847_v39 = vld [vmem:[#allocation4 + $0xe0] sm:$0xff] }
 0x5a7   : > { %3775 = vst [vmem:[#allocation4 + $0x40] sm:$0xf0] %v3767_v19  ;;  %vm7000_vm14 = vmmov %vm6999_vm6 }
 0x5a8   : > { %3709 = vst [vmem:[#allocation4 + $0x1b0] sm:$0xf] %v3701_v30  ;;  %vm7001_vm10 = vmmov %vm6999_vm6 }
 0x5a9   : > { %v6651_v50 = vpop.permute.xlu2 %3085  ;;  %3710 = vst [vmem:[#allocation4 + $0x1f8] sm:$0xf] %v3702_v29  ;;  %vm7002_vm15 = vmmov %vm6999_vm6  ;;  %v3862_v29 = vld [vmem:[#allocation4 + $0xa0] sm:$0xff] }
 0x5aa   : > { %v3888_v5 = vld [vmem:[#allocation4 + $0xf8] sm:$0xff] }
 0x5ad   : > { %v3820_v47 = vpop.permute.xlu1 %3819  ;;  %v3759_v15 = vpop.permute.xlu0 %3758 }
 0x5ae   : > { %v3765_v12 = vsel %vm6996_vm12, %v3757_v32, %v3759_v15  ;;  %v3766_v56 = vsel %vm6997_vm13, %v3759_v15, %v3761_v6  ;;  %v3891_v26 = vld [vmem:[#allocation4 + $0x40] sm:$0xff] }
 0x5af   : > { %3773 = vst [vmem:[#allocation4 + $0x1b0] sm:$0xf0] %v3765_v12  ;;  %v3858_v12 = vld [vmem:[#allocation4 + $0x90] sm:$0xff] }
 0x5b0   : > { %3774 = vst [vmem:[#allocation4 + $0x1f8] sm:$0xf0] %v3766_v56  ;;  %v3861_v56 = vld [vmem:[#allocation4 + $0x170] sm:$0xff] }
 0x5b1   : > { %v3152_v36 = vpop.permute.xlu2 %3151 }
 0x5b2   : > { %v3160_v14 = vsel %vm6998_vm9, %v3152_v36, %v6583_v1 }
 0x5b3   : > { %3168 = vst [vmem:[#allocation4 + $0x190] sm:$0xf0] %v3160_v14  ;;  %v3857_v14 = vld [vmem:[#allocation4 + $0x1a0] sm:$0xff] }
 0x5b5   : > { %v3824_v7 = vpop.permute.xlu1 %3823  ;;  %v3818_v37 = vpop.permute.xlu0 %3817 }
 0x5b6   : > { %v3830_v21 = vsel %vm6999_vm6, %v3824_v7, %v3826_v31  ;;  %v3827_v3 = vsel %vm7000_vm14, %v3818_v37, %v3820_v47  ;;  %v3889_v57 = vld [vmem:[#allocation4 + $0x1b0] sm:$0xff] }
 0x5b7   : > { %3838 = vst [vmem:[#allocation4 + $0x1b8] sm:$0xf] %v3830_v21  ;;  %v3890_v49 = vld [vmem:[#allocation4 + $0x1f8] sm:$0xff] }
 0x5b8   : > { %3835 = vst [vmem:[#allocation4 + $0x50] sm:$0xf] %v3827_v3  ;;  %v3853_v21 = vld [vmem:[#allocation4 + $0x98] sm:$0xff] }
 0x5b9   : > { %v3846_v3 = vld [vmem:[#allocation4 + $0xd8] sm:$0xff] }
 0x5bd   : > { %v3279_v58 = vpop.permute.xlu1 %3278  ;;  %v3822_v35 = vpop.permute.xlu0 %3821 }
 0x5be   : > { %v3287_v45 = vsel %vm1442_vm11, %v3279_v58, %v6608_v61  ;;  %v3828_v8 = vsel %vm7001_vm10, %v3820_v47, %v3822_v35  ;;  %v3829_v24 = vsel %vm7002_vm15, %v3822_v35, %v3824_v7  ;;  %v3895_v1 = vld [vmem:[#allocation4 + $0x1b8] sm:$0xff]  ;;  %v3883_v61 = vld [vmem:[#allocation4 + $0x130] sm:$0xff]  ;;  %v3839_v47 = vld [vmem:[%s6689_s4] sm:$0xff] }
 0x5bf   : > { %3295 = vst [vmem:[#allocation4 + $0x30] sm:$0xf0] %v3287_v45  ;;  %v3892_v13 = vld [vmem:[#allocation4 + $0x50] sm:$0xff]  ;;  %3972 = vmatpush.msrb.mxu3 %v3895_v1  ;;  %v3850_v7 = vld [vmem:[#allocation4 + $0x158] sm:$0xff]  ;;  %v3849_v35 = vld [vmem:[#allocation4 + $0x148] sm:$0xff] }
 0x5c0   : > { %3836 = vst [vmem:[#allocation4 + $0x150] sm:$0xf] %v3828_v8  ;;  %3912 = vmatpush.msrb.mxu0 %v3892_v13  ;;  %v3842_v45 = vld [vmem:[#allocation4 + $0xa8] sm:$0xff]  ;;  %v3856_v8 = vld [vmem:[#allocation4 + $0x180] sm:$0xff]  ;;  %v3841_v13 = vld [vmem:[#allocation4 + $0xf0] sm:$0xff] }
 0x5c1   : > { %3837 = vst [vmem:[#allocation4 + $0x78] sm:$0xf] %v3829_v24  ;;  %3973 = vmatpush.msrb.mxu3 %v3891_v26  ;;  %v3845_v24 = vld [vmem:[#allocation4 + $0x128] sm:$0xff]  ;;  %v3848_v26 = vld [vmem:[#allocation4 + $0x20] sm:$0xff] }
 0x5c2   : > { %3913 = vmatpush.msrb.mxu0 %v3888_v5  ;;  %v3852_v1 = vld [vmem:[#allocation4 + $0x188] sm:$0xff]  ;;  %v3844_v5 = vld [vmem:[#allocation4 + $0x80] sm:$0xff] }
 0x5c3   : > { %3974 = vmatpush.msrb.mxu3 %v3887_v42  ;;  %v3840_v42 = vld [vmem:[#allocation4 + $0xc0] sm:$0xff] }
 0x5c4   : > { %3914 = vmatpush.msrb.mxu0 %v3884_v59 }
 0x5c5   : > { %3975 = vmatpush.msrb.mxu3 %v3883_v61  ;;  %v3150_v2 = vpop.permute.xlu1 %3149  ;;  %v3277_v33 = vpop.permute.xlu0 %3276 }
 0x5c6   : > { %v3159_v46 = vsel %vm7003_vm3, %v3150_v2, %v3152_v36  ;;  %3915 = vmatpush.msrb.mxu0 %v3880_v60  ;;  %v3286_v20 = vsel %vm1442_vm11, %v3277_v33, %v3279_v58  ;;  %vm7004_vm11 = vcmask 449536   ;;  %v3873_v31 = vld [vmem:[#allocation4 + $0x30] sm:$0xff]  ;;  %v3854_v36 = vld [vmem:[#allocation4 + $0x100] sm:$0xff]  ;;  %v3860_v58 = vld [vmem:[#allocation4 + $0xe8] sm:$0xff] }
 0x5c7   : > { %3167 = vst [vmem:[#allocation4 + $0x140] sm:$0xf0] %v3159_v46  ;;  %v3893_v11 = vld [vmem:[#allocation4 + $0x150] sm:$0xff]  ;;  %3976 = vmatpush.msrb.mxu3 %v3879_v55  ;;  %vm7007_vm5 = vmmov %vm7004_vm11 }
 0x5c8   : > { %3294 = vst [vmem:[#allocation4 + $0x10] sm:$0xf0] %v3286_v20  ;;  %3916 = vmatpush.msrb.mxu0 %v3876_v17  ;;  %3932 = vmatpush.msrb.mxu1 %v3893_v11  ;;  %v3894_v63 = vld [vmem:[#allocation4 + $0x78] sm:$0xff] }
 0x5c9   : > { %3952 = vmatpush.msrb.mxu2 %v3894_v63  ;;  %3977 = vmatpush.msrb.mxu3 %v3875_v10 }
 0x5ca   : > { %3933 = vmatpush.msrb.mxu1 %v3889_v57 }
 0x5cb   : > { %3953 = vmatpush.msrb.mxu2 %v3890_v49  ;;  %3978 = vmatpush.msrb.mxu3 %v3871_v44 }
 0x5cc   : > { %3934 = vmatpush.msrb.mxu1 %v3885_v51 }
 0x5cd   : > { %3954 = vmatpush.msrb.mxu2 %v3886_v48  ;;  %v3025_v16 = vpop.permute.xlu1 %3024  ;;  %3979 = vmatpush.msrb.mxu3 %v3867_v25  ;;  %v3088_v28 = vpop.permute.xlu0 %3087 }
 0x5ce   : > { %v3033_v22 = vsel %vm7004_vm11, %v3025_v16, %v6536_v27  ;;  %3935 = vmatpush.msrb.mxu1 %v3881_v9  ;;  %v3095_v53 = vsel %vm7005_vm7, %v6651_v50, %v3088_v28  ;;  %v3096_v52 = vsel %vm7006_vm4, %v3088_v28, %v6572_v23  ;;  %v3859_v27 = vld [vmem:[#allocation4 + $0x1a8] sm:$0xff]  ;;  %v3843_v50 = vld [vmem:[#allocation4] sm:$0xff] }
 0x5cf   : > { %3041 = vst [vmem:[#allocation4 + $0x198] sm:$0xf0] %v3033_v22  ;;  %3955 = vmatpush.msrb.mxu2 %v3882_v34  ;;  %v3872_v62 = vld [vmem:[#allocation4 + $0x10] sm:$0xff]  ;;  %3980 = vmatpush.msrb.mxu3 %v3863_v40  ;;  %v3870_v23 = vld [vmem:[#allocation4 + $0x88] sm:$0xff] }
 0x5d0   : > { %3103 = vst [vmem:[#allocation4 + $0x140] sm:$0xf] %v3095_v53  ;;  %3917 = vmatpush.msrb.mxu0 %v3872_v62  ;;  %3936 = vmatpush.msrb.mxu1 %v3877_v0 }
 0x5d1   : > { %3104 = vst [vmem:[#allocation4 + $0x190] sm:$0xf] %v3096_v52  ;;  %3956 = vmatpush.msrb.mxu2 %v3878_v41  ;;  %3981 = vmatpush.msrb.mxu3 %v3859_v27 }
 0x5d2   : > { %3937 = vmatpush.msrb.mxu1 %v3873_v31 }
 0x5d3   : > { %3957 = vmatpush.msrb.mxu2 %v3874_v54  ;;  %3982 = vmatpush.msrb.mxu3 %v3855_v43 }
 0x5d5   : > { %3958 = vmatpush.msrb.mxu2 %v3870_v23  ;;  %3983 = vmatpush.msrb.mxu3 %v3851_v18  ;;  %v3023_v32 = vpop.permute.xlu0 %3022 }
 0x5d6   : > { %v3032_v6 = vsel %vm7007_vm5, %v3023_v32, %v3025_v16  ;;  %v3865_v15 = vld [vmem:[#allocation4 + $0x198] sm:$0xff] }
 0x5d7   : > { %3959 = vmatpush.msrb.mxu2 %v3866_v4  ;;  %3040 = vst [vmem:[#allocation4 + $0x1e0] sm:$0xf0] %v3032_v6  ;;  %v3868_v19 = vld [vmem:[#allocation4 + $0x140] sm:$0xff]  ;;  %3984 = vmatpush.msrb.mxu3 %v3847_v39 }
 0x5d8   : > { %3918 = vmatpush.msrb.mxu0 %v3868_v19  ;;  %v3869_v30 = vld [vmem:[#allocation4 + $0x190] sm:$0xff] }
 0x5d9   : > { %3938 = vmatpush.msrb.mxu1 %v3869_v30  ;;  %3960 = vmatpush.msrb.mxu2 %v3862_v29 }
 0x5da   : > { %3985 = vmatpush.msrb.mxu3 %v3843_v50 }
 0x5db   : > { %3939 = vmatpush.msrb.mxu1 %v3865_v15  ;;  %3961 = vmatpush.msrb.mxu2 %v3858_v12 }
 0x5dc   : > { %3986 = vmatmul.f32.vlgmr.msrb.gmra.mxu3 %v3839_v47 }
 0x5dd   : > { %3940 = vmatpush.msrb.mxu1 %v3861_v56  ;;  %3962 = vmatpush.msrb.mxu2 %v3854_v36 }
 0x5de   : > { %v3864_v37 = vld [vmem:[#allocation4 + $0x1e0] sm:$0xff] }
 0x5df   : > { %3941 = vmatpush.msrb.mxu1 %v3857_v14  ;;  %3963 = vmatpush.msrb.mxu2 %v3850_v7 }
 0x5e0   : > { %3919 = vmatpush.msrb.mxu0 %v3864_v37 }
 0x5e1   : > { %3942 = vmatpush.msrb.mxu1 %v3853_v21  ;;  %3964 = vmatpush.msrb.mxu2 %v3846_v3 }
 0x5e2   : > { %3920 = vmatpush.msrb.mxu0 %v3860_v58 }
 0x5e3   : > { %3943 = vmatpush.msrb.mxu1 %v3849_v35  ;;  %3965 = vmatpush.msrb.mxu2 %v3842_v45 }
 0x5e4   : > { %3921 = vmatpush.msrb.mxu0 %v3856_v8  ;;  %3966 = vmatmul.f32.vlgmr.msrb.gmra.mxu2 %v3839_v47 }
 0x5e5   : > { %3944 = vmatpush.msrb.mxu1 %v3845_v24 }
 0x5e6   : > { %3922 = vmatpush.msrb.mxu0 %v3852_v1 }
 0x5e7   : > { %3945 = vmatpush.msrb.mxu1 %v3841_v13 }
 0x5e8   : > { %3923 = vmatpush.msrb.mxu0 %v3848_v26  ;;  %3946 = vmatmul.f32.vlgmr.msrb.gmra.mxu1 %v3839_v47 }
 0x5ea   : > { %3924 = vmatpush.msrb.mxu0 %v3844_v5 }
 0x5ec   : > { %3925 = vmatpush.msrb.mxu0 %v3840_v42 }
 0x5ed   : > { %3926 = vmatmul.f32.vlgmr.msrb.gmra.mxu0 %v3839_v47 }
 0x5f1   : > { %v3908_v59 = vpop.permute.xlu2 %3907 }
 0x65f   : > { %v3987_v61 = vpop.f32.mrf.mxu3 }
 0x660   : > { %v3988_v2 = vadd.f32 %v3987_v61, %v3908_v59 }
 0x662   : > { %v3993_v60 = vmax.f32 %v3988_v2, 0.0 }
 0x664   : > { %3997 = vst [vmem:[%s251_s19 + $0x18] sm:$0xff] %v3993_v60 }
 0x665   : > { %v3947_v33 = vpop.f32.mrf.mxu1 }
 0x666   : > { %v3948_v46 = vadd.f32 %v3947_v33, %v3908_v59 }
 0x667   : > { %v3967_v20 = vpop.f32.mrf.mxu2 }
 0x668   : > { %v3991_v55 = vmax.f32 %v3948_v46, 0.0  ;;  %v3968_v17 = vadd.f32 %v3967_v20, %v3908_v59 }
 0x66a   : > { %v3927_v11 = vpop.f32.mrf.mxu0  ;;  %3995 = vst [vmem:[%s251_s19 + $0x8] sm:$0xff] %v3991_v55  ;;  %v3992_v63 = vmax.f32 %v3968_v17, 0.0 }
 0x66b   : > { %v3928_v10 = vadd.f32 %v3927_v11, %v3908_v59 }
 0x66c   : > { %3996 = vst [vmem:[%s251_s19 + $0x10] sm:$0xff] %v3992_v63 }
 0x66d   : > { %v3990_v57 = vmax.f32 %v3928_v10, 0.0 }
 0x66f   : > { %3994 = vst [vmem:[%s251_s19] sm:$0xff] %v3990_v57 }
 0x670 PF: > { %s16_s21 = sadd.s32 1, %s4170_s21  }
 0x671   : > { %p13_p4 = scmp.ge.s32.totalorder %s16_s21, 4  }
 0x673   :  { %15 = sbr.rel (!%p13_p4) target bundleno = 1 (0x1), region = 230 }

</bundles_post_ra>
